<compile_context>
chip_gen: v7x
topology: tpu7x:2x2x1
jax: 0.10.0
libtpu: 0.0.40
codegen_flags: <defaults>
</compile_context>

<pallas_src>
import functools

import jax
import jax.numpy as jnp
import numpy as np
from jax import lax
from jax.experimental import pallas as pl
from jax.experimental.pallas import tpu as pltpu


def _round_up(x, m):
    return ((x + m - 1) // m) * m


# ----------------------------------------------------------------------------
# Pallas kernels
# ----------------------------------------------------------------------------
def _mm_bias_act_kernel(x_ref, w_ref, b_ref, o_ref, *, act):
    acc = jnp.dot(x_ref[...], w_ref[...], preferred_element_type=jnp.float32)
    acc = acc + b_ref[...]                          # (Mp, Np) + (1, Np)
    if act == "relu":
        acc = jnp.maximum(acc, 0.0)
    elif act == "sigmoid":
        # sigmoid(x) = 0.5*(tanh(x/2)+1): tanh uses the EUP slot and saturates
        # to [-1, 1], keeping the result exactly in [0, 1].
        acc = 0.5 * jnp.tanh(0.5 * acc) + 0.5
    o_ref[...] = acc.astype(o_ref.dtype)


def _fc_fused_kernel(x_ref, w1_ref, b1_ref, w2_ref, b2_ref, o_ref):
    h = jnp.dot(x_ref[...], w1_ref[...], preferred_element_type=jnp.float32)
    h = jnp.maximum(h + b1_ref[...], 0.0)
    u = jnp.dot(h.astype(jnp.bfloat16), w2_ref[...],
                preferred_element_type=jnp.float32)
    u = jnp.maximum(u + b2_ref[...], 0.0)
    o_ref[...] = u.astype(o_ref.dtype)


# ----------------------------------------------------------------------------
# Pallas wrappers (single-block launches; weights are pre-packed)
# ----------------------------------------------------------------------------
def matmul_bias_act(x, wmat, brow, act):
    """x: (M, Kp) bf16 (K already padded to wmat rows), wmat: (Kp, Np) bf16,
    brow: (1, Np) f32  ->  (M, Np) f32."""
    M, Kp = x.shape
    Np = wmat.shape[1]
    Mp = _round_up(M, 32)                       # bf16 sublane-tile aligned rows
    if Mp != M:
        x = jnp.pad(x, ((0, Mp - M), (0, 0)))
    out = pl.pallas_call(
        functools.partial(_mm_bias_act_kernel, act=act),
        out_shape=jax.ShapeDtypeStruct((Mp, Np), jnp.float32),
        grid=(1,),
        in_specs=[
            pl.BlockSpec((Mp, Kp), lambda i: (0, 0)),
            pl.BlockSpec((Kp, Np), lambda i: (0, 0)),
            pl.BlockSpec((1, Np), lambda i: (0, 0)),
        ],
        out_specs=pl.BlockSpec((Mp, Np), lambda i: (0, 0)),
        compiler_params=pltpu.CompilerParams(
            dimension_semantics=("arbitrary",)),
    )(x, wmat, brow)
    return out[:M] if Mp != M else out


def fc_fused(flat, w1, b1, w2, b2, n_out):
    """relu(relu(flat @ w1 + b1) @ w2 + b2) in one pallas_call."""
    B, K = flat.shape
    Mp = _round_up(B, 32)
    Kp = w1.shape[0]
    N2p = w2.shape[1]
    x = jnp.pad(flat, ((0, Mp - B), (0, Kp - K))).astype(jnp.bfloat16)
    out = pl.pallas_call(
        _fc_fused_kernel,
        out_shape=jax.ShapeDtypeStruct((Mp, N2p), jnp.float32),
        grid=(1,),
        in_specs=[
            pl.BlockSpec((Mp, Kp), lambda i: (0, 0)),
            pl.BlockSpec(w1.shape, lambda i: (0, 0)),
            pl.BlockSpec(b1.shape, lambda i: (0, 0)),
            pl.BlockSpec(w2.shape, lambda i: (0, 0)),
            pl.BlockSpec(b2.shape, lambda i: (0, 0)),
        ],
        out_specs=pl.BlockSpec((Mp, N2p), lambda i: (0, 0)),
        compiler_params=pltpu.CompilerParams(
            dimension_semantics=("arbitrary",)),
    )(x, w1, b1, w2, b2)
    return out[:B, :n_out]


# ----------------------------------------------------------------------------
# Conv / ConvTranspose layers (NHWC; im2col glue in XLA, matmul in Pallas)
# ----------------------------------------------------------------------------
def conv2d_s2(x, wmat, brow, cout, act):
    """PyTorch Conv2d(k=4, stride=2, pad=1). x: (B,H,W,Cin) NHWC f32."""
    B, H, W, cin = x.shape
    OH, OW = H // 2, W // 2
    xp = jnp.pad(x, ((0, 0), (1, 1), (1, 1), (0, 0))).astype(jnp.bfloat16)
    taps = [xp[:, kh:kh + 2 * OH:2, kw:kw + 2 * OW:2, :]
            for kh in range(4) for kw in range(4)]
    col = jnp.stack(taps, axis=3).reshape(B * OH * OW, 16 * cin)
    Kp = wmat.shape[0]
    col = jnp.pad(col, ((0, 0), (0, Kp - 16 * cin)))      # bf16, lane-dense
    out = matmul_bias_act(col, wmat, brow, act)
    return out[:, :cout].reshape(B, OH, OW, cout)


def conv_transpose2d_s2(x, wmat, brow, cout, act):
    """PyTorch ConvTranspose2d(k=4, stride=2, pad=1) via a 9-tap stride-1
    sub-pixel matmul; output columns are phase-major (r, s, co) so the
    interleave is one reshape+transpose.  x: (B,H,W,Cin) NHWC f32."""
    B, H, W, cin = x.shape
    xp = jnp.pad(x, ((0, 0), (1, 1), (1, 1), (0, 0))).astype(jnp.bfloat16)
    taps = [xp[:, oh:oh + H, ow:ow + W, :]
            for oh in range(3) for ow in range(3)]
    col = jnp.stack(taps, axis=3).reshape(B * H * W, 9 * cin)
    Kp = wmat.shape[0]
    col = jnp.pad(col, ((0, 0), (0, Kp - 9 * cin)))
    y = matmul_bias_act(col, wmat, brow, act)[:, :4 * cout]
    # y rows = (b, m, n); cols = (r, s, co);  out[b, 2m+r, 2n+s, co]
    y = y.reshape(B, H, W, 2, 2, cout)
    y = jnp.transpose(y, (0, 1, 3, 2, 4, 5)).reshape(B, 2 * H, 2 * W, cout)
    return y


# ----------------------------------------------------------------------------
# Parameter init (PyTorch-style uniform) and one-time packing
# ----------------------------------------------------------------------------
def init_params(key, emb_dim=100):
    def uinit(k, shape, fan_in):
        bound = 1.0 / np.sqrt(fan_in)
        return jax.random.uniform(k, shape, jnp.float32, -bound, bound)

    keys = jax.random.split(key, 16)
    p = {}
    p["conv1_w"] = uinit(keys[0], (12, 3, 4, 4), 3 * 16)
    p["conv1_b"] = uinit(keys[1], (12,), 3 * 16)
    p["conv2_w"] = uinit(keys[2], (24, 12, 4, 4), 12 * 16)
    p["conv2_b"] = uinit(keys[3], (24,), 12 * 16)
    p["conv3_w"] = uinit(keys[4], (48, 24, 4, 4), 24 * 16)
    p["conv3_b"] = uinit(keys[5], (48,), 24 * 16)
    p["fc1_w"] = uinit(keys[6], (768, emb_dim), 768)      # stored (in, out)
    p["fc1_b"] = uinit(keys[7], (emb_dim,), 768)
    p["fc2_w"] = uinit(keys[8], (emb_dim, 768), emb_dim)  # stored (in, out)
    p["fc2_b"] = uinit(keys[9], (768,), emb_dim)
    p["deconv1_w"] = uinit(keys[10], (48, 24, 4, 4), 48 * 16)
    p["deconv1_b"] = uinit(keys[11], (24,), 48 * 16)
    p["deconv2_w"] = uinit(keys[12], (24, 12, 4, 4), 24 * 16)
    p["deconv2_b"] = uinit(keys[13], (12,), 24 * 16)
    p["deconv3_w"] = uinit(keys[14], (12, 3, 4, 4), 12 * 16)
    p["deconv3_b"] = uinit(keys[15], (3,), 12 * 16)
    return p


def pack_params(params):
    """One-time packing into padded, pre-transposed bf16 matmul layouts."""
    def pad_mat(wmat, bias):
        K, N = wmat.shape
        Kp, Np = _round_up(K, 128), _round_up(N, 128)
        wp = np.zeros((Kp, Np), np.float32); wp[:K, :N] = wmat
        bp = np.zeros((1, Np), np.float32); bp[0, :N] = bias
        return jnp.asarray(wp, jnp.bfloat16), jnp.asarray(bp, jnp.float32)

    def pack_conv(w, b):
        w = np.asarray(w, np.float32); b = np.asarray(b, np.float32)
        cout, cin = w.shape[0], w.shape[1]
        wmat = w.transpose(2, 3, 1, 0).reshape(16 * cin, cout)  # (kh,kw,ci)->co
        return pad_mat(wmat, b)

    def pack_deconv(w, b):
        # w: (Cin, Cout, 4, 4).  Output phase (r, s): y=2m+r, x=2n+s reads
        # padded input at offsets oh in {r, r+1}, ow in {s, s+1} with kernel
        # index kh = 3 + r - 2*oh, kw = 3 + s - 2*ow.
        w = np.asarray(w, np.float32); b = np.asarray(b, np.float32)
        cin, cout = w.shape[0], w.shape[1]
        Wd = np.zeros((3, 3, cin, 2, 2, cout), np.float32)
        for r in range(2):
            for s in range(2):
                for oh in (r, r + 1):
                    for ow in (s, s + 1):
                        Wd[oh, ow, :, r, s, :] = w[:, :, 3 + r - 2 * oh,
                                                   3 + s - 2 * ow]
        return pad_mat(Wd.reshape(9 * cin, 4 * cout), np.tile(b, 4))

    def pack_linear(w, b):
        return pad_mat(np.asarray(w, np.float32), np.asarray(b, np.float32))

    packed = {}
    for name in ("conv1", "conv2", "conv3"):
        packed[name + "_wm"], packed[name + "_bv"] = pack_conv(
            params[name + "_w"], params[name + "_b"])
    for name in ("deconv1", "deconv2", "deconv3"):
        packed[name + "_wm"], packed[name + "_bv"] = pack_deconv(
            params[name + "_w"], params[name + "_b"])
    packed["fc1_wm"], packed["fc1_bv"] = pack_linear(params["fc1_w"],
                                                     params["fc1_b"])
    packed["fc2_wm"], packed["fc2_bv"] = pack_linear(params["fc2_w"],
                                                     params["fc2_b"])
    return packed


# ----------------------------------------------------------------------------
# Forward pass (matches Autoencoder.forward -> (encoded, decoded))
# ----------------------------------------------------------------------------
def autoencoder_forward(packed, x):
    B = x.shape[0]
    xh = jnp.transpose(x, (0, 2, 3, 1))                    # NCHW -> NHWC once
    # encoder
    h = conv2d_s2(xh, packed["conv1_wm"], packed["conv1_bv"], 12, "relu")
    h = conv2d_s2(h, packed["conv2_wm"], packed["conv2_bv"], 24, "relu")
    h = conv2d_s2(h, packed["conv3_wm"], packed["conv3_bv"], 48, "relu")
    encoded = jnp.transpose(h, (0, 3, 1, 2))               # (B,48,4,4) NCHW
    # compressor + uncompressor (Flatten is channel-major, like torch)
    flat = encoded.reshape(B, -1)                          # (B, 768)
    un = fc_fused(flat, packed["fc1_wm"], packed["fc1_bv"],
                  packed["fc2_wm"], packed["fc2_bv"], 768)
    un_nhwc = jnp.transpose(un.reshape(B, 48, 4, 4), (0, 2, 3, 1))
    # decoder
    d = conv_transpose2d_s2(un_nhwc, packed["deconv1_wm"],
                            packed["deconv1_bv"], 24, "relu")
    d = conv_transpose2d_s2(d, packed["deconv2_wm"],
                            packed["deconv2_bv"], 12, "relu")
    d = conv_transpose2d_s2(d, packed["deconv3_wm"],
                            packed["deconv3_bv"], 3, "sigmoid")
    decoded = jnp.transpose(d, (0, 3, 1, 2))               # NHWC -> NCHW once
    return encoded, decoded


# ----------------------------------------------------------------------------
# Pure-JAX reference (f32 lax convolutions) for numerical validation
# ----------------------------------------------------------------------------
def reference_forward(params, x):
    def conv(x, w, b):
        y = lax.conv_general_dilated(
            x, w, (2, 2), ((1, 1), (1, 1)),
            dimension_numbers=("NCHW", "OIHW", "NCHW"))
        return jax.nn.relu(y + b[None, :, None, None])

    def deconv(x, w, b, act):
        wt = jnp.flip(w, (2, 3)).transpose(1, 0, 2, 3)     # (Cout,Cin,kh,kw)
        y = lax.conv_general_dilated(
            x, wt, (1, 1), ((2, 2), (2, 2)), lhs_dilation=(2, 2),
            dimension_numbers=("NCHW", "OIHW", "NCHW"))
        y = y + b[None, :, None, None]
        return jax.nn.relu(y) if act == "relu" else jax.nn.sigmoid(y)

    h = conv(x, params["conv1_w"], params["conv1_b"])
    h = conv(h, params["conv2_w"], params["conv2_b"])
    enc = conv(h, params["conv3_w"], params["conv3_b"])
    flat = enc.reshape(enc.shape[0], -1)
    h = jax.nn.relu(flat @ params["fc1_w"] + params["fc1_b"])
    h = jax.nn.relu(h @ params["fc2_w"] + params["fc2_b"])
    d = h.reshape(-1, 48, 4, 4)
    d = deconv(d, params["deconv1_w"], params["deconv1_b"], "relu")
    d = deconv(d, params["deconv2_w"], params["deconv2_b"], "relu")
    dec = deconv(d, params["deconv3_w"], params["deconv3_b"], "sigmoid")
    return enc, dec


if __name__ == "__main__":
    key = jax.random.PRNGKey(0)
    pkey, xkey = jax.random.split(key)
    params = init_params(pkey, emb_dim=100)
    packed = pack_params(params)                 # one-time weight packing
    # Input implied by the module: 3 stride-2 convs -> (48,4,4) latent
    # => 32x32 spatial, 3 channels. Small batch = 2.
    x = jax.random.uniform(xkey, (2, 3, 32, 32), jnp.float32)

    encoded, decoded = jax.jit(autoencoder_forward)(packed, x)
    encoded = jax.block_until_ready(encoded)
    decoded = jax.block_until_ready(decoded)

    assert encoded.shape == (2, 48, 4, 4), encoded.shape
    assert decoded.shape == (2, 3, 32, 32), decoded.shape
    assert bool(jnp.all(jnp.isfinite(encoded))) and bool(jnp.all(jnp.isfinite(decoded)))
    assert bool(jnp.all(decoded >= 0.0)) and bool(jnp.all(decoded <= 1.0))

    # Numerical check against the f32 lax reference (bf16-MXU tolerance).
    enc_ref, dec_ref = jax.jit(reference_forward)(params, x)
    np.testing.assert_allclose(np.asarray(encoded), np.asarray(enc_ref),
                               atol=3e-2, rtol=3e-2)
    np.testing.assert_allclose(np.asarray(decoded), np.asarray(dec_ref),
                               atol=3e-2, rtol=3e-2)
    print("KERNEL_OK")
</pallas_src>

<mosaic_0001>
module attributes {stable_mosaic.version = 11 : i64} {
  func.func @_mm_bias_act_kernel(%arg0: i32, %arg1: memref<512x128xbf16, #tpu.memory_space<vmem>>, %arg2: memref<128x128xbf16, #tpu.memory_space<vmem>>, %arg3: memref<1x128xf32, #tpu.memory_space<vmem>>, %arg4: memref<512x128xf32, #tpu.memory_space<vmem>>) attributes {dimension_semantics = [#tpu.dimension_semantics<arbitrary>], iteration_bounds = array<i64: 1>, scalar_prefetch = 0 : i64, scratch_operands = 0 : i64, tpu.core_type = #tpu.core_type<tc>, window_params = [{pipeline_mode = #tpu.pipeline_mode<synchronous>, transform_indices = @transform_0, window_bounds = array<i64: 512, 128>}, {pipeline_mode = #tpu.pipeline_mode<synchronous>, transform_indices = @transform_1, window_bounds = array<i64: 128, 128>}, {pipeline_mode = #tpu.pipeline_mode<synchronous>, transform_indices = @transform_2, window_bounds = array<i64: 1, 128>}, {pipeline_mode = #tpu.pipeline_mode<synchronous>, transform_indices = @transform_3, window_bounds = array<i64: 512, 128>}]} {
    %c0 = arith.constant 0 : index
    %c0_0 = arith.constant 0 : index
    %0 = vector.load %arg1[%c0, %c0_0] : memref<512x128xbf16, #tpu.memory_space<vmem>>, vector<512x128xbf16>
    %c0_1 = arith.constant 0 : index
    %c0_2 = arith.constant 0 : index
    %1 = vector.load %arg2[%c0_1, %c0_2] : memref<128x128xbf16, #tpu.memory_space<vmem>>, vector<128x128xbf16>
    %cst = arith.constant dense<0.000000e+00> : vector<512x128xf32>
    %2 = tpu.matmul %0, %1, %cst {dimension_numbers = #tpu.dot_dimension_numbers<[1], [0], [0], [1], [0, 0, 1, 1], [], []>} : vector<512x128xbf16>, vector<128x128xbf16>, vector<512x128xf32> -> vector<512x128xf32>
    %c0_3 = arith.constant 0 : index
    %c0_4 = arith.constant 0 : index
    %3 = vector.load %arg3[%c0_3, %c0_4] : memref<1x128xf32, #tpu.memory_space<vmem>>, vector<1x128xf32>
    %4 = vector.broadcast %3 : vector<1x128xf32> to vector<512x128xf32>
    %5 = arith.addf %2, %4 : vector<512x128xf32>
    %cst_5 = arith.constant 0.000000e+00 : f32
    %6 = vector.broadcast %cst_5 : f32 to vector<512x128xf32>
    %7 = arith.maximumf %5, %6 : vector<512x128xf32>
    %c0_6 = arith.constant 0 : index
    %c0_7 = arith.constant 0 : index
    %8 = vector.load %arg4[%c0_6, %c0_7] : memref<512x128xf32, #tpu.memory_space<vmem>>, vector<512x128xf32>
    tpu.vector_store %arg4[%c0_6, %c0_7], %7 {strides = array<i32>} : memref<512x128xf32, #tpu.memory_space<vmem>>, vector<512x128xf32>,
    return
  }
  func.func @transform_0(%arg0: i32) -> (i32, i32) {
    %c0_i32 = arith.constant 0 : i32
    %c0_i32_0 = arith.constant 0 : i32
    %c0_i32_1 = arith.constant 0 : i32
    return %c0_i32, %c0_i32_0 : i32, i32
  }
  func.func @transform_1(%arg0: i32) -> (i32, i32) {
    %c0_i32 = arith.constant 0 : i32
    %c0_i32_0 = arith.constant 0 : i32
    %c0_i32_1 = arith.constant 0 : i32
    return %c0_i32, %c0_i32_0 : i32, i32
  }
  func.func @transform_2(%arg0: i32) -> (i32, i32) {
    %c0_i32 = arith.constant 0 : i32
    %c0_i32_0 = arith.constant 0 : i32
    %c0_i32_1 = arith.constant 0 : i32
    return %c0_i32, %c0_i32_0 : i32, i32
  }
  func.func @transform_3(%arg0: i32) -> (i32, i32) {
    %c0_i32 = arith.constant 0 : i32
    %c0_i32_0 = arith.constant 0 : i32
    %c0_i32_1 = arith.constant 0 : i32
    return %c0_i32, %c0_i32_0 : i32, i32
  }
}

module attributes {stable_mosaic.version = 11 : i64} {
  func.func @_mm_bias_act_kernel(%arg0: i32, %arg1: memref<128x256xbf16, #tpu.memory_space<vmem>>, %arg2: memref<256x128xbf16, #tpu.memory_space<vmem>>, %arg3: memref<1x128xf32, #tpu.memory_space<vmem>>, %arg4: memref<128x128xf32, #tpu.memory_space<vmem>>) attributes {dimension_semantics = [#tpu.dimension_semantics<arbitrary>], iteration_bounds = array<i64: 1>, scalar_prefetch = 0 : i64, scratch_operands = 0 : i64, tpu.core_type = #tpu.core_type<tc>, window_params = [{pipeline_mode = #tpu.pipeline_mode<synchronous>, transform_indices = @transform_0, window_bounds = array<i64: 128, 256>}, {pipeline_mode = #tpu.pipeline_mode<synchronous>, transform_indices = @transform_1, window_bounds = array<i64: 256, 128>}, {pipeline_mode = #tpu.pipeline_mode<synchronous>, transform_indices = @transform_2, window_bounds = array<i64: 1, 128>}, {pipeline_mode = #tpu.pipeline_mode<synchronous>, transform_indices = @transform_3, window_bounds = array<i64: 128, 128>}]} {
    %c0 = arith.constant 0 : index
    %c0_0 = arith.constant 0 : index
    %0 = vector.load %arg1[%c0, %c0_0] : memref<128x256xbf16, #tpu.memory_space<vmem>>, vector<128x256xbf16>
    %c0_1 = arith.constant 0 : index
    %c0_2 = arith.constant 0 : index
    %1 = vector.load %arg2[%c0_1, %c0_2] : memref<256x128xbf16, #tpu.memory_space<vmem>>, vector<256x128xbf16>
    %cst = arith.constant dense<0.000000e+00> : vector<128x128xf32>
    %2 = tpu.matmul %0, %1, %cst {dimension_numbers = #tpu.dot_dimension_numbers<[1], [0], [0], [1], [0, 0, 1, 1], [], []>} : vector<128x256xbf16>, vector<256x128xbf16>, vector<128x128xf32> -> vector<128x128xf32>
    %c0_3 = arith.constant 0 : index
    %c0_4 = arith.constant 0 : index
    %3 = vector.load %arg3[%c0_3, %c0_4] : memref<1x128xf32, #tpu.memory_space<vmem>>, vector<1x128xf32>
    %4 = vector.broadcast %3 : vector<1x128xf32> to vector<128x128xf32>
    %5 = arith.addf %2, %4 : vector<128x128xf32>
    %cst_5 = arith.constant 0.000000e+00 : f32
    %6 = vector.broadcast %cst_5 : f32 to vector<128x128xf32>
    %7 = arith.maximumf %5, %6 : vector<128x128xf32>
    %c0_6 = arith.constant 0 : index
    %c0_7 = arith.constant 0 : index
    %8 = vector.load %arg4[%c0_6, %c0_7] : memref<128x128xf32, #tpu.memory_space<vmem>>, vector<128x128xf32>
    tpu.vector_store %arg4[%c0_6, %c0_7], %7 {strides = array<i32>} : memref<128x128xf32, #tpu.memory_space<vmem>>, vector<128x128xf32>,
    return
  }
  func.func @transform_0(%arg0: i32) -> (i32, i32) {
    %c0_i32 = arith.constant 0 : i32
    %c0_i32_0 = arith.constant 0 : i32
    %c0_i32_1 = arith.constant 0 : i32
    return %c0_i32, %c0_i32_0 : i32, i32
  }
  func.func @transform_1(%arg0: i32) -> (i32, i32) {
    %c0_i32 = arith.constant 0 : i32
    %c0_i32_0 = arith.constant 0 : i32
    %c0_i32_1 = arith.constant 0 : i32
    return %c0_i32, %c0_i32_0 : i32, i32
  }
  func.func @transform_2(%arg0: i32) -> (i32, i32) {
    %c0_i32 = arith.constant 0 : i32
    %c0_i32_0 = arith.constant 0 : i32
    %c0_i32_1 = arith.constant 0 : i32
    return %c0_i32, %c0_i32_0 : i32, i32
  }
  func.func @transform_3(%arg0: i32) -> (i32, i32) {
    %c0_i32 = arith.constant 0 : i32
    %c0_i32_0 = arith.constant 0 : i32
    %c0_i32_1 = arith.constant 0 : i32
    return %c0_i32, %c0_i32_0 : i32, i32
  }
}

module attributes {stable_mosaic.version = 11 : i64} {
  func.func @_mm_bias_act_kernel(%arg0: i32, %arg1: memref<32x384xbf16, #tpu.memory_space<vmem>>, %arg2: memref<384x128xbf16, #tpu.memory_space<vmem>>, %arg3: memref<1x128xf32, #tpu.memory_space<vmem>>, %arg4: memref<32x128xf32, #tpu.memory_space<vmem>>) attributes {dimension_semantics = [#tpu.dimension_semantics<arbitrary>], iteration_bounds = array<i64: 1>, scalar_prefetch = 0 : i64, scratch_operands = 0 : i64, tpu.core_type = #tpu.core_type<tc>, window_params = [{pipeline_mode = #tpu.pipeline_mode<synchronous>, transform_indices = @transform_0, window_bounds = array<i64: 32, 384>}, {pipeline_mode = #tpu.pipeline_mode<synchronous>, transform_indices = @transform_1, window_bounds = array<i64: 384, 128>}, {pipeline_mode = #tpu.pipeline_mode<synchronous>, transform_indices = @transform_2, window_bounds = array<i64: 1, 128>}, {pipeline_mode = #tpu.pipeline_mode<synchronous>, transform_indices = @transform_3, window_bounds = array<i64: 32, 128>}]} {
    %c0 = arith.constant 0 : index
    %c0_0 = arith.constant 0 : index
    %0 = vector.load %arg1[%c0, %c0_0] : memref<32x384xbf16, #tpu.memory_space<vmem>>, vector<32x384xbf16>
    %c0_1 = arith.constant 0 : index
    %c0_2 = arith.constant 0 : index
    %1 = vector.load %arg2[%c0_1, %c0_2] : memref<384x128xbf16, #tpu.memory_space<vmem>>, vector<384x128xbf16>
    %cst = arith.constant dense<0.000000e+00> : vector<32x128xf32>
    %2 = tpu.matmul %0, %1, %cst {dimension_numbers = #tpu.dot_dimension_numbers<[1], [0], [0], [1], [0, 0, 1, 1], [], []>} : vector<32x384xbf16>, vector<384x128xbf16>, vector<32x128xf32> -> vector<32x128xf32>
    %c0_3 = arith.constant 0 : index
    %c0_4 = arith.constant 0 : index
    %3 = vector.load %arg3[%c0_3, %c0_4] : memref<1x128xf32, #tpu.memory_space<vmem>>, vector<1x128xf32>
    %4 = vector.broadcast %3 : vector<1x128xf32> to vector<32x128xf32>
    %5 = arith.addf %2, %4 : vector<32x128xf32>
    %cst_5 = arith.constant 0.000000e+00 : f32
    %6 = vector.broadcast %cst_5 : f32 to vector<32x128xf32>
    %7 = arith.maximumf %5, %6 : vector<32x128xf32>
    %c0_6 = arith.constant 0 : index
    %c0_7 = arith.constant 0 : index
    %8 = vector.load %arg4[%c0_6, %c0_7] : memref<32x128xf32, #tpu.memory_space<vmem>>, vector<32x128xf32>
    tpu.vector_store %arg4[%c0_6, %c0_7], %7 {strides = array<i32>} : memref<32x128xf32, #tpu.memory_space<vmem>>, vector<32x128xf32>,
    return
  }
  func.func @transform_0(%arg0: i32) -> (i32, i32) {
    %c0_i32 = arith.constant 0 : i32
    %c0_i32_0 = arith.constant 0 : i32
    %c0_i32_1 = arith.constant 0 : i32
    return %c0_i32, %c0_i32_0 : i32, i32
  }
  func.func @transform_1(%arg0: i32) -> (i32, i32) {
    %c0_i32 = arith.constant 0 : i32
    %c0_i32_0 = arith.constant 0 : i32
    %c0_i32_1 = arith.constant 0 : i32
    return %c0_i32, %c0_i32_0 : i32, i32
  }
  func.func @transform_2(%arg0: i32) -> (i32, i32) {
    %c0_i32 = arith.constant 0 : i32
    %c0_i32_0 = arith.constant 0 : i32
    %c0_i32_1 = arith.constant 0 : i32
    return %c0_i32, %c0_i32_0 : i32, i32
  }
  func.func @transform_3(%arg0: i32) -> (i32, i32) {
    %c0_i32 = arith.constant 0 : i32
    %c0_i32_0 = arith.constant 0 : i32
    %c0_i32_1 = arith.constant 0 : i32
    return %c0_i32, %c0_i32_0 : i32, i32
  }
}

module attributes {stable_mosaic.version = 11 : i64} {
  func.func @_fc_fused_kernel(%arg0: i32, %arg1: memref<32x768xbf16, #tpu.memory_space<vmem>>, %arg2: memref<768x128xbf16, #tpu.memory_space<vmem>>, %arg3: memref<1x128xf32, #tpu.memory_space<vmem>>, %arg4: memref<128x768xbf16, #tpu.memory_space<vmem>>, %arg5: memref<1x768xf32, #tpu.memory_space<vmem>>, %arg6: memref<32x768xf32, #tpu.memory_space<vmem>>) attributes {dimension_semantics = [#tpu.dimension_semantics<arbitrary>], iteration_bounds = array<i64: 1>, scalar_prefetch = 0 : i64, scratch_operands = 0 : i64, tpu.core_type = #tpu.core_type<tc>, window_params = [{pipeline_mode = #tpu.pipeline_mode<synchronous>, transform_indices = @transform_0, window_bounds = array<i64: 32, 768>}, {pipeline_mode = #tpu.pipeline_mode<synchronous>, transform_indices = @transform_1, window_bounds = array<i64: 768, 128>}, {pipeline_mode = #tpu.pipeline_mode<synchronous>, transform_indices = @transform_2, window_bounds = array<i64: 1, 128>}, {pipeline_mode = #tpu.pipeline_mode<synchronous>, transform_indices = @transform_3, window_bounds = array<i64: 128, 768>}, {pipeline_mode = #tpu.pipeline_mode<synchronous>, transform_indices = @transform_4, window_bounds = array<i64: 1, 768>}, {pipeline_mode = #tpu.pipeline_mode<synchronous>, transform_indices = @transform_5, window_bounds = array<i64: 32, 768>}]} {
    %c0 = arith.constant 0 : index
    %c0_0 = arith.constant 0 : index
    %0 = vector.load %arg1[%c0, %c0_0] : memref<32x768xbf16, #tpu.memory_space<vmem>>, vector<32x768xbf16>
    %c0_1 = arith.constant 0 : index
    %c0_2 = arith.constant 0 : index
    %1 = vector.load %arg2[%c0_1, %c0_2] : memref<768x128xbf16, #tpu.memory_space<vmem>>, vector<768x128xbf16>
    %cst = arith.constant dense<0.000000e+00> : vector<32x128xf32>
    %2 = tpu.matmul %0, %1, %cst {dimension_numbers = #tpu.dot_dimension_numbers<[1], [0], [0], [1], [0, 0, 1, 1], [], []>} : vector<32x768xbf16>, vector<768x128xbf16>, vector<32x128xf32> -> vector<32x128xf32>
    %c0_3 = arith.constant 0 : index
    %c0_4 = arith.constant 0 : index
    %3 = vector.load %arg3[%c0_3, %c0_4] : memref<1x128xf32, #tpu.memory_space<vmem>>, vector<1x128xf32>
    %4 = vector.broadcast %3 : vector<1x128xf32> to vector<32x128xf32>
    %5 = arith.addf %2, %4 : vector<32x128xf32>
    %cst_5 = arith.constant 0.000000e+00 : f32
    %6 = vector.broadcast %cst_5 : f32 to vector<32x128xf32>
    %7 = arith.maximumf %5, %6 : vector<32x128xf32>
    %8 = arith.truncf %7 : vector<32x128xf32> to vector<32x128xbf16>
    %c0_6 = arith.constant 0 : index
    %c0_7 = arith.constant 0 : index
    %9 = vector.load %arg4[%c0_6, %c0_7] : memref<128x768xbf16, #tpu.memory_space<vmem>>, vector<128x768xbf16>
    %cst_8 = arith.constant dense<0.000000e+00> : vector<32x768xf32>
    %10 = tpu.matmul %8, %9, %cst_8 {dimension_numbers = #tpu.dot_dimension_numbers<[1], [0], [0], [1], [0, 0, 1, 1], [], []>} : vector<32x128xbf16>, vector<128x768xbf16>, vector<32x768xf32> -> vector<32x768xf32>
    %c0_9 = arith.constant 0 : index
    %c0_10 = arith.constant 0 : index
    %11 = vector.load %arg5[%c0_9, %c0_10] : memref<1x768xf32, #tpu.memory_space<vmem>>, vector<1x768xf32>
    %12 = vector.broadcast %11 : vector<1x768xf32> to vector<32x768xf32>
    %13 = arith.addf %10, %12 : vector<32x768xf32>
    %cst_11 = arith.constant 0.000000e+00 : f32
    %14 = vector.broadcast %cst_11 : f32 to vector<32x768xf32>
    %15 = arith.maximumf %13, %14 : vector<32x768xf32>
    %c0_12 = arith.constant 0 : index
    %c0_13 = arith.constant 0 : index
    %16 = vector.load %arg6[%c0_12, %c0_13] : memref<32x768xf32, #tpu.memory_space<vmem>>, vector<32x768xf32>
    tpu.vector_store %arg6[%c0_12, %c0_13], %15 {strides = array<i32>} : memref<32x768xf32, #tpu.memory_space<vmem>>, vector<32x768xf32>,
    return
  }
  func.func @transform_0(%arg0: i32) -> (i32, i32) {
    %c0_i32 = arith.constant 0 : i32
    %c0_i32_0 = arith.constant 0 : i32
    %c0_i32_1 = arith.constant 0 : i32
    return %c0_i32, %c0_i32_0 : i32, i32
  }
  func.func @transform_1(%arg0: i32) -> (i32, i32) {
    %c0_i32 = arith.constant 0 : i32
    %c0_i32_0 = arith.constant 0 : i32
    %c0_i32_1 = arith.constant 0 : i32
    return %c0_i32, %c0_i32_0 : i32, i32
  }
  func.func @transform_2(%arg0: i32) -> (i32, i32) {
    %c0_i32 = arith.constant 0 : i32
    %c0_i32_0 = arith.constant 0 : i32
    %c0_i32_1 = arith.constant 0 : i32
    return %c0_i32, %c0_i32_0 : i32, i32
  }
  func.func @transform_3(%arg0: i32) -> (i32, i32) {
    %c0_i32 = arith.constant 0 : i32
    %c0_i32_0 = arith.constant 0 : i32
    %c0_i32_1 = arith.constant 0 : i32
    return %c0_i32, %c0_i32_0 : i32, i32
  }
  func.func @transform_4(%arg0: i32) -> (i32, i32) {
    %c0_i32 = arith.constant 0 : i32
    %c0_i32_0 = arith.constant 0 : i32
    %c0_i32_1 = arith.constant 0 : i32
    return %c0_i32, %c0_i32_0 : i32, i32
  }
  func.func @transform_5(%arg0: i32) -> (i32, i32) {
    %c0_i32 = arith.constant 0 : i32
    %c0_i32_0 = arith.constant 0 : i32
    %c0_i32_1 = arith.constant 0 : i32
    return %c0_i32, %c0_i32_0 : i32, i32
  }
}

module attributes {stable_mosaic.version = 11 : i64} {
  func.func @_mm_bias_act_kernel(%arg0: i32, %arg1: memref<32x512xbf16, #tpu.memory_space<vmem>>, %arg2: memref<512x128xbf16, #tpu.memory_space<vmem>>, %arg3: memref<1x128xf32, #tpu.memory_space<vmem>>, %arg4: memref<32x128xf32, #tpu.memory_space<vmem>>) attributes {dimension_semantics = [#tpu.dimension_semantics<arbitrary>], iteration_bounds = array<i64: 1>, scalar_prefetch = 0 : i64, scratch_operands = 0 : i64, tpu.core_type = #tpu.core_type<tc>, window_params = [{pipeline_mode = #tpu.pipeline_mode<synchronous>, transform_indices = @transform_0, window_bounds = array<i64: 32, 512>}, {pipeline_mode = #tpu.pipeline_mode<synchronous>, transform_indices = @transform_1, window_bounds = array<i64: 512, 128>}, {pipeline_mode = #tpu.pipeline_mode<synchronous>, transform_indices = @transform_2, window_bounds = array<i64: 1, 128>}, {pipeline_mode = #tpu.pipeline_mode<synchronous>, transform_indices = @transform_3, window_bounds = array<i64: 32, 128>}]} {
    %c0 = arith.constant 0 : index
    %c0_0 = arith.constant 0 : index
    %0 = vector.load %arg1[%c0, %c0_0] : memref<32x512xbf16, #tpu.memory_space<vmem>>, vector<32x512xbf16>
    %c0_1 = arith.constant 0 : index
    %c0_2 = arith.constant 0 : index
    %1 = vector.load %arg2[%c0_1, %c0_2] : memref<512x128xbf16, #tpu.memory_space<vmem>>, vector<512x128xbf16>
    %cst = arith.constant dense<0.000000e+00> : vector<32x128xf32>
    %2 = tpu.matmul %0, %1, %cst {dimension_numbers = #tpu.dot_dimension_numbers<[1], [0], [0], [1], [0, 0, 1, 1], [], []>} : vector<32x512xbf16>, vector<512x128xbf16>, vector<32x128xf32> -> vector<32x128xf32>
    %c0_3 = arith.constant 0 : index
    %c0_4 = arith.constant 0 : index
    %3 = vector.load %arg3[%c0_3, %c0_4] : memref<1x128xf32, #tpu.memory_space<vmem>>, vector<1x128xf32>
    %4 = vector.broadcast %3 : vector<1x128xf32> to vector<32x128xf32>
    %5 = arith.addf %2, %4 : vector<32x128xf32>
    %cst_5 = arith.constant 0.000000e+00 : f32
    %6 = vector.broadcast %cst_5 : f32 to vector<32x128xf32>
    %7 = arith.maximumf %5, %6 : vector<32x128xf32>
    %c0_6 = arith.constant 0 : index
    %c0_7 = arith.constant 0 : index
    %8 = vector.load %arg4[%c0_6, %c0_7] : memref<32x128xf32, #tpu.memory_space<vmem>>, vector<32x128xf32>
    tpu.vector_store %arg4[%c0_6, %c0_7], %7 {strides = array<i32>} : memref<32x128xf32, #tpu.memory_space<vmem>>, vector<32x128xf32>,
    return
  }
  func.func @transform_0(%arg0: i32) -> (i32, i32) {
    %c0_i32 = arith.constant 0 : i32
    %c0_i32_0 = arith.constant 0 : i32
    %c0_i32_1 = arith.constant 0 : i32
    return %c0_i32, %c0_i32_0 : i32, i32
  }
  func.func @transform_1(%arg0: i32) -> (i32, i32) {
    %c0_i32 = arith.constant 0 : i32
    %c0_i32_0 = arith.constant 0 : i32
    %c0_i32_1 = arith.constant 0 : i32
    return %c0_i32, %c0_i32_0 : i32, i32
  }
  func.func @transform_2(%arg0: i32) -> (i32, i32) {
    %c0_i32 = arith.constant 0 : i32
    %c0_i32_0 = arith.constant 0 : i32
    %c0_i32_1 = arith.constant 0 : i32
    return %c0_i32, %c0_i32_0 : i32, i32
  }
  func.func @transform_3(%arg0: i32) -> (i32, i32) {
    %c0_i32 = arith.constant 0 : i32
    %c0_i32_0 = arith.constant 0 : i32
    %c0_i32_1 = arith.constant 0 : i32
    return %c0_i32, %c0_i32_0 : i32, i32
  }
}

module attributes {stable_mosaic.version = 11 : i64} {
  func.func @_mm_bias_act_kernel(%arg0: i32, %arg1: memref<512x128xbf16, #tpu.memory_space<vmem>>, %arg2: memref<128x128xbf16, #tpu.memory_space<vmem>>, %arg3: memref<1x128xf32, #tpu.memory_space<vmem>>, %arg4: memref<512x128xf32, #tpu.memory_space<vmem>>) attributes {dimension_semantics = [#tpu.dimension_semantics<arbitrary>], iteration_bounds = array<i64: 1>, scalar_prefetch = 0 : i64, scratch_operands = 0 : i64, tpu.core_type = #tpu.core_type<tc>, window_params = [{pipeline_mode = #tpu.pipeline_mode<synchronous>, transform_indices = @transform_0, window_bounds = array<i64: 512, 128>}, {pipeline_mode = #tpu.pipeline_mode<synchronous>, transform_indices = @transform_1, window_bounds = array<i64: 128, 128>}, {pipeline_mode = #tpu.pipeline_mode<synchronous>, transform_indices = @transform_2, window_bounds = array<i64: 1, 128>}, {pipeline_mode = #tpu.pipeline_mode<synchronous>, transform_indices = @transform_3, window_bounds = array<i64: 512, 128>}]} {
    %c0 = arith.constant 0 : index
    %c0_0 = arith.constant 0 : index
    %0 = vector.load %arg1[%c0, %c0_0] : memref<512x128xbf16, #tpu.memory_space<vmem>>, vector<512x128xbf16>
    %c0_1 = arith.constant 0 : index
    %c0_2 = arith.constant 0 : index
    %1 = vector.load %arg2[%c0_1, %c0_2] : memref<128x128xbf16, #tpu.memory_space<vmem>>, vector<128x128xbf16>
    %cst = arith.constant dense<0.000000e+00> : vector<512x128xf32>
    %2 = tpu.matmul %0, %1, %cst {dimension_numbers = #tpu.dot_dimension_numbers<[1], [0], [0], [1], [0, 0, 1, 1], [], []>} : vector<512x128xbf16>, vector<128x128xbf16>, vector<512x128xf32> -> vector<512x128xf32>
    %c0_3 = arith.constant 0 : index
    %c0_4 = arith.constant 0 : index
    %3 = vector.load %arg3[%c0_3, %c0_4] : memref<1x128xf32, #tpu.memory_space<vmem>>, vector<1x128xf32>
    %4 = vector.broadcast %3 : vector<1x128xf32> to vector<512x128xf32>
    %5 = arith.addf %2, %4 : vector<512x128xf32>
    %cst_5 = arith.constant 5.000000e-01 : f32
    %6 = vector.broadcast %cst_5 : f32 to vector<512x128xf32>
    %7 = arith.mulf %6, %5 : vector<512x128xf32>
    %8 = math.tanh %7 : vector<512x128xf32>
    %cst_6 = arith.constant 5.000000e-01 : f32
    %9 = vector.broadcast %cst_6 : f32 to vector<512x128xf32>
    %10 = arith.mulf %9, %8 : vector<512x128xf32>
    %cst_7 = arith.constant 5.000000e-01 : f32
    %11 = vector.broadcast %cst_7 : f32 to vector<512x128xf32>
    %12 = arith.addf %10, %11 : vector<512x128xf32>
    %c0_8 = arith.constant 0 : index
    %c0_9 = arith.constant 0 : index
    %13 = vector.load %arg4[%c0_8, %c0_9] : memref<512x128xf32, #tpu.memory_space<vmem>>, vector<512x128xf32>
    tpu.vector_store %arg4[%c0_8, %c0_9], %12 {strides = array<i32>} : memref<512x128xf32, #tpu.memory_space<vmem>>, vector<512x128xf32>,
    return
  }
  func.func @transform_0(%arg0: i32) -> (i32, i32) {
    %c0_i32 = arith.constant 0 : i32
    %c0_i32_0 = arith.constant 0 : i32
    %c0_i32_1 = arith.constant 0 : i32
    return %c0_i32, %c0_i32_0 : i32, i32
  }
  func.func @transform_1(%arg0: i32) -> (i32, i32) {
    %c0_i32 = arith.constant 0 : i32
    %c0_i32_0 = arith.constant 0 : i32
    %c0_i32_1 = arith.constant 0 : i32
    return %c0_i32, %c0_i32_0 : i32, i32
  }
  func.func @transform_2(%arg0: i32) -> (i32, i32) {
    %c0_i32 = arith.constant 0 : i32
    %c0_i32_0 = arith.constant 0 : i32
    %c0_i32_1 = arith.constant 0 : i32
    return %c0_i32, %c0_i32_0 : i32, i32
  }
  func.func @transform_3(%arg0: i32) -> (i32, i32) {
    %c0_i32 = arith.constant 0 : i32
    %c0_i32_0 = arith.constant 0 : i32
    %c0_i32_1 = arith.constant 0 : i32
    return %c0_i32, %c0_i32_0 : i32, i32
  }
}

</mosaic_0001>

<bundles_post_ra>
// kernel: autoencoder_forward.7
= control target key start
LH: loop header
LB: loop body
LE: loop exit
PB: predicated region body
PF: predicated region fallthrough
CT: control target
= control target key end

     0   :  { %s1381_s1 = inlined_call_operand.vmem [shape: bf16[128,128], index: 1, kind: input, shape index: {}]   ;;  %s1382_s0 = inlined_call_operand.vmem [shape: bf16[512,128], index: 0, kind: input, shape index: {}]   ;;  %s1383_s2 = inlined_call_operand.vmem [shape: f32[1,128], index: 2, kind: input, shape index: {}]   ;;  %s1384_s3 = inlined_call_operand.vmem [shape: f32[512,128], index: 3, kind: output, shape index: {}]  }
   0x1   :  { %v940_v0 = vld [vmem:[%s1381_s1] sm:$0xff]   ;;  %v941_v1 = vld [vmem:[%s1381_s1 + $0x8] sm:$0xff]   ;;  %v942_v2 = vld [vmem:[%s1381_s1 + $0x10] sm:$0xff]  }
   0x2   :  { %844 = vmatprep.subr.bf16.mxu0 %v940_v0  ;;  %924 = vmatprep.subr.bf16.mxu1 %v940_v0  ;;  %v943_v3 = vld [vmem:[%s1381_s1 + $0x18] sm:$0xff]   ;;  %v948_v4 = vld [vmem:[%s1382_s0] sm:$0xff]   ;;  %v945_v7 = vld [vmem:[%s1381_s1 + $0x28] sm:$0xff]  }
   0x3   :  { %845 = vmatpush3.bf16.msra.mxu0 %v940_v0  ;;  %932 = vmatpush3.bf16.msra.mxu1 %v940_v0  ;;  %v949_v5 = vld [vmem:[%s1382_s0 + $0x80] sm:$0xff]   ;;  %v946_v8 = vld [vmem:[%s1381_s1 + $0x30] sm:$0xff]   ;;  %v947_v9 = vld [vmem:[%s1381_s1 + $0x38] sm:$0xff]  }
   0x4   :  { %846 = vmatprep.subr.bf16.mxu0 %v941_v1  ;;  %925 = vmatprep.subr.bf16.mxu1 %v941_v1  ;;  %v944_v6 = vld [vmem:[%s1381_s1 + $0x20] sm:$0xff]   ;;  %v950_v10 = vld [vmem:[%s1382_s0 + $0x8] sm:$0xff]   ;;  %v952_v12 = vld [vmem:[%s1382_s0 + $0x10] sm:$0xff]  }
   0x5   :  { %860 = vmatprep.mubr.bf16.mxu0 %v948_v4  ;;  %892 = vmatprep.mubr.bf16.mxu1 %v949_v5  ;;  %v951_v11 = vld [vmem:[%s1382_s0 + $0x88] sm:$0xff]   ;;  %v953_v13 = vld [vmem:[%s1382_s0 + $0x90] sm:$0xff]   ;;  %v954_v14 = vld [vmem:[%s1382_s0 + $0x18] sm:$0xff]  }
   0x6   :  { %v955_v15 = vld [vmem:[%s1382_s0 + $0x98] sm:$0xff]   ;;  %v956_v16 = vld [vmem:[%s1382_s0 + $0x20] sm:$0xff]   ;;  %v958_v18 = vld [vmem:[%s1382_s0 + $0x28] sm:$0xff]  }
   0x7   :  { %847 = vmatpush3.bf16.msra.mxu0 %v941_v1  ;;  %933 = vmatpush3.bf16.msra.mxu1 %v941_v1  ;;  %v957_v17 = vld [vmem:[%s1382_s0 + $0xa0] sm:$0xff]   ;;  %v959_v19 = vld [vmem:[%s1382_s0 + $0xa8] sm:$0xff]   ;;  %v960_v20 = vld [vmem:[%s1382_s0 + $0x30] sm:$0xff]  }
   0x8   :  { %848 = vmatprep.subr.bf16.mxu0 %v942_v2  ;;  %926 = vmatprep.subr.bf16.mxu1 %v942_v2  ;;  %v961_v21 = vld [vmem:[%s1382_s0 + $0xb0] sm:$0xff]   ;;  %v962_v22 = vld [vmem:[%s1382_s0 + $0x38] sm:$0xff]   ;;  %v964_v24 = vld [vmem:[%s1382_s0 + $0x40] sm:$0xff]  }
   0x9   :  { %v963_v23 = vld [vmem:[%s1382_s0 + $0xb8] sm:$0xff]   ;;  %v965_v25 = vld [vmem:[%s1382_s0 + $0xc0] sm:$0xff]   ;;  %v966_v26 = vld [vmem:[%s1382_s0 + $0x48] sm:$0xff]  }
   0xa   :  { %v967_v27 = vld [vmem:[%s1382_s0 + $0xc8] sm:$0xff]   ;;  %v968_v28 = vld [vmem:[%s1382_s0 + $0x50] sm:$0xff]   ;;  %v970_v30 = vld [vmem:[%s1382_s0 + $0x58] sm:$0xff]  }
   0xb   :  { %849 = vmatpush3.bf16.msra.mxu0 %v942_v2  ;;  %934 = vmatpush3.bf16.msra.mxu1 %v942_v2  ;;  %v969_v29 = vld [vmem:[%s1382_s0 + $0xd0] sm:$0xff]   ;;  %v971_v31 = vld [vmem:[%s1382_s0 + $0xd8] sm:$0xff]   ;;  %v972_v32 = vld [vmem:[%s1382_s0 + $0x60] sm:$0xff]  }
   0xc   :  { %850 = vmatprep.subr.bf16.mxu0 %v943_v3  ;;  %927 = vmatprep.subr.bf16.mxu1 %v943_v3  ;;  %v973_v33 = vld [vmem:[%s1382_s0 + $0xe0] sm:$0xff]   ;;  %v974_v34 = vld [vmem:[%s1382_s0 + $0x68] sm:$0xff]   ;;  %v976_v36 = vld [vmem:[%s1382_s0 + $0x70] sm:$0xff]  }
   0xd   :  { %v975_v35 = vld [vmem:[%s1382_s0 + $0xe8] sm:$0xff]   ;;  %v977_v37 = vld [vmem:[%s1382_s0 + $0xf0] sm:$0xff]   ;;  %v978_v38 = vld [vmem:[%s1382_s0 + $0x78] sm:$0xff]  }
   0xe   :  { %v979_v39 = vld [vmem:[%s1382_s0 + $0xf8] sm:$0xff]   ;;  %v1123_v40 = vld [vmem:[%s1383_s2] ss:$0 sm:$0xff] }
   0xf   :  { %851 = vmatpush3.bf16.msra.mxu0 %v943_v3  ;;  %935 = vmatpush3.bf16.msra.mxu1 %v943_v3 }
  0x10   :  { %852 = vmatprep.subr.bf16.mxu0 %v944_v6  ;;  %928 = vmatprep.subr.bf16.mxu1 %v944_v6 }
  0x13   :  { %853 = vmatpush3.bf16.msra.mxu0 %v944_v6  ;;  %936 = vmatpush3.bf16.msra.mxu1 %v944_v6 }
  0x14   :  { %854 = vmatprep.subr.bf16.mxu0 %v945_v7  ;;  %929 = vmatprep.subr.bf16.mxu1 %v945_v7 }
  0x17   :  { %855 = vmatpush3.bf16.msra.mxu0 %v945_v7  ;;  %937 = vmatpush3.bf16.msra.mxu1 %v945_v7 }
  0x18   :  { %856 = vmatprep.subr.bf16.mxu0 %v946_v8  ;;  %930 = vmatprep.subr.bf16.mxu1 %v946_v8 }
  0x1b   :  { %857 = vmatpush3.bf16.msra.mxu0 %v946_v8  ;;  %938 = vmatpush3.bf16.msra.mxu1 %v946_v8 }
  0x1c   :  { %858 = vmatprep.subr.bf16.mxu0 %v947_v9  ;;  %931 = vmatprep.subr.bf16.mxu1 %v947_v9 }
  0x1f   :  { %859 = vmatpush3.bf16.msra.mxu0 %v947_v9  ;;  %939 = vmatpush3.bf16.msra.mxu1 %v947_v9 }
  0x22   :  { %861 = vmatmul.mubr.bf16.vlgmr.msra.gmra.mrb[0].mxu0 %v950_v10  ;;  %893 = vmatmul.mubr.bf16.vlgmr.msra.gmra.mrb[0].mxu1 %v951_v11 }
  0x23   :  { %864 = vmatprep.mubr.bf16.mxu0 %v952_v12  ;;  %896 = vmatprep.mubr.bf16.mxu1 %v953_v13 }
  0x2a   :  { %865 = vmatmul.mubr.bf16.gmra.mrb[4].mxu0 %v954_v14  ;;  %897 = vmatmul.mubr.bf16.gmra.mrb[4].mxu1 %v955_v15 }
  0x2b   :  { %868 = vmatprep.mubr.bf16.mxu0 %v956_v16  ;;  %900 = vmatprep.mubr.bf16.mxu1 %v957_v17 }
  0x32   :  { %869 = vmatmul.mubr.bf16.gmra.mrb[8].mxu0 %v958_v18  ;;  %901 = vmatmul.mubr.bf16.gmra.mrb[8].mxu1 %v959_v19 }
  0x33   :  { %872 = vmatprep.mubr.bf16.mxu0 %v960_v20  ;;  %904 = vmatprep.mubr.bf16.mxu1 %v961_v21 }
  0x3a   :  { %873 = vmatmul.mubr.bf16.gmra.mrb[12].mxu0 %v962_v22  ;;  %905 = vmatmul.mubr.bf16.gmra.mrb[12].mxu1 %v963_v23 }
  0x3b   :  { %876 = vmatprep.mubr.bf16.mxu0 %v964_v24  ;;  %908 = vmatprep.mubr.bf16.mxu1 %v965_v25 }
  0x42   :  { %877 = vmatmul.mubr.bf16.gmra.mrb[16].mxu0 %v966_v26  ;;  %909 = vmatmul.mubr.bf16.gmra.mrb[16].mxu1 %v967_v27 }
  0x43   :  { %880 = vmatprep.mubr.bf16.mxu0 %v968_v28  ;;  %912 = vmatprep.mubr.bf16.mxu1 %v969_v29 }
  0x4a   :  { %881 = vmatmul.mubr.bf16.gmra.mrb[20].mxu0 %v970_v30  ;;  %913 = vmatmul.mubr.bf16.gmra.mrb[20].mxu1 %v971_v31 }
  0x4b   :  { %884 = vmatprep.mubr.bf16.mxu0 %v972_v32  ;;  %916 = vmatprep.mubr.bf16.mxu1 %v973_v33 }
  0x52   :  { %885 = vmatmul.mubr.bf16.gmra.mrb[24].mxu0 %v974_v34  ;;  %917 = vmatmul.mubr.bf16.gmra.mrb[24].mxu1 %v975_v35 }
  0x53   :  { %888 = vmatprep.mubr.bf16.mxu0 %v976_v36  ;;  %920 = vmatprep.mubr.bf16.mxu1 %v977_v37 }
  0x5a   :  { %889 = vmatmul.mubr.bf16.gmra.mrb[28].mxu0 %v978_v38  ;;  %921 = vmatmul.mubr.bf16.gmra.mrb[28].mxu1 %v979_v39 }
  0xf5   :  { %v862_v41 = vpop.f32.mrb[0].mxu0  ;;  %v894_v42 = vpop.f32.mrb[0].mxu1 }
  0xf6   :  { %v385_v43 = vadd.f32 %v862_v41, %v1123_v40  ;;  %v513_v44 = vadd.f32 %v894_v42, %v1123_v40  ;;  %v376_v45 = vpop.f32.mrb[1].mxu0  ;;  %v504_v46 = vpop.f32.mrb[1].mxu1 }
  0xf7   :  { %v377_v47 = vadd.f32 %v1123_v40, %v376_v45  ;;  %v505_v48 = vadd.f32 %v1123_v40, %v504_v46  ;;  %v863_v49 = vpop.f32.mrb[2].mxu0  ;;  %v895_v50 = vpop.f32.mrb[2].mxu1 }
  0xf8   :  { %v633_v51 = vmax.f32 %v385_v43, 0.0  ;;  %v665_v52 = vmax.f32 %v513_v44, 0.0  ;;  %v388_v53 = vadd.f32 %v863_v49, %v1123_v40  ;;  %v516_v54 = vadd.f32 %v895_v50, %v1123_v40  ;;  %v379_v55 = vpop.f32.mrb[3].mxu0  ;;  %v507_v56 = vpop.f32.mrb[3].mxu1 }
  0xf9   :  { %v631_v57 = vmax.f32 %v377_v47, 0.0  ;;  %v663_v58 = vmax.f32 %v505_v48, 0.0  ;;  %v380_v59 = vadd.f32 %v1123_v40, %v379_v55  ;;  %v508_v60 = vadd.f32 %v1123_v40, %v507_v56 }
  0xfa   :  { %697 = vst [vmem:[%s1384_s3 + $0x10] sm:$0xff] %v633_v51  ;;  %729 = vst [vmem:[%s1384_s3 + $0x110] sm:$0xff] %v665_v52  ;;  %v634_v61 = vmax.f32 %v388_v53, 0.0  ;;  %v666_v62 = vmax.f32 %v516_v54, 0.0 }
  0xfb   :  { %695 = vst [vmem:[%s1384_s3] sm:$0xff] %v631_v57  ;;  %727 = vst [vmem:[%s1384_s3 + $0x100] sm:$0xff] %v663_v58  ;;  %v632_v63 = vmax.f32 %v380_v59, 0.0  ;;  %v664_v0 = vmax.f32 %v508_v60, 0.0 }
  0xfc   :  { %698 = vst [vmem:[%s1384_s3 + $0x18] sm:$0xff] %v634_v61  ;;  %730 = vst [vmem:[%s1384_s3 + $0x118] sm:$0xff] %v666_v62 }
  0xfd   :  { %696 = vst [vmem:[%s1384_s3 + $0x8] sm:$0xff] %v632_v63  ;;  %728 = vst [vmem:[%s1384_s3 + $0x108] sm:$0xff] %v664_v0  ;;  %v866_v1 = vpop.f32.mrb[4].mxu0  ;;  %v898_v2 = vpop.f32.mrb[4].mxu1 }
  0xfe   :  { %v401_v3 = vadd.f32 %v866_v1, %v1123_v40  ;;  %v529_v4 = vadd.f32 %v898_v2, %v1123_v40  ;;  %v392_v5 = vpop.f32.mrb[5].mxu0  ;;  %v520_v6 = vpop.f32.mrb[5].mxu1 }
  0xff   :  { %v393_v7 = vadd.f32 %v1123_v40, %v392_v5  ;;  %v521_v8 = vadd.f32 %v1123_v40, %v520_v6  ;;  %v867_v9 = vpop.f32.mrb[6].mxu0  ;;  %v899_v10 = vpop.f32.mrb[6].mxu1 }
 0x100   :  { %v637_v11 = vmax.f32 %v401_v3, 0.0  ;;  %v669_v12 = vmax.f32 %v529_v4, 0.0  ;;  %v404_v13 = vadd.f32 %v867_v9, %v1123_v40  ;;  %v532_v14 = vadd.f32 %v899_v10, %v1123_v40  ;;  %v395_v15 = vpop.f32.mrb[7].mxu0  ;;  %v523_v16 = vpop.f32.mrb[7].mxu1 }
 0x101   :  { %v635_v17 = vmax.f32 %v393_v7, 0.0  ;;  %v667_v18 = vmax.f32 %v521_v8, 0.0  ;;  %v396_v19 = vadd.f32 %v1123_v40, %v395_v15  ;;  %v524_v20 = vadd.f32 %v1123_v40, %v523_v16 }
 0x102   :  { %701 = vst [vmem:[%s1384_s3 + $0x30] sm:$0xff] %v637_v11  ;;  %733 = vst [vmem:[%s1384_s3 + $0x130] sm:$0xff] %v669_v12  ;;  %v638_v21 = vmax.f32 %v404_v13, 0.0  ;;  %v670_v22 = vmax.f32 %v532_v14, 0.0 }
 0x103   :  { %699 = vst [vmem:[%s1384_s3 + $0x20] sm:$0xff] %v635_v17  ;;  %731 = vst [vmem:[%s1384_s3 + $0x120] sm:$0xff] %v667_v18  ;;  %v636_v23 = vmax.f32 %v396_v19, 0.0  ;;  %v668_v24 = vmax.f32 %v524_v20, 0.0 }
 0x104   :  { %702 = vst [vmem:[%s1384_s3 + $0x38] sm:$0xff] %v638_v21  ;;  %734 = vst [vmem:[%s1384_s3 + $0x138] sm:$0xff] %v670_v22 }
 0x105   :  { %700 = vst [vmem:[%s1384_s3 + $0x28] sm:$0xff] %v636_v23  ;;  %732 = vst [vmem:[%s1384_s3 + $0x128] sm:$0xff] %v668_v24  ;;  %v870_v25 = vpop.f32.mrb[8].mxu0  ;;  %v902_v26 = vpop.f32.mrb[8].mxu1 }
 0x106   :  { %v417_v27 = vadd.f32 %v870_v25, %v1123_v40  ;;  %v545_v28 = vadd.f32 %v902_v26, %v1123_v40  ;;  %v408_v29 = vpop.f32.mrb[9].mxu0  ;;  %v536_v30 = vpop.f32.mrb[9].mxu1 }
 0x107   :  { %v409_v31 = vadd.f32 %v1123_v40, %v408_v29  ;;  %v537_v32 = vadd.f32 %v1123_v40, %v536_v30  ;;  %v871_v33 = vpop.f32.mrb[10].mxu0  ;;  %v903_v34 = vpop.f32.mrb[10].mxu1 }
 0x108   :  { %v641_v35 = vmax.f32 %v417_v27, 0.0  ;;  %v673_v36 = vmax.f32 %v545_v28, 0.0  ;;  %v420_v37 = vadd.f32 %v871_v33, %v1123_v40  ;;  %v548_v38 = vadd.f32 %v903_v34, %v1123_v40  ;;  %v411_v39 = vpop.f32.mrb[11].mxu0  ;;  %v539_v41 = vpop.f32.mrb[11].mxu1 }
 0x109   :  { %v639_v42 = vmax.f32 %v409_v31, 0.0  ;;  %v671_v43 = vmax.f32 %v537_v32, 0.0  ;;  %v412_v44 = vadd.f32 %v1123_v40, %v411_v39  ;;  %v540_v45 = vadd.f32 %v1123_v40, %v539_v41 }
 0x10a   :  { %705 = vst [vmem:[%s1384_s3 + $0x50] sm:$0xff] %v641_v35  ;;  %737 = vst [vmem:[%s1384_s3 + $0x150] sm:$0xff] %v673_v36  ;;  %v642_v46 = vmax.f32 %v420_v37, 0.0  ;;  %v674_v47 = vmax.f32 %v548_v38, 0.0 }
 0x10b   :  { %703 = vst [vmem:[%s1384_s3 + $0x40] sm:$0xff] %v639_v42  ;;  %735 = vst [vmem:[%s1384_s3 + $0x140] sm:$0xff] %v671_v43  ;;  %v640_v48 = vmax.f32 %v412_v44, 0.0  ;;  %v672_v49 = vmax.f32 %v540_v45, 0.0 }
 0x10c   :  { %706 = vst [vmem:[%s1384_s3 + $0x58] sm:$0xff] %v642_v46  ;;  %738 = vst [vmem:[%s1384_s3 + $0x158] sm:$0xff] %v674_v47 }
 0x10d   :  { %704 = vst [vmem:[%s1384_s3 + $0x48] sm:$0xff] %v640_v48  ;;  %736 = vst [vmem:[%s1384_s3 + $0x148] sm:$0xff] %v672_v49  ;;  %v874_v50 = vpop.f32.mrb[12].mxu0  ;;  %v906_v51 = vpop.f32.mrb[12].mxu1 }
 0x10e   :  { %v433_v52 = vadd.f32 %v874_v50, %v1123_v40  ;;  %v561_v53 = vadd.f32 %v906_v51, %v1123_v40  ;;  %v424_v54 = vpop.f32.mrb[13].mxu0  ;;  %v552_v55 = vpop.f32.mrb[13].mxu1 }
 0x10f   :  { %v425_v56 = vadd.f32 %v1123_v40, %v424_v54  ;;  %v553_v57 = vadd.f32 %v1123_v40, %v552_v55  ;;  %v875_v58 = vpop.f32.mrb[14].mxu0  ;;  %v907_v59 = vpop.f32.mrb[14].mxu1 }
 0x110   :  { %v645_v60 = vmax.f32 %v433_v52, 0.0  ;;  %v677_v61 = vmax.f32 %v561_v53, 0.0  ;;  %v436_v62 = vadd.f32 %v875_v58, %v1123_v40  ;;  %v564_v63 = vadd.f32 %v907_v59, %v1123_v40  ;;  %v427_v0 = vpop.f32.mrb[15].mxu0  ;;  %v555_v1 = vpop.f32.mrb[15].mxu1 }
 0x111   :  { %v643_v2 = vmax.f32 %v425_v56, 0.0  ;;  %v675_v3 = vmax.f32 %v553_v57, 0.0  ;;  %v428_v4 = vadd.f32 %v1123_v40, %v427_v0  ;;  %v556_v5 = vadd.f32 %v1123_v40, %v555_v1 }
 0x112   :  { %709 = vst [vmem:[%s1384_s3 + $0x70] sm:$0xff] %v645_v60  ;;  %741 = vst [vmem:[%s1384_s3 + $0x170] sm:$0xff] %v677_v61  ;;  %v646_v6 = vmax.f32 %v436_v62, 0.0  ;;  %v678_v7 = vmax.f32 %v564_v63, 0.0 }
 0x113   :  { %707 = vst [vmem:[%s1384_s3 + $0x60] sm:$0xff] %v643_v2  ;;  %739 = vst [vmem:[%s1384_s3 + $0x160] sm:$0xff] %v675_v3  ;;  %v644_v8 = vmax.f32 %v428_v4, 0.0  ;;  %v676_v9 = vmax.f32 %v556_v5, 0.0 }
 0x114   :  { %710 = vst [vmem:[%s1384_s3 + $0x78] sm:$0xff] %v646_v6  ;;  %742 = vst [vmem:[%s1384_s3 + $0x178] sm:$0xff] %v678_v7 }
 0x115   :  { %708 = vst [vmem:[%s1384_s3 + $0x68] sm:$0xff] %v644_v8  ;;  %740 = vst [vmem:[%s1384_s3 + $0x168] sm:$0xff] %v676_v9  ;;  %v878_v10 = vpop.f32.mrb[16].mxu0  ;;  %v910_v11 = vpop.f32.mrb[16].mxu1 }
 0x116   :  { %v449_v12 = vadd.f32 %v878_v10, %v1123_v40  ;;  %v577_v13 = vadd.f32 %v910_v11, %v1123_v40  ;;  %v440_v14 = vpop.f32.mrb[17].mxu0  ;;  %v568_v15 = vpop.f32.mrb[17].mxu1 }
 0x117   :  { %v441_v16 = vadd.f32 %v1123_v40, %v440_v14  ;;  %v569_v17 = vadd.f32 %v1123_v40, %v568_v15  ;;  %v879_v18 = vpop.f32.mrb[18].mxu0  ;;  %v911_v19 = vpop.f32.mrb[18].mxu1 }
 0x118   :  { %v649_v20 = vmax.f32 %v449_v12, 0.0  ;;  %v681_v21 = vmax.f32 %v577_v13, 0.0  ;;  %v452_v22 = vadd.f32 %v879_v18, %v1123_v40  ;;  %v580_v23 = vadd.f32 %v911_v19, %v1123_v40  ;;  %v443_v24 = vpop.f32.mrb[19].mxu0  ;;  %v571_v25 = vpop.f32.mrb[19].mxu1 }
 0x119   :  { %v647_v26 = vmax.f32 %v441_v16, 0.0  ;;  %v679_v27 = vmax.f32 %v569_v17, 0.0  ;;  %v444_v28 = vadd.f32 %v1123_v40, %v443_v24  ;;  %v572_v29 = vadd.f32 %v1123_v40, %v571_v25 }
 0x11a   :  { %713 = vst [vmem:[%s1384_s3 + $0x90] sm:$0xff] %v649_v20  ;;  %745 = vst [vmem:[%s1384_s3 + $0x190] sm:$0xff] %v681_v21  ;;  %v650_v30 = vmax.f32 %v452_v22, 0.0  ;;  %v682_v31 = vmax.f32 %v580_v23, 0.0 }
 0x11b   :  { %711 = vst [vmem:[%s1384_s3 + $0x80] sm:$0xff] %v647_v26  ;;  %743 = vst [vmem:[%s1384_s3 + $0x180] sm:$0xff] %v679_v27  ;;  %v648_v32 = vmax.f32 %v444_v28, 0.0  ;;  %v680_v33 = vmax.f32 %v572_v29, 0.0 }
 0x11c   :  { %714 = vst [vmem:[%s1384_s3 + $0x98] sm:$0xff] %v650_v30  ;;  %746 = vst [vmem:[%s1384_s3 + $0x198] sm:$0xff] %v682_v31 }
 0x11d   :  { %712 = vst [vmem:[%s1384_s3 + $0x88] sm:$0xff] %v648_v32  ;;  %744 = vst [vmem:[%s1384_s3 + $0x188] sm:$0xff] %v680_v33  ;;  %v882_v34 = vpop.f32.mrb[20].mxu0  ;;  %v914_v35 = vpop.f32.mrb[20].mxu1 }
 0x11e   :  { %v465_v36 = vadd.f32 %v882_v34, %v1123_v40  ;;  %v593_v37 = vadd.f32 %v914_v35, %v1123_v40  ;;  %v456_v38 = vpop.f32.mrb[21].mxu0  ;;  %v584_v39 = vpop.f32.mrb[21].mxu1 }
 0x11f   :  { %v457_v41 = vadd.f32 %v1123_v40, %v456_v38  ;;  %v585_v42 = vadd.f32 %v1123_v40, %v584_v39  ;;  %v883_v43 = vpop.f32.mrb[22].mxu0  ;;  %v915_v44 = vpop.f32.mrb[22].mxu1 }
 0x120   :  { %v653_v45 = vmax.f32 %v465_v36, 0.0  ;;  %v685_v46 = vmax.f32 %v593_v37, 0.0  ;;  %v468_v47 = vadd.f32 %v883_v43, %v1123_v40  ;;  %v596_v48 = vadd.f32 %v915_v44, %v1123_v40  ;;  %v459_v49 = vpop.f32.mrb[23].mxu0  ;;  %v587_v50 = vpop.f32.mrb[23].mxu1 }
 0x121   :  { %v651_v51 = vmax.f32 %v457_v41, 0.0  ;;  %v683_v52 = vmax.f32 %v585_v42, 0.0  ;;  %v460_v53 = vadd.f32 %v1123_v40, %v459_v49  ;;  %v588_v54 = vadd.f32 %v1123_v40, %v587_v50 }
 0x122   :  { %717 = vst [vmem:[%s1384_s3 + $0xb0] sm:$0xff] %v653_v45  ;;  %749 = vst [vmem:[%s1384_s3 + $0x1b0] sm:$0xff] %v685_v46  ;;  %v654_v55 = vmax.f32 %v468_v47, 0.0  ;;  %v686_v56 = vmax.f32 %v596_v48, 0.0 }
 0x123   :  { %715 = vst [vmem:[%s1384_s3 + $0xa0] sm:$0xff] %v651_v51  ;;  %747 = vst [vmem:[%s1384_s3 + $0x1a0] sm:$0xff] %v683_v52  ;;  %v652_v57 = vmax.f32 %v460_v53, 0.0  ;;  %v684_v58 = vmax.f32 %v588_v54, 0.0 }
 0x124   :  { %718 = vst [vmem:[%s1384_s3 + $0xb8] sm:$0xff] %v654_v55  ;;  %750 = vst [vmem:[%s1384_s3 + $0x1b8] sm:$0xff] %v686_v56 }
 0x125   :  { %716 = vst [vmem:[%s1384_s3 + $0xa8] sm:$0xff] %v652_v57  ;;  %748 = vst [vmem:[%s1384_s3 + $0x1a8] sm:$0xff] %v684_v58  ;;  %v886_v59 = vpop.f32.mrb[24].mxu0  ;;  %v918_v60 = vpop.f32.mrb[24].mxu1 }
 0x126   :  { %v481_v61 = vadd.f32 %v886_v59, %v1123_v40  ;;  %v609_v62 = vadd.f32 %v918_v60, %v1123_v40  ;;  %v472_v63 = vpop.f32.mrb[25].mxu0  ;;  %v600_v0 = vpop.f32.mrb[25].mxu1 }
 0x127   :  { %v473_v1 = vadd.f32 %v1123_v40, %v472_v63  ;;  %v601_v2 = vadd.f32 %v1123_v40, %v600_v0  ;;  %v887_v3 = vpop.f32.mrb[26].mxu0  ;;  %v919_v4 = vpop.f32.mrb[26].mxu1 }
 0x128   :  { %v657_v5 = vmax.f32 %v481_v61, 0.0  ;;  %v689_v6 = vmax.f32 %v609_v62, 0.0  ;;  %v484_v7 = vadd.f32 %v887_v3, %v1123_v40  ;;  %v612_v8 = vadd.f32 %v919_v4, %v1123_v40  ;;  %v475_v9 = vpop.f32.mrb[27].mxu0  ;;  %v603_v10 = vpop.f32.mrb[27].mxu1 }
 0x129   :  { %v655_v11 = vmax.f32 %v473_v1, 0.0  ;;  %v687_v12 = vmax.f32 %v601_v2, 0.0  ;;  %v476_v13 = vadd.f32 %v1123_v40, %v475_v9  ;;  %v604_v14 = vadd.f32 %v1123_v40, %v603_v10 }
 0x12a   :  { %721 = vst [vmem:[%s1384_s3 + $0xd0] sm:$0xff] %v657_v5  ;;  %753 = vst [vmem:[%s1384_s3 + $0x1d0] sm:$0xff] %v689_v6  ;;  %v658_v15 = vmax.f32 %v484_v7, 0.0  ;;  %v690_v16 = vmax.f32 %v612_v8, 0.0 }
 0x12b   :  { %719 = vst [vmem:[%s1384_s3 + $0xc0] sm:$0xff] %v655_v11  ;;  %751 = vst [vmem:[%s1384_s3 + $0x1c0] sm:$0xff] %v687_v12  ;;  %v656_v17 = vmax.f32 %v476_v13, 0.0  ;;  %v688_v18 = vmax.f32 %v604_v14, 0.0 }
 0x12c   :  { %722 = vst [vmem:[%s1384_s3 + $0xd8] sm:$0xff] %v658_v15  ;;  %754 = vst [vmem:[%s1384_s3 + $0x1d8] sm:$0xff] %v690_v16 }
 0x12d   :  { %720 = vst [vmem:[%s1384_s3 + $0xc8] sm:$0xff] %v656_v17  ;;  %752 = vst [vmem:[%s1384_s3 + $0x1c8] sm:$0xff] %v688_v18  ;;  %v890_v19 = vpop.f32.mrb[28].mxu0  ;;  %v922_v20 = vpop.f32.mrb[28].mxu1 }
 0x12e   :  { %v497_v21 = vadd.f32 %v890_v19, %v1123_v40  ;;  %v625_v22 = vadd.f32 %v922_v20, %v1123_v40  ;;  %v488_v23 = vpop.f32.mrb[29].mxu0  ;;  %v616_v24 = vpop.f32.mrb[29].mxu1 }
 0x12f   :  { %v489_v25 = vadd.f32 %v1123_v40, %v488_v23  ;;  %v617_v26 = vadd.f32 %v1123_v40, %v616_v24  ;;  %v891_v27 = vpop.f32.mrb[30].mxu0  ;;  %v923_v28 = vpop.f32.mrb[30].mxu1 }
 0x130   :  { %v661_v29 = vmax.f32 %v497_v21, 0.0  ;;  %v693_v30 = vmax.f32 %v625_v22, 0.0  ;;  %v500_v31 = vadd.f32 %v891_v27, %v1123_v40  ;;  %v628_v32 = vadd.f32 %v923_v28, %v1123_v40  ;;  %v491_v33 = vpop.f32.mrb[31].mxu0  ;;  %v619_v34 = vpop.f32.mrb[31].mxu1 }
 0x131   :  { %v659_v35 = vmax.f32 %v489_v25, 0.0  ;;  %v691_v36 = vmax.f32 %v617_v26, 0.0  ;;  %v492_v37 = vadd.f32 %v1123_v40, %v491_v33  ;;  %v620_v38 = vadd.f32 %v1123_v40, %v619_v34 }
 0x132   :  { %725 = vst [vmem:[%s1384_s3 + $0xf0] sm:$0xff] %v661_v29  ;;  %757 = vst [vmem:[%s1384_s3 + $0x1f0] sm:$0xff] %v693_v30  ;;  %v662_v39 = vmax.f32 %v500_v31, 0.0  ;;  %v694_v41 = vmax.f32 %v628_v32, 0.0 }
 0x133   :  { %723 = vst [vmem:[%s1384_s3 + $0xe0] sm:$0xff] %v659_v35  ;;  %755 = vst [vmem:[%s1384_s3 + $0x1e0] sm:$0xff] %v691_v36  ;;  %v660_v42 = vmax.f32 %v492_v37, 0.0  ;;  %v692_v40 = vmax.f32 %v620_v38, 0.0 }
 0x134   :  { %726 = vst [vmem:[%s1384_s3 + $0xf8] sm:$0xff] %v662_v39  ;;  %758 = vst [vmem:[%s1384_s3 + $0x1f8] sm:$0xff] %v694_v41 }
 0x135   :  { %724 = vst [vmem:[%s1384_s3 + $0xe8] sm:$0xff] %v660_v42  ;;  %756 = vst [vmem:[%s1384_s3 + $0x1e8] sm:$0xff] %v692_v40 }

// kernel: autoencoder_forward.8
= control target key start
LH: loop header
LB: loop body
LE: loop exit
PB: predicated region body
PF: predicated region fallthrough
CT: control target
= control target key end

     0   :  { %s717_s1 = inlined_call_operand.vmem [shape: bf16[256,128], index: 1, kind: input, shape index: {}]   ;;  %s718_s0 = inlined_call_operand.vmem [shape: bf16[128,256], index: 0, kind: input, shape index: {}]   ;;  %s719_s2 = inlined_call_operand.vmem [shape: f32[1,128], index: 2, kind: input, shape index: {}]   ;;  %s720_s3 = inlined_call_operand.vmem [shape: f32[128,128], index: 3, kind: output, shape index: {}]  }
   0x1   :  { %v492_v0 = vld [vmem:[%s717_s1 + $0x40] sm:$0xff]   ;;  %v494_v2 = vld [vmem:[%s717_s1 + $0x48] sm:$0xff]   ;;  %v496_v4 = vld [vmem:[%s717_s1 + $0x50] sm:$0xff]  }
   0x2   :  { %v493_v1 = vld [vmem:[%s717_s1] sm:$0xff]   ;;  %412 = vmatprep.subr.bf16.mxu0 %v492_v0  ;;  %476 = vmatprep.subr.bf16.mxu1 %v492_v0  ;;  %v495_v3 = vld [vmem:[%s717_s1 + $0x8] sm:$0xff]   ;;  %v497_v5 = vld [vmem:[%s717_s1 + $0x10] sm:$0xff]  }
   0x3   :  { %413 = vmatpush3.bf16.msra.mxu0 %v493_v1  ;;  %484 = vmatpush3.bf16.msra.mxu1 %v493_v1  ;;  %v498_v6 = vld [vmem:[%s717_s1 + $0x58] sm:$0xff]   ;;  %v500_v8 = vld [vmem:[%s717_s1 + $0x60] sm:$0xff]   ;;  %v502_v10 = vld [vmem:[%s717_s1 + $0x68] sm:$0xff]  }
   0x4   :  { %414 = vmatprep.subr.bf16.mxu0 %v494_v2  ;;  %477 = vmatprep.subr.bf16.mxu1 %v494_v2  ;;  %v499_v7 = vld [vmem:[%s717_s1 + $0x18] sm:$0xff]   ;;  %v501_v9 = vld [vmem:[%s717_s1 + $0x20] sm:$0xff]   ;;  %v503_v13 = vld [vmem:[%s717_s1 + $0x28] sm:$0xff]  }
   0x5   :  { %v510_v11 = vld [vmem:[%s718_s0 + $0x4] ss:$8 sps:$4 sm:$0xff]   ;;  %v504_v14 = vld [vmem:[%s717_s1 + $0x70] sm:$0xff]   ;;  %v506_v16 = vld [vmem:[%s717_s1 + $0x78] sm:$0xff]  }
   0x6   :  { %v513_v12 = vld [vmem:[%s718_s0 + $0x44] ss:$8 sps:$4 sm:$0xff]   ;;  %278 = vmatprep.mubr.bf16.mxu0 %v510_v11  ;;  %v505_v15 = vld [vmem:[%s717_s1 + $0x30] sm:$0xff]   ;;  %v507_v17 = vld [vmem:[%s717_s1 + $0x38] sm:$0xff]  }
   0x7   :  { %415 = vmatpush3.bf16.msra.mxu0 %v495_v3  ;;  %485 = vmatpush3.bf16.msra.mxu1 %v495_v3  ;;  %v508_v18 = vld [vmem:[%s718_s0] ss:$8 sps:$4 sm:$0xff]   ;;  %v514_v20 = vld [vmem:[%s718_s0 + $0x14] ss:$8 sps:$4 sm:$0xff]   ;;  %v518_v22 = vld [vmem:[%s718_s0 + $0x10] ss:$8 sps:$4 sm:$0xff]  }
   0x8   :  { %416 = vmatprep.subr.bf16.mxu0 %v496_v4  ;;  %478 = vmatprep.subr.bf16.mxu1 %v496_v4  ;;  %v511_v19 = vld [vmem:[%s718_s0 + $0x40] ss:$8 sps:$4 sm:$0xff]   ;;  %v516_v21 = vld [vmem:[%s718_s0 + $0x54] ss:$8 sps:$4 sm:$0xff]   ;;  %v519_v23 = vld [vmem:[%s718_s0 + $0x50] ss:$8 sps:$4 sm:$0xff]  }
   0x9   :  { %310 = vmatprep.mubr.bf16.mxu1 %v513_v12  ;;  %v520_v24 = vld [vmem:[%s718_s0 + $0x24] ss:$8 sps:$4 sm:$0xff]   ;;  %v524_v26 = vld [vmem:[%s718_s0 + $0x20] ss:$8 sps:$4 sm:$0xff]   ;;  %v526_v28 = vld [vmem:[%s718_s0 + $0x34] ss:$8 sps:$4 sm:$0xff]  }
   0xa   :  { %v522_v25 = vld [vmem:[%s718_s0 + $0x64] ss:$8 sps:$4 sm:$0xff]   ;;  %v525_v27 = vld [vmem:[%s718_s0 + $0x60] ss:$8 sps:$4 sm:$0xff]   ;;  %v528_v29 = vld [vmem:[%s718_s0 + $0x74] ss:$8 sps:$4 sm:$0xff]  }
   0xb   :  { %417 = vmatpush3.bf16.msra.mxu0 %v497_v5  ;;  %486 = vmatpush3.bf16.msra.mxu1 %v497_v5  ;;  %v530_v30 = vld [vmem:[%s718_s0 + $0x30] ss:$8 sps:$4 sm:$0xff]   ;;  %v651_v34 = vld [vmem:[%s719_s2] ss:$0 sm:$0xff] }
   0xc   :  { %418 = vmatprep.subr.bf16.mxu0 %v498_v6  ;;  %479 = vmatprep.subr.bf16.mxu1 %v498_v6  ;;  %v531_v31 = vld [vmem:[%s718_s0 + $0x70] ss:$8 sps:$4 sm:$0xff]  }
   0xf   :  { %419 = vmatpush3.bf16.msra.mxu0 %v499_v7  ;;  %487 = vmatpush3.bf16.msra.mxu1 %v499_v7 }
  0x10   :  { %420 = vmatprep.subr.bf16.mxu0 %v500_v8  ;;  %480 = vmatprep.subr.bf16.mxu1 %v500_v8 }
  0x13   :  { %421 = vmatpush3.bf16.msra.mxu0 %v501_v9  ;;  %488 = vmatpush3.bf16.msra.mxu1 %v501_v9 }
  0x14   :  { %422 = vmatprep.subr.bf16.mxu0 %v502_v10  ;;  %481 = vmatprep.subr.bf16.mxu1 %v502_v10 }
  0x17   :  { %423 = vmatpush3.bf16.msra.mxu0 %v503_v13  ;;  %489 = vmatpush3.bf16.msra.mxu1 %v503_v13 }
  0x18   :  { %424 = vmatprep.subr.bf16.mxu0 %v504_v14  ;;  %482 = vmatprep.subr.bf16.mxu1 %v504_v14 }
  0x1b   :  { %425 = vmatpush3.bf16.msra.mxu0 %v505_v15  ;;  %490 = vmatpush3.bf16.msra.mxu1 %v505_v15 }
  0x1c   :  { %426 = vmatprep.subr.bf16.mxu0 %v506_v16  ;;  %483 = vmatprep.subr.bf16.mxu1 %v506_v16 }
  0x1f   :  { %427 = vmatpush3.bf16.msra.mxu0 %v507_v17  ;;  %491 = vmatpush3.bf16.msra.mxu1 %v507_v17 }
  0x22   :  { %279 = vmatmul.mubr.bf16.vlgmr.msra.gmra.mrb[0].mxu0 %v508_v18  ;;  %311 = vmatmul.mubr.bf16.vlgmr.msra.gmra.mrb[0].mxu1 %v511_v19 }
  0x23   :  { %286 = vmatprep.mubr.bf16.mxu0 %v514_v20  ;;  %318 = vmatprep.mubr.bf16.mxu1 %v516_v21 }
  0x2a   :  { %287 = vmatmul.mubr.bf16.gmra.mrb[4].mxu0 %v518_v22  ;;  %319 = vmatmul.mubr.bf16.gmra.mrb[4].mxu1 %v519_v23 }
  0x2b   :  { %294 = vmatprep.mubr.bf16.mxu0 %v520_v24  ;;  %326 = vmatprep.mubr.bf16.mxu1 %v522_v25 }
  0x32   :  { %295 = vmatmul.mubr.bf16.gmra.mrb[8].mxu0 %v524_v26  ;;  %327 = vmatmul.mubr.bf16.gmra.mrb[8].mxu1 %v525_v27 }
  0x33   :  { %302 = vmatprep.mubr.bf16.mxu0 %v526_v28  ;;  %334 = vmatprep.mubr.bf16.mxu1 %v528_v29 }
  0x3a   :  { %303 = vmatmul.mubr.bf16.gmra.mrb[12].mxu0 %v530_v30  ;;  %335 = vmatmul.mubr.bf16.gmra.mrb[12].mxu1 %v531_v31 }
  0xf5   :  { %v428_v32 = vpop.f32.mrb[0].mxu0  ;;  %v452_v33 = vpop.f32.mrb[0].mxu1 }
  0xf6   :  { %v429_v35 = vpop.f32.mrb[1].mxu0  ;;  %v453_v36 = vpop.f32.mrb[1].mxu1 }
  0xf7   :  { %v430_v37 = vadd.f32 %v429_v35, %v428_v32  ;;  %v454_v38 = vadd.f32 %v453_v36, %v452_v33  ;;  %v431_v39 = vpop.f32.mrb[2].mxu0  ;;  %v455_v40 = vpop.f32.mrb[2].mxu1 }
  0xf8   :  { %v432_v41 = vpop.f32.mrb[3].mxu0  ;;  %v456_v42 = vpop.f32.mrb[3].mxu1 }
  0xf9   :  { %v281_v43 = vadd.f32 %v430_v37, %v651_v34  ;;  %v313_v44 = vadd.f32 %v454_v38, %v651_v34  ;;  %v433_v45 = vadd.f32 %v432_v41, %v431_v39  ;;  %v457_v46 = vadd.f32 %v456_v42, %v455_v40 }
  0xfb   :  { %v343_v47 = vmax.f32 %v281_v43, 0.0  ;;  %v351_v48 = vmax.f32 %v313_v44, 0.0  ;;  %v284_v49 = vadd.f32 %v433_v45, %v651_v34  ;;  %v316_v50 = vadd.f32 %v457_v46, %v651_v34 }
  0xfd   :  { %359 = vst [vmem:[%s720_s3] sm:$0xff] %v343_v47  ;;  %367 = vst [vmem:[%s720_s3 + $0x40] sm:$0xff] %v351_v48  ;;  %v344_v51 = vmax.f32 %v284_v49, 0.0  ;;  %v352_v52 = vmax.f32 %v316_v50, 0.0  ;;  %v434_v53 = vpop.f32.mrb[4].mxu0  ;;  %v458_v54 = vpop.f32.mrb[4].mxu1 }
  0xfe   :  { %v435_v55 = vpop.f32.mrb[5].mxu0  ;;  %v459_v56 = vpop.f32.mrb[5].mxu1 }
  0xff   :  { %360 = vst [vmem:[%s720_s3 + $0x8] sm:$0xff] %v344_v51  ;;  %368 = vst [vmem:[%s720_s3 + $0x48] sm:$0xff] %v352_v52  ;;  %v436_v57 = vadd.f32 %v435_v55, %v434_v53  ;;  %v460_v58 = vadd.f32 %v459_v56, %v458_v54  ;;  %v437_v59 = vpop.f32.mrb[6].mxu0  ;;  %v461_v60 = vpop.f32.mrb[6].mxu1 }
 0x100   :  { %v438_v61 = vpop.f32.mrb[7].mxu0  ;;  %v462_v62 = vpop.f32.mrb[7].mxu1 }
 0x101   :  { %v289_v63 = vadd.f32 %v436_v57, %v651_v34  ;;  %v321_v0 = vadd.f32 %v460_v58, %v651_v34  ;;  %v439_v1 = vadd.f32 %v438_v61, %v437_v59  ;;  %v463_v2 = vadd.f32 %v462_v62, %v461_v60 }
 0x103   :  { %v345_v3 = vmax.f32 %v289_v63, 0.0  ;;  %v353_v4 = vmax.f32 %v321_v0, 0.0  ;;  %v292_v5 = vadd.f32 %v439_v1, %v651_v34  ;;  %v324_v6 = vadd.f32 %v463_v2, %v651_v34 }
 0x105   :  { %361 = vst [vmem:[%s720_s3 + $0x10] sm:$0xff] %v345_v3  ;;  %369 = vst [vmem:[%s720_s3 + $0x50] sm:$0xff] %v353_v4  ;;  %v346_v7 = vmax.f32 %v292_v5, 0.0  ;;  %v354_v8 = vmax.f32 %v324_v6, 0.0  ;;  %v440_v9 = vpop.f32.mrb[8].mxu0  ;;  %v464_v10 = vpop.f32.mrb[8].mxu1 }
 0x106   :  { %v441_v11 = vpop.f32.mrb[9].mxu0  ;;  %v465_v12 = vpop.f32.mrb[9].mxu1 }
 0x107   :  { %362 = vst [vmem:[%s720_s3 + $0x18] sm:$0xff] %v346_v7  ;;  %370 = vst [vmem:[%s720_s3 + $0x58] sm:$0xff] %v354_v8  ;;  %v442_v13 = vadd.f32 %v441_v11, %v440_v9  ;;  %v466_v14 = vadd.f32 %v465_v12, %v464_v10  ;;  %v443_v15 = vpop.f32.mrb[10].mxu0  ;;  %v467_v16 = vpop.f32.mrb[10].mxu1 }
 0x108   :  { %v444_v17 = vpop.f32.mrb[11].mxu0  ;;  %v468_v18 = vpop.f32.mrb[11].mxu1 }
 0x109   :  { %v297_v19 = vadd.f32 %v442_v13, %v651_v34  ;;  %v329_v20 = vadd.f32 %v466_v14, %v651_v34  ;;  %v445_v21 = vadd.f32 %v444_v17, %v443_v15  ;;  %v469_v22 = vadd.f32 %v468_v18, %v467_v16 }
 0x10b   :  { %v347_v23 = vmax.f32 %v297_v19, 0.0  ;;  %v355_v24 = vmax.f32 %v329_v20, 0.0  ;;  %v300_v25 = vadd.f32 %v445_v21, %v651_v34  ;;  %v332_v26 = vadd.f32 %v469_v22, %v651_v34 }
 0x10d   :  { %363 = vst [vmem:[%s720_s3 + $0x20] sm:$0xff] %v347_v23  ;;  %371 = vst [vmem:[%s720_s3 + $0x60] sm:$0xff] %v355_v24  ;;  %v348_v27 = vmax.f32 %v300_v25, 0.0  ;;  %v356_v28 = vmax.f32 %v332_v26, 0.0  ;;  %v446_v29 = vpop.f32.mrb[12].mxu0  ;;  %v470_v30 = vpop.f32.mrb[12].mxu1 }
 0x10e   :  { %v447_v31 = vpop.f32.mrb[13].mxu0  ;;  %v471_v32 = vpop.f32.mrb[13].mxu1 }
 0x10f   :  { %364 = vst [vmem:[%s720_s3 + $0x28] sm:$0xff] %v348_v27  ;;  %372 = vst [vmem:[%s720_s3 + $0x68] sm:$0xff] %v356_v28  ;;  %v448_v33 = vadd.f32 %v447_v31, %v446_v29  ;;  %v472_v35 = vadd.f32 %v471_v32, %v470_v30  ;;  %v449_v36 = vpop.f32.mrb[14].mxu0  ;;  %v473_v37 = vpop.f32.mrb[14].mxu1 }
 0x110   :  { %v450_v38 = vpop.f32.mrb[15].mxu0  ;;  %v474_v39 = vpop.f32.mrb[15].mxu1 }
 0x111   :  { %v305_v40 = vadd.f32 %v448_v33, %v651_v34  ;;  %v337_v41 = vadd.f32 %v472_v35, %v651_v34  ;;  %v451_v42 = vadd.f32 %v450_v38, %v449_v36  ;;  %v475_v43 = vadd.f32 %v474_v39, %v473_v37 }
 0x113   :  { %v349_v44 = vmax.f32 %v305_v40, 0.0  ;;  %v357_v45 = vmax.f32 %v337_v41, 0.0  ;;  %v308_v46 = vadd.f32 %v451_v42, %v651_v34  ;;  %v340_v47 = vadd.f32 %v475_v43, %v651_v34 }
 0x115   :  { %365 = vst [vmem:[%s720_s3 + $0x30] sm:$0xff] %v349_v44  ;;  %373 = vst [vmem:[%s720_s3 + $0x70] sm:$0xff] %v357_v45  ;;  %v350_v48 = vmax.f32 %v308_v46, 0.0  ;;  %v358_v49 = vmax.f32 %v340_v47, 0.0 }
 0x117   :  { %366 = vst [vmem:[%s720_s3 + $0x38] sm:$0xff] %v350_v48  ;;  %374 = vst [vmem:[%s720_s3 + $0x78] sm:$0xff] %v358_v49 }

// kernel: autoencoder_forward.9
= control target key start
LH: loop header
LB: loop body
LE: loop exit
PB: predicated region body
PF: predicated region fallthrough
CT: control target
= control target key end

     0   :  { %s610_s1 = inlined_call_operand.vmem [shape: bf16[384,128], index: 1, kind: input, shape index: {}]   ;;  %s611_s0 = inlined_call_operand.vmem [shape: bf16[32,384], index: 0, kind: input, shape index: {}]   ;;  %s612_s2 = inlined_call_operand.vmem [shape: f32[1,128], index: 2, kind: input, shape index: {}]   ;;  %s613_s3 = inlined_call_operand.vmem [shape: f32[32,128], index: 3, kind: output, shape index: {}]  }
   0x1   :  { %v453_v0 = vld [vmem:[%s610_s1 + $0x40] sm:$0xff]   ;;  %v455_v2 = vld [vmem:[%s610_s1 + $0x48] sm:$0xff]   ;;  %v458_v5 = vld [vmem:[%s610_s1 + $0x50] sm:$0xff]  }
   0x2   :  { %v454_v1 = vld [vmem:[%s610_s1] sm:$0xff]   ;;  %395 = vmatprep.subr.bf16.mxu0 %v453_v0  ;;  %v457_v4 = vld [vmem:[%s610_s1 + $0x8] sm:$0xff]   ;;  %v460_v7 = vld [vmem:[%s610_s1 + $0x10] sm:$0xff]  }
   0x3   :  { %396 = vmatpush3.bf16.msra.mxu0 %v454_v1  ;;  %v456_v3 = vld [vmem:[%s610_s1 + $0x80] sm:$0xff]   ;;  %v459_v6 = vld [vmem:[%s610_s1 + $0x88] sm:$0xff]   ;;  %v461_v8 = vld [vmem:[%s610_s1 + $0x58] sm:$0xff]  }
   0x4   :  { %397 = vmatprep.subr.bf16.mxu0 %v455_v2  ;;  %433 = vmatprep.subr.bf16.mxu1 %v456_v3  ;;  %v462_v9 = vld [vmem:[%s610_s1 + $0x90] sm:$0xff]   ;;  %v463_v10 = vld [vmem:[%s610_s1 + $0x18] sm:$0xff]   ;;  %v464_v11 = vld [vmem:[%s610_s1 + $0x60] sm:$0xff]  }
   0x5   :  { %434 = vmatpush3.bf16.msra.mxu1 %v456_v3  ;;  %v465_v12 = vld [vmem:[%s610_s1 + $0x98] sm:$0xff]   ;;  %v466_v13 = vld [vmem:[%s610_s1 + $0x20] sm:$0xff]   ;;  %v467_v15 = vld [vmem:[%s610_s1 + $0x68] sm:$0xff]  }
   0x6   :  { %435 = vmatprep.subr.bf16.mxu1 %v459_v6  ;;  %v468_v14 = vld [vmem:[%s610_s1 + $0xa0] sm:$0xff]   ;;  %v469_v16 = vld [vmem:[%s610_s1 + $0x28] sm:$0xff]   ;;  %v470_v18 = vld [vmem:[%s610_s1 + $0x70] sm:$0xff]  }
   0x7   :  { %398 = vmatpush3.bf16.msra.mxu0 %v457_v4  ;;  %v471_v17 = vld [vmem:[%s610_s1 + $0xa8] sm:$0xff]   ;;  %v472_v19 = vld [vmem:[%s610_s1 + $0x30] sm:$0xff]   ;;  %v473_v20 = vld [vmem:[%s610_s1 + $0x78] sm:$0xff]  }
   0x8   :  { %399 = vmatprep.subr.bf16.mxu0 %v458_v5  ;;  %v474_v21 = vld [vmem:[%s610_s1 + $0xb0] sm:$0xff]   ;;  %v475_v23 = vld [vmem:[%s610_s1 + $0x38] sm:$0xff]   ;;  %v476_v26 = vld [vmem:[%s611_s0] ss:$12 sps:$4 sm:$0xff]  }
   0x9   :  { %436 = vmatpush3.bf16.msra.mxu1 %v459_v6  ;;  %v478_v22 = vld [vmem:[%s611_s0 + $0x4] ss:$12 sps:$4 sm:$0xff]   ;;  %v480_v24 = vld [vmem:[%s611_s0 + $0x8] ss:$12 sps:$4 sm:$0xff]   ;;  %v479_v25 = vld [vmem:[%s610_s1 + $0xb8] sm:$0xff]  }
   0xa   :  { %437 = vmatprep.subr.bf16.mxu1 %v462_v9  ;;  %286 = vmatprep.mubr.bf16.mxu0 %v478_v22  ;;  %v482_v27 = vld [vmem:[%s611_s0 + $0x1c] ss:$12 sps:$4 sm:$0xff]   ;;  %v481_v28 = vld [vmem:[%s611_s0 + $0x20] ss:$12 sps:$4 sm:$0xff]   ;;  %v484_v29 = vld [vmem:[%s611_s0 + $0x18] ss:$12 sps:$4 sm:$0xff]  }
   0xb   :  { %400 = vmatpush3.bf16.msra.mxu0 %v460_v7  ;;  %449 = vmatprep.mubr.bf16.mxu1 %v480_v24  ;;  %v364_v32 = vld [vmem:[%s612_s2] ss:$0 sm:$0xff] }
   0xc   :  { %401 = vmatprep.subr.bf16.mxu0 %v461_v8 }
   0xd   :  { %438 = vmatpush3.bf16.msra.mxu1 %v462_v9 }
   0xe   :  { %439 = vmatprep.subr.bf16.mxu1 %v465_v12 }
   0xf   :  { %402 = vmatpush3.bf16.msra.mxu0 %v463_v10 }
  0x10   :  { %403 = vmatprep.subr.bf16.mxu0 %v464_v11 }
  0x11   :  { %440 = vmatpush3.bf16.msra.mxu1 %v465_v12 }
  0x12   :  { %441 = vmatprep.subr.bf16.mxu1 %v468_v14 }
  0x13   :  { %404 = vmatpush3.bf16.msra.mxu0 %v466_v13 }
  0x14   :  { %405 = vmatprep.subr.bf16.mxu0 %v467_v15 }
  0x15   :  { %442 = vmatpush3.bf16.msra.mxu1 %v468_v14 }
  0x16   :  { %443 = vmatprep.subr.bf16.mxu1 %v471_v17 }
  0x17   :  { %406 = vmatpush3.bf16.msra.mxu0 %v469_v16 }
  0x18   :  { %407 = vmatprep.subr.bf16.mxu0 %v470_v18 }
  0x19   :  { %444 = vmatpush3.bf16.msra.mxu1 %v471_v17 }
  0x1a   :  { %445 = vmatprep.subr.bf16.mxu1 %v474_v21 }
  0x1b   :  { %408 = vmatpush3.bf16.msra.mxu0 %v472_v19 }
  0x1c   :  { %409 = vmatprep.subr.bf16.mxu0 %v473_v20 }
  0x1d   :  { %446 = vmatpush3.bf16.msra.mxu1 %v474_v21 }
  0x1e   :  { %447 = vmatprep.subr.bf16.mxu1 %v479_v25 }
  0x1f   :  { %410 = vmatpush3.bf16.msra.mxu0 %v475_v23 }
  0x21   :  { %448 = vmatpush3.bf16.msra.mxu1 %v479_v25 }
  0x22   :  { %287 = vmatmul.mubr.bf16.vlgmr.msra.gmra.mrb[0].mxu0 %v476_v26 }
  0x23   :  { %294 = vmatprep.mubr.bf16.mxu0 %v482_v27 }
  0x24   :  { %450 = vmatmul.mubr.bf16.vlgmr.msra.gmra.mrb[0].mxu1 %v481_v28 }
  0x2a   :  { %295 = vmatmul.mubr.bf16.gmra.mrb[4].mxu0 %v484_v29 }
  0xf5   :  { %v411_v30 = vpop.f32.mrb[0].mxu0 }
  0xf6   :  { %v412_v31 = vpop.f32.mrb[1].mxu0 }
  0xf7   :  { %v413_v33 = vadd.f32 %v412_v31, %v411_v30  ;;  %v414_v34 = vpop.f32.mrb[2].mxu0  ;;  %v451_v36 = vpop.f32.mrb[0].mxu1 }
  0xf8   :  { %v415_v35 = vpop.f32.mrb[3].mxu0  ;;  %v337_v39 = vpop.f32.mrb[1].mxu1 }
  0xf9   :  { %v416_v37 = vadd.f32 %v415_v35, %v414_v34  ;;  %v289_v38 = vadd.f32 %v413_v33, %v364_v32  ;;  %v452_v40 = vpop.f32.mrb[2].mxu1 }
  0xfa   :  { %v340_v43 = vpop.f32.mrb[3].mxu1 }
  0xfb   :  { %v338_v41 = vadd.f32 %v337_v39, %v289_v38  ;;  %v292_v42 = vadd.f32 %v416_v37, %v364_v32 }
  0xfd   :  { %v352_v44 = vmax.f32 %v338_v41, 0.0  ;;  %v341_v45 = vadd.f32 %v340_v43, %v292_v42  ;;  %v417_v46 = vpop.f32.mrb[4].mxu0 }
  0xfe   :  { %v418_v47 = vpop.f32.mrb[5].mxu0 }
  0xff   :  { %356 = vst [vmem:[%s613_s3] sm:$0xff] %v352_v44  ;;  %v353_v48 = vmax.f32 %v341_v45, 0.0  ;;  %v419_v49 = vadd.f32 %v418_v47, %v417_v46  ;;  %v420_v50 = vpop.f32.mrb[6].mxu0 }
 0x100   :  { %v421_v51 = vpop.f32.mrb[7].mxu0 }
 0x101   :  { %357 = vst [vmem:[%s613_s3 + $0x8] sm:$0xff] %v353_v48  ;;  %v297_v52 = vadd.f32 %v419_v49, %v364_v32  ;;  %v422_v53 = vadd.f32 %v421_v51, %v420_v50 }
 0x103   :  { %v346_v54 = vadd.f32 %v451_v36, %v297_v52  ;;  %v300_v55 = vadd.f32 %v422_v53, %v364_v32 }
 0x105   :  { %v354_v56 = vmax.f32 %v346_v54, 0.0  ;;  %v349_v57 = vadd.f32 %v452_v40, %v300_v55 }
 0x107   :  { %358 = vst [vmem:[%s613_s3 + $0x10] sm:$0xff] %v354_v56  ;;  %v355_v58 = vmax.f32 %v349_v57, 0.0 }
 0x109   :  { %359 = vst [vmem:[%s613_s3 + $0x18] sm:$0xff] %v355_v58 }

// kernel: autoencoder_forward.10
= control target key start
LH: loop header
LB: loop body
LE: loop exit
PB: predicated region body
PF: predicated region fallthrough
CT: control target
= control target key end

     0   :  { %s1955_s1 = inlined_call_operand.vmem [shape: bf16[768,128], index: 1, kind: input, shape index: {}]   ;;  %s1956_s0 = inlined_call_operand.vmem [shape: bf16[32,768], index: 0, kind: input, shape index: {}]   ;;  %s1957_s3 = inlined_call_operand.vmem [shape: bf16[128,768], index: 3, kind: input, shape index: {}]   ;;  %s1958_s2 = inlined_call_operand.vmem [shape: f32[1,128], index: 2, kind: input, shape index: {}]   ;;  %s1959_s4 = inlined_call_operand.vmem [shape: f32[1,768], index: 4, kind: input, shape index: {}]   ;;  %s1960_s5 = inlined_call_operand.vmem [shape: f32[32,768], index: 5, kind: output, shape index: {}]  }
   0x1   :  { %v1362_v0 = vld [vmem:[%s1955_s1 + $0x40] sm:$0xff]   ;;  %v1366_v4 = vld [vmem:[%s1955_s1 + $0x48] sm:$0xff]   ;;  %v1370_v8 = vld [vmem:[%s1955_s1 + $0x50] sm:$0xff]  }
   0x2   :  { %v1363_v1 = vld [vmem:[%s1955_s1] sm:$0xff]   ;;  %1277 = vmatprep.subr.bf16.mxu0 %v1362_v0  ;;  %v1367_v5 = vld [vmem:[%s1955_s1 + $0x8] sm:$0xff]   ;;  %v1371_v9 = vld [vmem:[%s1955_s1 + $0x10] sm:$0xff]  }
   0x3   :  { %v1364_v2 = vld [vmem:[%s1955_s1 + $0xc0] sm:$0xff]   ;;  %1278 = vmatpush3.bf16.msra.mxu0 %v1363_v1  ;;  %v1368_v6 = vld [vmem:[%s1955_s1 + $0xc8] sm:$0xff]   ;;  %v1372_v10 = vld [vmem:[%s1955_s1 + $0xd0] sm:$0xff]  }
   0x4   :  { %v1365_v3 = vld [vmem:[%s1955_s1 + $0x80] sm:$0xff]   ;;  %1305 = vmatprep.subr.bf16.mxu1 %v1364_v2  ;;  %1279 = vmatprep.subr.bf16.mxu0 %v1366_v4  ;;  %v1369_v7 = vld [vmem:[%s1955_s1 + $0x88] sm:$0xff]   ;;  %v1373_v11 = vld [vmem:[%s1955_s1 + $0x90] sm:$0xff]  }
   0x5   :  { %1306 = vmatpush3.bf16.msra.mxu1 %v1365_v3  ;;  %v1374_v12 = vld [vmem:[%s1955_s1 + $0x58] sm:$0xff]   ;;  %v1378_v16 = vld [vmem:[%s1955_s1 + $0x60] sm:$0xff]   ;;  %v1382_v20 = vld [vmem:[%s1955_s1 + $0x68] sm:$0xff]  }
   0x6   :  { %1307 = vmatprep.subr.bf16.mxu1 %v1368_v6  ;;  %v1375_v13 = vld [vmem:[%s1955_s1 + $0x18] sm:$0xff]   ;;  %v1379_v17 = vld [vmem:[%s1955_s1 + $0x20] sm:$0xff]   ;;  %v1383_v21 = vld [vmem:[%s1955_s1 + $0x28] sm:$0xff]  }
   0x7   :  { %1280 = vmatpush3.bf16.msra.mxu0 %v1367_v5  ;;  %v1376_v14 = vld [vmem:[%s1955_s1 + $0xd8] sm:$0xff]   ;;  %v1380_v18 = vld [vmem:[%s1955_s1 + $0xe0] sm:$0xff]   ;;  %v1384_v22 = vld [vmem:[%s1955_s1 + $0xe8] sm:$0xff]  }
   0x8   :  { %1281 = vmatprep.subr.bf16.mxu0 %v1370_v8  ;;  %v1377_v15 = vld [vmem:[%s1955_s1 + $0x98] sm:$0xff]   ;;  %v1381_v19 = vld [vmem:[%s1955_s1 + $0xa0] sm:$0xff]   ;;  %v1385_v23 = vld [vmem:[%s1955_s1 + $0xa8] sm:$0xff]  }
   0x9   :  { %1308 = vmatpush3.bf16.msra.mxu1 %v1369_v7  ;;  %v1386_v24 = vld [vmem:[%s1955_s1 + $0x70] sm:$0xff]   ;;  %v1390_v28 = vld [vmem:[%s1955_s1 + $0x78] sm:$0xff]   ;;  %v1397_v34 = vld [vmem:[%s1955_s1 + $0x140] sm:$0xff]  }
   0xa   :  { %1309 = vmatprep.subr.bf16.mxu1 %v1372_v10  ;;  %v1387_v25 = vld [vmem:[%s1955_s1 + $0x30] sm:$0xff]   ;;  %v1391_v29 = vld [vmem:[%s1955_s1 + $0x38] sm:$0xff]   ;;  %v1398_v35 = vld [vmem:[%s1956_s0 + $0x8] ss:$24 sps:$4 sm:$0xff]  }
   0xb   :  { %1282 = vmatpush3.bf16.msra.mxu0 %v1371_v9  ;;  %v1388_v26 = vld [vmem:[%s1955_s1 + $0xf0] sm:$0xff]   ;;  %v1392_v30 = vld [vmem:[%s1955_s1 + $0xf8] sm:$0xff]   ;;  %v1400_v36 = vld [vmem:[%s1956_s0 + $0xc] ss:$24 sps:$4 sm:$0xff]  }
   0xc   :  { %1283 = vmatprep.subr.bf16.mxu0 %v1374_v12  ;;  %v1389_v27 = vld [vmem:[%s1955_s1 + $0xb0] sm:$0xff]   ;;  %v1393_v31 = vld [vmem:[%s1956_s0] ss:$24 sps:$4 sm:$0xff]   ;;  %v1395_v32 = vld [vmem:[%s1956_s0 + $0x4] ss:$24 sps:$4 sm:$0xff]   ;;  %565 = vmatprep.mubr.bf16.mxu1 %v1400_v36 }
   0xd   :  { %1310 = vmatpush3.bf16.msra.mxu1 %v1373_v11  ;;  %v1396_v33 = vld [vmem:[%s1955_s1 + $0xb8] sm:$0xff]   ;;  %516 = vmatprep.mubr.bf16.mxu0 %v1395_v32  ;;  %v1401_v37 = vld [vmem:[%s1955_s1 + $0x100] sm:$0xff]   ;;  %v1402_v38 = vld [vmem:[%s1955_s1 + $0x148] sm:$0xff]  }
   0xe   :  { %1311 = vmatprep.subr.bf16.mxu1 %v1376_v14  ;;  %v1403_v39 = vld [vmem:[%s1955_s1 + $0x108] sm:$0xff]   ;;  %v1404_v40 = vld [vmem:[%s1955_s1 + $0x150] sm:$0xff]   ;;  %v1406_v42 = vld [vmem:[%s1955_s1 + $0x158] sm:$0xff]  }
   0xf   :  { %1284 = vmatpush3.bf16.msra.mxu0 %v1375_v13  ;;  %v1405_v41 = vld [vmem:[%s1955_s1 + $0x110] sm:$0xff]   ;;  %v1407_v44 = vld [vmem:[%s1955_s1 + $0x118] sm:$0xff]   ;;  %v1408_v46 = vld [vmem:[%s1955_s1 + $0x160] sm:$0xff]  }
  0x10   :  { %1285 = vmatprep.subr.bf16.mxu0 %v1378_v16  ;;  %v1410_v43 = vld [vmem:[%s1956_s0 + $0x34] ss:$24 sps:$4 sm:$0xff]   ;;  %v1413_v45 = vld [vmem:[%s1956_s0 + $0x30] ss:$24 sps:$4 sm:$0xff]   ;;  %v1409_v49 = vld [vmem:[%s1955_s1 + $0x120] sm:$0xff]  }
  0x11   :  { %1312 = vmatpush3.bf16.msra.mxu1 %v1377_v15  ;;  %v1415_v47 = vld [vmem:[%s1956_s0 + $0x3c] ss:$24 sps:$4 sm:$0xff]   ;;  %v1417_v48 = vld [vmem:[%s1956_s0 + $0x38] ss:$24 sps:$4 sm:$0xff]   ;;  %v1412_v50 = vld [vmem:[%s1955_s1 + $0x168] sm:$0xff]  }
  0x12   :  { %1313 = vmatprep.subr.bf16.mxu1 %v1380_v18  ;;  %v1414_v51 = vld [vmem:[%s1955_s1 + $0x128] sm:$0xff]   ;;  %v1418_v53 = vld [vmem:[%s1955_s1 + $0x170] sm:$0xff]   ;;  %v1420_v55 = vld [vmem:[%s1955_s1 + $0x178] sm:$0xff]  }
  0x13   :  { %1286 = vmatpush3.bf16.msra.mxu0 %v1379_v17  ;;  %v1424_v52 = vld [vmem:[%s1956_s0 + $0x14] ss:$24 sps:$4 sm:$0xff]   ;;  %v1421_v56 = vld [vmem:[%s1955_s1 + $0x138] sm:$0xff]   ;;  %v1422_v57 = vld [vmem:[%s1956_s0 + $0x10] ss:$24 sps:$4 sm:$0xff]  }
  0x14   :  { %1287 = vmatprep.subr.bf16.mxu0 %v1382_v20  ;;  %v1419_v54 = vld [vmem:[%s1955_s1 + $0x130] sm:$0xff]   ;;  %v1425_v58 = vld [vmem:[%s1956_s0 + $0x44] ss:$24 sps:$4 sm:$0xff]   ;;  %v1427_v59 = vld [vmem:[%s1956_s0 + $0x40] ss:$24 sps:$4 sm:$0xff]  }
  0x15   :  { %1314 = vmatpush3.bf16.msra.mxu1 %v1381_v19  ;;  %v1428_v60 = vld [vmem:[%s1957_s3] ss:$24 sps:$4 sm:$0xff]   ;;  %v1430_v61 = vld [vmem:[%s1957_s3 + $0x4] ss:$24 sps:$4 sm:$0xff]   ;;  %v1434_v0 = vld [vmem:[%s1957_s3 + $0x30] ss:$24 sps:$4 sm:$0xff]  }
  0x16   :  { %1315 = vmatprep.subr.bf16.mxu1 %v1384_v22  ;;  %v1431_v62 = vld [vmem:[%s1957_s3 + $0x8] ss:$24 sps:$4 sm:$0xff]   ;;  %v1433_v63 = vld [vmem:[%s1957_s3 + $0xc] ss:$24 sps:$4 sm:$0xff]   ;;  %v1437_v2 = vld [vmem:[%s1957_s3 + $0x38] ss:$24 sps:$4 sm:$0xff]  }
  0x17   :  { %1288 = vmatpush3.bf16.msra.mxu0 %v1383_v21  ;;  %v1436_v1 = vld [vmem:[%s1957_s3 + $0x34] ss:$24 sps:$4 sm:$0xff]   ;;  %v1442_v4 = vld [vmem:[%s1957_s3 + $0x64] ss:$24 sps:$4 sm:$0xff]   ;;  %v1440_v5 = vld [vmem:[%s1957_s3 + $0x60] ss:$24 sps:$4 sm:$0xff]  }
  0x18   :  { %1289 = vmatprep.subr.bf16.mxu0 %v1386_v24  ;;  %v1439_v3 = vld [vmem:[%s1957_s3 + $0x3c] ss:$24 sps:$4 sm:$0xff]   ;;  %v1445_v6 = vld [vmem:[%s1957_s3 + $0x6c] ss:$24 sps:$4 sm:$0xff]   ;;  %v1443_v7 = vld [vmem:[%s1957_s3 + $0x68] ss:$24 sps:$4 sm:$0xff]  }
  0x19   :  { %1316 = vmatpush3.bf16.msra.mxu1 %v1385_v23  ;;  %v1448_v8 = vld [vmem:[%s1957_s3 + $0x94] ss:$24 sps:$4 sm:$0xff]   ;;  %v1446_v10 = vld [vmem:[%s1957_s3 + $0x90] ss:$24 sps:$4 sm:$0xff]   ;;  %v1454_v12 = vld [vmem:[%s1957_s3 + $0xc4] ss:$24 sps:$4 sm:$0xff]  }
  0x1a   :  { %1317 = vmatprep.subr.bf16.mxu1 %v1388_v26  ;;  %v1451_v9 = vld [vmem:[%s1957_s3 + $0x9c] ss:$24 sps:$4 sm:$0xff]   ;;  %v1449_v11 = vld [vmem:[%s1957_s3 + $0x98] ss:$24 sps:$4 sm:$0xff]   ;;  %v1457_v14 = vld [vmem:[%s1957_s3 + $0xcc] ss:$24 sps:$4 sm:$0xff]  }
  0x1b   :  { %1290 = vmatpush3.bf16.msra.mxu0 %v1387_v25  ;;  %v1452_v13 = vld [vmem:[%s1957_s3 + $0xc0] ss:$24 sps:$4 sm:$0xff]   ;;  %v1460_v16 = vld [vmem:[%s1957_s3 + $0xf4] ss:$24 sps:$4 sm:$0xff]   ;;  %v1458_v17 = vld [vmem:[%s1957_s3 + $0xf0] ss:$24 sps:$4 sm:$0xff]  }
  0x1c   :  { %1291 = vmatprep.subr.bf16.mxu0 %v1390_v28  ;;  %v1455_v15 = vld [vmem:[%s1957_s3 + $0xc8] ss:$24 sps:$4 sm:$0xff]   ;;  %v1463_v18 = vld [vmem:[%s1957_s3 + $0xfc] ss:$24 sps:$4 sm:$0xff]   ;;  %v1461_v19 = vld [vmem:[%s1957_s3 + $0xf8] ss:$24 sps:$4 sm:$0xff]  }
  0x1d   :  { %1318 = vmatpush3.bf16.msra.mxu1 %v1389_v27  ;;  %v1466_v20 = vld [vmem:[%s1957_s3 + $0x124] ss:$24 sps:$4 sm:$0xff]   ;;  %v1464_v21 = vld [vmem:[%s1957_s3 + $0x120] ss:$24 sps:$4 sm:$0xff]   ;;  %v1472_v24 = vld [vmem:[%s1957_s3 + $0x154] ss:$24 sps:$4 sm:$0xff]  }
  0x1e   :  { %1319 = vmatprep.subr.bf16.mxu1 %v1392_v30  ;;  %v1469_v22 = vld [vmem:[%s1957_s3 + $0x12c] ss:$24 sps:$4 sm:$0xff]   ;;  %v1467_v23 = vld [vmem:[%s1957_s3 + $0x128] ss:$24 sps:$4 sm:$0xff]   ;;  %v1475_v26 = vld [vmem:[%s1957_s3 + $0x15c] ss:$24 sps:$4 sm:$0xff]  }
  0x1f   :  { %1292 = vmatpush3.bf16.msra.mxu0 %v1391_v29  ;;  %v1470_v25 = vld [vmem:[%s1957_s3 + $0x150] ss:$24 sps:$4 sm:$0xff]   ;;  %v1478_v28 = vld [vmem:[%s1957_s3 + $0x14] ss:$24 sps:$4 sm:$0xff]   ;;  %v1500_v29 = vmov 0  }
  0x20   :  { %1333 = vmatprep.subr.bf16.mxu0 %v1397_v34  ;;  %v1473_v27 = vld [vmem:[%s1957_s3 + $0x158] ss:$24 sps:$4 sm:$0xff]  }
  0x21   :  { %1320 = vmatpush3.bf16.msra.mxu1 %v1396_v33 }
  0x22   :  { %517 = vmatmul.mubr.bf16.vlgmr.msra.gmra.mrb[0].mxu0 %v1393_v31  ;;  %957 = vmatprep.subr.bf16.mxu1 %v1430_v61  ;;  %v1168_v31 = vld [vmem:[%s1958_s2] ss:$0 sm:$0xff] }
  0x23   :  { %1334 = vmatpush3.bf16.msra.mxu0 %v1401_v37  ;;  %524 = vmatprep.mubr.bf16.mxu0 %v1410_v43 }
  0x24   :  { %566 = vmatmul.mubr.bf16.vlgmr.msra.gmra.mrb[0].mxu1 %v1398_v35  ;;  %1335 = vmatprep.subr.bf16.mxu0 %v1402_v38 }
  0x25   :  { %573 = vmatprep.mubr.bf16.mxu1 %v1415_v47  ;;  %958 = vmatpush1.bf16.msra.mxu1 %v1428_v60 }
  0x26   :  { %959 = vmatprep.subr.bf16.mxu1 %v1436_v1 }
  0x27   :  { %1336 = vmatpush3.bf16.msra.mxu0 %v1403_v39 }
  0x28   :  { %1337 = vmatprep.subr.bf16.mxu0 %v1404_v40 }
  0x29   :  { %960 = vmatpush1.bf16.msra.mxu1 %v1434_v0 }
  0x2a   :  { %525 = vmatmul.mubr.bf16.gmra.mrb[4].mxu0 %v1413_v45  ;;  %961 = vmatprep.subr.bf16.mxu1 %v1442_v4 }
  0x2b   :  { %1338 = vmatpush3.bf16.msra.mxu0 %v1405_v41  ;;  %614 = vmatprep.mubr.bf16.mxu0 %v1424_v52 }
  0x2c   :  { %1339 = vmatprep.subr.bf16.mxu0 %v1406_v42  ;;  %574 = vmatmul.mubr.bf16.gmra.mrb[4].mxu1 %v1417_v48 }
  0x2d   :  { %962 = vmatpush1.bf16.msra.mxu1 %v1440_v5  ;;  %989 = vmatprep.mubr.bf16.mxu1 %v1500_v29 }
  0x2e   :  { %963 = vmatprep.subr.bf16.mxu1 %v1448_v8 }
  0x2f   :  { %1340 = vmatpush3.bf16.msra.mxu0 %v1407_v44 }
  0x30   :  { %1341 = vmatprep.subr.bf16.mxu0 %v1408_v46 }
  0x31   :  { %964 = vmatpush1.bf16.msra.mxu1 %v1446_v10 }
  0x32   :  { %965 = vmatprep.subr.bf16.mxu1 %v1454_v12 }
  0x33   :  { %1342 = vmatpush3.bf16.msra.mxu0 %v1409_v49 }
  0x34   :  { %1343 = vmatprep.subr.bf16.mxu0 %v1412_v50 }
  0x35   :  { %966 = vmatpush1.bf16.msra.mxu1 %v1452_v13 }
  0x36   :  { %967 = vmatprep.subr.bf16.mxu1 %v1460_v16 }
  0x37   :  { %1344 = vmatpush3.bf16.msra.mxu0 %v1414_v51 }
  0x38   :  { %1345 = vmatprep.subr.bf16.mxu0 %v1418_v53 }
  0x39   :  { %968 = vmatpush1.bf16.msra.mxu1 %v1458_v17 }
  0x3a   :  { %969 = vmatprep.subr.bf16.mxu1 %v1466_v20 }
  0x3b   :  { %1346 = vmatpush3.bf16.msra.mxu0 %v1419_v54 }
  0x3c   :  { %1347 = vmatprep.subr.bf16.mxu0 %v1420_v55 }
  0x3d   :  { %970 = vmatpush1.bf16.msra.mxu1 %v1464_v21  ;;  %v1484_v21 = vld [vmem:[%s1957_s3 + $0x74] ss:$24 sps:$4 sm:$0xff]  }
  0x3e   :  { %971 = vmatprep.subr.bf16.mxu1 %v1472_v24  ;;  %v1482_v24 = vld [vmem:[%s1957_s3 + $0x70] ss:$24 sps:$4 sm:$0xff]  }
  0x3f   :  { %1348 = vmatpush3.bf16.msra.mxu0 %v1421_v56 }
  0x40   :  { %1010 = vmatprep.subr.bf16.mxu0 %v1433_v63 }
  0x41   :  { %972 = vmatpush1.bf16.msra.mxu1 %v1470_v25 }
  0x42   :  { %615 = vmatmul.mubr.bf16.vlgmr.msra.gmra.mrb[8].mxu0 %v1422_v57  ;;  %1063 = vmatprep.subr.bf16.mxu1 %v1478_v28  ;;  %v1490_v28 = vld [vmem:[%s1957_s3 + $0xd4] ss:$24 sps:$4 sm:$0xff]  }
  0x43   :  { %622 = vmatprep.mubr.bf16.mxu0 %v1425_v58  ;;  %1011 = vmatpush1.bf16.msra.mxu0 %v1431_v62 }
  0x44   :  { %1012 = vmatprep.subr.bf16.mxu0 %v1439_v3 }
  0x47   :  { %1013 = vmatpush1.bf16.msra.mxu0 %v1437_v2 }
  0x48   :  { %1014 = vmatprep.subr.bf16.mxu0 %v1445_v6 }
  0x4a   :  { %623 = vmatmul.mubr.bf16.gmra.mrb[12].mxu0 %v1427_v59 }
  0x4b   :  { %1015 = vmatpush1.bf16.msra.mxu0 %v1443_v7  ;;  %1042 = vmatprep.mubr.bf16.mxu0 %v1500_v29 }
  0x4c   :  { %1016 = vmatprep.subr.bf16.mxu0 %v1451_v9 }
  0x4f   :  { %1017 = vmatpush1.bf16.msra.mxu0 %v1449_v11  ;;  %v1476_v11 = vld [vmem:[%s1957_s3 + $0x10] ss:$24 sps:$4 sm:$0xff]  }
  0x50   :  { %1018 = vmatprep.subr.bf16.mxu0 %v1457_v14 }
  0x53   :  { %1019 = vmatpush1.bf16.msra.mxu0 %v1455_v15  ;;  %v1481_v15 = vld [vmem:[%s1957_s3 + $0x44] ss:$24 sps:$4 sm:$0xff]  }
  0x54   :  { %1020 = vmatprep.subr.bf16.mxu0 %v1463_v18 }
  0x57   :  { %1021 = vmatpush1.bf16.msra.mxu0 %v1461_v19  ;;  %v1479_v19 = vld [vmem:[%s1957_s3 + $0x40] ss:$24 sps:$4 sm:$0xff]  }
  0x58   :  { %1022 = vmatprep.subr.bf16.mxu0 %v1469_v22 }
  0x5b   :  { %1023 = vmatpush1.bf16.msra.mxu0 %v1467_v23 }
  0x5c   :  { %1024 = vmatprep.subr.bf16.mxu0 %v1475_v26  ;;  %v1487_v26 = vld [vmem:[%s1957_s3 + $0xa4] ss:$24 sps:$4 sm:$0xff]  }
  0x5f   :  { %1025 = vmatpush1.bf16.msra.mxu0 %v1473_v27  ;;  %v1485_v27 = vld [vmem:[%s1957_s3 + $0xa0] ss:$24 sps:$4 sm:$0xff]  }
  0xf5   :  { %v1293_v30 = vpop.f32.mrb[0].mxu0 }
  0xf6   :  { %v1294_v32 = vpop.f32.mrb[1].mxu0 }
  0xf7   :  { %v1295_v33 = vadd.f32 %v1294_v32, %v1293_v30  ;;  %v1296_v34 = vpop.f32.mrb[2].mxu0  ;;  %v1321_v35 = vpop.f32.mrb[0].mxu1  ;;  %v1488_v30 = vld [vmem:[%s1957_s3 + $0xd0] ss:$24 sps:$4 sm:$0xff]   ;;  %v1491_v32 = vld [vmem:[%s1957_s3 + $0x100] ss:$24 sps:$4 sm:$0xff]  }
  0xf8   :  { %v1297_v36 = vpop.f32.mrb[3].mxu0  ;;  %v1322_v39 = vpop.f32.mrb[1].mxu1 }
  0xf9   :  { %v519_v37 = vadd.f32 %v1295_v33, %v1168_v31  ;;  %v1298_v38 = vadd.f32 %v1297_v36, %v1296_v34  ;;  %v1323_v40 = vadd.f32 %v1322_v39, %v1321_v35  ;;  %v1324_v41 = vpop.f32.mrb[2].mxu1  ;;  %v1496_v33 = vld [vmem:[%s1957_s3 + $0x134] ss:$24 sps:$4 sm:$0xff]   ;;  %v1494_v34 = vld [vmem:[%s1957_s3 + $0x130] ss:$24 sps:$4 sm:$0xff]  }
  0xfa   :  { %v1325_v43 = vpop.f32.mrb[3].mxu1  ;;  %v1499_v35 = vld [vmem:[%s1957_s3 + $0x164] ss:$24 sps:$4 sm:$0xff]   ;;  %v1497_v36 = vld [vmem:[%s1957_s3 + $0x160] ss:$24 sps:$4 sm:$0xff]  }
  0xfb   :  { %v522_v42 = vadd.f32 %v1298_v38, %v1168_v31  ;;  %v568_v44 = vadd.f32 %v1323_v40, %v519_v37  ;;  %v1326_v45 = vadd.f32 %v1325_v43, %v1324_v41  ;;  %v687_v37 = vlaneseq  ;;  %v1871_v41 = vld [vmem:[%s1959_s4] sm:$0x3f] }
  0xfd   :  { %v571_v46 = vadd.f32 %v1326_v45, %v522_v42  ;;  %v1299_v47 = vpop.f32.mrb[4].mxu0  ;;  %v1864_v38 = vshrl.u32 %v687_v37, 7 }
  0xfe   :  { %v1300_v48 = vpop.f32.mrb[5].mxu0 }
  0xff   :  { %v1301_v49 = vadd.f32 %v1300_v48, %v1299_v47  ;;  %v1302_v50 = vpop.f32.mrb[6].mxu0  ;;  %v1327_v51 = vpop.f32.mrb[4].mxu1  ;;  %v689_v39 = vsub.s32 0, %v1864_v38  ;;  %v697_v40 = vsub.s32 2, %v1864_v38  ;;  %v693_v42 = vsub.s32 1, %v1864_v38 }
 0x100   :  { %v1303_v52 = vpop.f32.mrb[7].mxu0  ;;  %v1328_v55 = vpop.f32.mrb[5].mxu1  ;;  %v701_v43 = vsub.s32 3, %v1864_v38 }
 0x101   :  { %v527_v53 = vadd.f32 %v1301_v49, %v1168_v31  ;;  %v1304_v54 = vadd.f32 %v1303_v52, %v1302_v50  ;;  %v1329_v56 = vadd.f32 %v1328_v55, %v1327_v51  ;;  %v1330_v57 = vpop.f32.mrb[6].mxu1  ;;  %v694_v45 = vrot.slane %v1871_v41, %v693_v42 }
 0x102   :  { %v1331_v59 = vpop.f32.mrb[7].mxu1 }
 0x103   :  { %v530_v58 = vadd.f32 %v1304_v54, %v1168_v31  ;;  %v576_v60 = vadd.f32 %v1329_v56, %v527_v53  ;;  %v1332_v61 = vadd.f32 %v1331_v59, %v1330_v57  ;;  %v1493_v31 = vld [vmem:[%s1957_s3 + $0x104] ss:$24 sps:$4 sm:$0xff]  }
 0x105   :  { %v579_v62 = vadd.f32 %v1332_v61, %v530_v58 }
 0x115   :  { %v1349_v63 = vpop.f32.mrb[8].mxu0 }
 0x116   :  { %v1350_v0 = vpop.f32.mrb[9].mxu0 }
 0x117   :  { %v1351_v1 = vadd.f32 %v1350_v0, %v1349_v63  ;;  %v1352_v2 = vpop.f32.mrb[10].mxu0 }
 0x118   :  { %v1353_v3 = vpop.f32.mrb[11].mxu0 }
 0x119   :  { %v617_v4 = vadd.f32 %v1351_v1, %v568_v44  ;;  %v1354_v5 = vadd.f32 %v1353_v3, %v1352_v2  ;;  %v690_v44 = vrot.slane %v1871_v41, %v689_v39 }
 0x11b   :  { %v620_v6 = vadd.f32 %v1354_v5, %v571_v46  ;;  %v631_v7 = vmax.f32 %v617_v4, 0.0  ;;  %v702_v46 = vrot.slane %v1871_v41, %v701_v43 }
 0x11d   :  { %v632_v8 = vmax.f32 %v620_v6, 0.0  ;;  %v1355_v9 = vpop.f32.mrb[12].mxu0 }
 0x11e   :  { %v1356_v10 = vpop.f32.mrb[13].mxu0 }
 0x11f   :  { %v635_v12 = vpack.c.bf16 %v632_v8, %v631_v7  ;;  %v1357_v13 = vadd.f32 %v1356_v10, %v1355_v9  ;;  %v1358_v14 = vpop.f32.mrb[14].mxu0 }
 0x120   :  { %v1359_v16 = vpop.f32.mrb[15].mxu0 }
 0x121   :  { %v625_v17 = vadd.f32 %v1357_v13, %v576_v60  ;;  %v1360_v18 = vadd.f32 %v1359_v16, %v1358_v14  ;;  %990 = vmatmul.mubr.bf16.vlgmr.msra.gmra.mrb[8].mxu1 %v635_v12  ;;  %1043 = vmatmul.mubr.bf16.vlgmr.msra.gmra.mrb[16].mxu0 %v635_v12 }
 0x122   :  { %1064 = vmatpush1.bf16.msra.mxu1 %v1476_v11  ;;  %999 = vmatprep.mubr.bf16.mxu1 %v1500_v29 }
 0x123   :  { %v628_v20 = vadd.f32 %v1360_v18, %v579_v62  ;;  %1065 = vmatprep.subr.bf16.mxu1 %v1481_v15  ;;  %1052 = vmatprep.mubr.bf16.mxu0 %v1500_v29  ;;  %v633_v22 = vmax.f32 %v625_v17, 0.0 }
 0x125   :  { %v634_v23 = vmax.f32 %v628_v20, 0.0 }
 0x126   :  { %1066 = vmatpush1.bf16.msra.mxu1 %v1479_v19 }
 0x127   :  { %1067 = vmatprep.subr.bf16.mxu1 %v1484_v21  ;;  %v636_v25 = vpack.c.bf16 %v634_v23, %v633_v22 }
 0x129   :  { %1000 = vmatmul.mubr.bf16.gmra.mrb[12].mxu1 %v636_v25  ;;  %1053 = vmatmul.mubr.bf16.gmra.mrb[20].mxu0 %v636_v25 }
 0x12a   :  { %1068 = vmatpush1.bf16.msra.mxu1 %v1482_v24  ;;  %1095 = vmatprep.mubr.bf16.mxu1 %v1500_v29 }
 0x12b   :  { %1069 = vmatprep.subr.bf16.mxu1 %v1487_v26 }
 0x12e   :  { %1070 = vmatpush1.bf16.msra.mxu1 %v1485_v27 }
 0x12f   :  { %1071 = vmatprep.subr.bf16.mxu1 %v1490_v28 }
 0x132   :  { %1072 = vmatpush1.bf16.msra.mxu1 %v1488_v30 }
 0x133   :  { %1073 = vmatprep.subr.bf16.mxu1 %v1493_v31 }
 0x136   :  { %1074 = vmatpush1.bf16.msra.mxu1 %v1491_v32  ;;  %v705_v32 = vsub.s32 4, %v1864_v38 }
 0x137   :  { %1075 = vmatprep.subr.bf16.mxu1 %v1496_v33  ;;  %v709_v33 = vsub.s32 5, %v1864_v38 }
 0x13a   :  { %1076 = vmatpush1.bf16.msra.mxu1 %v1494_v34  ;;  %v706_v34 = vrot.slane %v1871_v41, %v705_v32 }
 0x13b   :  { %1077 = vmatprep.subr.bf16.mxu1 %v1499_v35  ;;  %v710_v35 = vrot.slane %v1871_v41, %v709_v33 }
 0x13e   :  { %1078 = vmatpush1.bf16.msra.mxu1 %v1497_v36 }
 0x141   :  { %1096 = vmatmul.mubr.bf16.vlgmr.msra.gmra.mrb[16].mxu1 %v635_v12 }
 0x142   :  { %1105 = vmatprep.mubr.bf16.mxu1 %v1500_v29  ;;  %v698_v29 = vrot.slane %v1871_v41, %v697_v40 }
 0x149   :  { %1106 = vmatmul.mubr.bf16.gmra.mrb[20].mxu1 %v636_v25 }
 0x1f4   :  { %v991_v47 = vpop.f32.mrb[8].mxu1  ;;  %v1044_v48 = vpop.f32.mrb[16].mxu0 }
 0x1f5   :  { %v992_v49 = vadd.f32 %v991_v47, %v690_v44  ;;  %v1045_v50 = vadd.f32 %v1044_v48, %v698_v29  ;;  %v993_v51 = vpop.f32.mrb[9].mxu1  ;;  %v1046_v52 = vpop.f32.mrb[17].mxu0 }
 0x1f6   :  { %v994_v53 = vadd.f32 %v993_v51, %v694_v45  ;;  %v1047_v54 = vadd.f32 %v1046_v52, %v702_v46  ;;  %v995_v55 = vpop.f32.mrb[10].mxu1  ;;  %v1048_v56 = vpop.f32.mrb[18].mxu0 }
 0x1f7   :  { %v1116_v57 = vmax.f32 %v992_v49, 0.0  ;;  %v1118_v58 = vmax.f32 %v1045_v50, 0.0  ;;  %v996_v59 = vadd.f32 %v995_v55, %v690_v44  ;;  %v1049_v60 = vadd.f32 %v1048_v56, %v698_v29  ;;  %v997_v61 = vpop.f32.mrb[11].mxu1  ;;  %v1050_v62 = vpop.f32.mrb[19].mxu0 }
 0x1f8   :  { %v1117_v63 = vmax.f32 %v994_v53, 0.0  ;;  %v1119_v0 = vmax.f32 %v1047_v54, 0.0  ;;  %v998_v1 = vadd.f32 %v997_v61, %v694_v45  ;;  %v1051_v2 = vadd.f32 %v1050_v62, %v702_v46 }
 0x1f9   :  { %1140 = vst [vmem:[%s1960_s5] sm:$0xff] %v1116_v57  ;;  %1142 = vst [vmem:[%s1960_s5 + $0x10] sm:$0xff] %v1118_v58  ;;  %v1122_v3 = vmax.f32 %v996_v59, 0.0  ;;  %v1124_v4 = vmax.f32 %v1049_v60, 0.0 }
 0x1fa   :  { %1141 = vst [vmem:[%s1960_s5 + $0x8] sm:$0xff] %v1117_v63  ;;  %1143 = vst [vmem:[%s1960_s5 + $0x18] sm:$0xff] %v1119_v0  ;;  %v1123_v5 = vmax.f32 %v998_v1, 0.0  ;;  %v1125_v6 = vmax.f32 %v1051_v2, 0.0 }
 0x1fb   :  { %1146 = vst [vmem:[%s1960_s5 + $0x30] sm:$0xff] %v1122_v3  ;;  %1148 = vst [vmem:[%s1960_s5 + $0x40] sm:$0xff] %v1124_v4 }
 0x1fc   :  { %1147 = vst [vmem:[%s1960_s5 + $0x38] sm:$0xff] %v1123_v5  ;;  %1149 = vst [vmem:[%s1960_s5 + $0x48] sm:$0xff] %v1125_v6  ;;  %v1001_v7 = vpop.f32.mrb[12].mxu1  ;;  %v1054_v8 = vpop.f32.mrb[20].mxu0 }
 0x1fd   :  { %v1002_v9 = vadd.f32 %v1001_v7, %v690_v44  ;;  %v1055_v10 = vadd.f32 %v1054_v8, %v698_v29  ;;  %v1003_v11 = vpop.f32.mrb[13].mxu1  ;;  %v1056_v12 = vpop.f32.mrb[21].mxu0 }
 0x1fe   :  { %v1004_v13 = vadd.f32 %v1003_v11, %v694_v45  ;;  %v1057_v14 = vadd.f32 %v1056_v12, %v702_v46  ;;  %v1005_v15 = vpop.f32.mrb[14].mxu1  ;;  %v1058_v16 = vpop.f32.mrb[22].mxu0 }
 0x1ff   :  { %v1128_v17 = vmax.f32 %v1002_v9, 0.0  ;;  %v1130_v18 = vmax.f32 %v1055_v10, 0.0  ;;  %v1006_v19 = vadd.f32 %v1005_v15, %v690_v44  ;;  %v1059_v20 = vadd.f32 %v1058_v16, %v698_v29  ;;  %v1007_v21 = vpop.f32.mrb[15].mxu1  ;;  %v1060_v22 = vpop.f32.mrb[23].mxu0 }
 0x200   :  { %v1129_v23 = vmax.f32 %v1004_v13, 0.0  ;;  %v1131_v24 = vmax.f32 %v1057_v14, 0.0  ;;  %v1008_v25 = vadd.f32 %v1007_v21, %v694_v45  ;;  %v1061_v26 = vadd.f32 %v1060_v22, %v702_v46 }
 0x201   :  { %1152 = vst [vmem:[%s1960_s5 + $0x60] sm:$0xff] %v1128_v17  ;;  %1154 = vst [vmem:[%s1960_s5 + $0x70] sm:$0xff] %v1130_v18  ;;  %v1134_v27 = vmax.f32 %v1006_v19, 0.0  ;;  %v1136_v28 = vmax.f32 %v1059_v20, 0.0 }
 0x202   :  { %1153 = vst [vmem:[%s1960_s5 + $0x68] sm:$0xff] %v1129_v23  ;;  %1155 = vst [vmem:[%s1960_s5 + $0x78] sm:$0xff] %v1131_v24  ;;  %v1135_v30 = vmax.f32 %v1008_v25, 0.0  ;;  %v1137_v31 = vmax.f32 %v1061_v26, 0.0 }
 0x203   :  { %1158 = vst [vmem:[%s1960_s5 + $0x90] sm:$0xff] %v1134_v27  ;;  %1160 = vst [vmem:[%s1960_s5 + $0xa0] sm:$0xff] %v1136_v28 }
 0x204   :  { %1159 = vst [vmem:[%s1960_s5 + $0x98] sm:$0xff] %v1135_v30  ;;  %1161 = vst [vmem:[%s1960_s5 + $0xa8] sm:$0xff] %v1137_v31 }
 0x214   :  { %v1097_v36 = vpop.f32.mrb[16].mxu1 }
 0x215   :  { %v1098_v37 = vadd.f32 %v1097_v36, %v706_v34  ;;  %v1099_v39 = vpop.f32.mrb[17].mxu1 }
 0x216   :  { %v1100_v40 = vadd.f32 %v1099_v39, %v710_v35  ;;  %v1101_v42 = vpop.f32.mrb[18].mxu1 }
 0x217   :  { %v1120_v43 = vmax.f32 %v1098_v37, 0.0  ;;  %v1102_v44 = vadd.f32 %v1101_v42, %v706_v34  ;;  %v1103_v29 = vpop.f32.mrb[19].mxu1 }
 0x218   :  { %v1121_v45 = vmax.f32 %v1100_v40, 0.0  ;;  %v1104_v46 = vadd.f32 %v1103_v29, %v710_v35 }
 0x219   :  { %1144 = vst [vmem:[%s1960_s5 + $0x20] sm:$0xff] %v1120_v43  ;;  %v1126_v47 = vmax.f32 %v1102_v44, 0.0 }
 0x21a   :  { %1145 = vst [vmem:[%s1960_s5 + $0x28] sm:$0xff] %v1121_v45  ;;  %v1127_v38 = vmax.f32 %v1104_v46, 0.0 }
 0x21b   :  { %1150 = vst [vmem:[%s1960_s5 + $0x50] sm:$0xff] %v1126_v47 }
 0x21c   :  { %1151 = vst [vmem:[%s1960_s5 + $0x58] sm:$0xff] %v1127_v38  ;;  %v1107_v41 = vpop.f32.mrb[20].mxu1 }
 0x21d   :  { %v1108_v48 = vadd.f32 %v1107_v41, %v706_v34  ;;  %v1109_v49 = vpop.f32.mrb[21].mxu1 }
 0x21e   :  { %v1110_v50 = vadd.f32 %v1109_v49, %v710_v35  ;;  %v1111_v51 = vpop.f32.mrb[22].mxu1 }
 0x21f   :  { %v1132_v52 = vmax.f32 %v1108_v48, 0.0  ;;  %v1112_v53 = vadd.f32 %v1111_v51, %v706_v34  ;;  %v1113_v54 = vpop.f32.mrb[23].mxu1 }
 0x220   :  { %v1133_v55 = vmax.f32 %v1110_v50, 0.0  ;;  %v1114_v56 = vadd.f32 %v1113_v54, %v710_v35 }
 0x221   :  { %1156 = vst [vmem:[%s1960_s5 + $0x80] sm:$0xff] %v1132_v52  ;;  %v1138_v57 = vmax.f32 %v1112_v53, 0.0 }
 0x222   :  { %1157 = vst [vmem:[%s1960_s5 + $0x88] sm:$0xff] %v1133_v55  ;;  %v1139_v58 = vmax.f32 %v1114_v56, 0.0 }
 0x223   :  { %1162 = vst [vmem:[%s1960_s5 + $0xb0] sm:$0xff] %v1138_v57 }
 0x224   :  { %1163 = vst [vmem:[%s1960_s5 + $0xb8] sm:$0xff] %v1139_v58 }

// kernel: autoencoder_forward.11
= control target key start
LH: loop header
LB: loop body
LE: loop exit
PB: predicated region body
PF: predicated region fallthrough
CT: control target
= control target key end

     0   :  { %s732_s1 = inlined_call_operand.vmem [shape: bf16[512,128], index: 1, kind: input, shape index: {}]   ;;  %s733_s0 = inlined_call_operand.vmem [shape: bf16[32,512], index: 0, kind: input, shape index: {}]   ;;  %s734_s2 = inlined_call_operand.vmem [shape: f32[1,128], index: 2, kind: input, shape index: {}]   ;;  %s735_s3 = inlined_call_operand.vmem [shape: f32[32,128], index: 3, kind: output, shape index: {}]  }
   0x1   :  { %v533_v0 = vld [vmem:[%s732_s1 + $0x40] sm:$0xff]   ;;  %v537_v4 = vld [vmem:[%s732_s1 + $0x48] sm:$0xff]   ;;  %v541_v8 = vld [vmem:[%s732_s1 + $0x50] sm:$0xff]  }
   0x2   :  { %v534_v1 = vld [vmem:[%s732_s1 + $0xc0] sm:$0xff]   ;;  %477 = vmatprep.subr.bf16.mxu0 %v533_v0  ;;  %v538_v5 = vld [vmem:[%s732_s1 + $0xc8] sm:$0xff]   ;;  %v542_v9 = vld [vmem:[%s732_s1 + $0xd0] sm:$0xff]  }
   0x3   :  { %v535_v2 = vld [vmem:[%s732_s1] sm:$0xff]   ;;  %505 = vmatprep.subr.bf16.mxu1 %v534_v1  ;;  %v539_v6 = vld [vmem:[%s732_s1 + $0x8] sm:$0xff]   ;;  %v543_v10 = vld [vmem:[%s732_s1 + $0x10] sm:$0xff]  }
   0x4   :  { %v536_v3 = vld [vmem:[%s732_s1 + $0x80] sm:$0xff]   ;;  %478 = vmatpush3.bf16.msra.mxu0 %v535_v2  ;;  %v540_v7 = vld [vmem:[%s732_s1 + $0x88] sm:$0xff]   ;;  %v544_v11 = vld [vmem:[%s732_s1 + $0x90] sm:$0xff]  }
   0x5   :  { %506 = vmatpush3.bf16.msra.mxu1 %v536_v3  ;;  %479 = vmatprep.subr.bf16.mxu0 %v537_v4  ;;  %v545_v12 = vld [vmem:[%s732_s1 + $0x58] sm:$0xff]   ;;  %v549_v16 = vld [vmem:[%s732_s1 + $0x60] sm:$0xff]   ;;  %v553_v20 = vld [vmem:[%s732_s1 + $0x68] sm:$0xff]  }
   0x6   :  { %507 = vmatprep.subr.bf16.mxu1 %v538_v5  ;;  %v546_v13 = vld [vmem:[%s732_s1 + $0xd8] sm:$0xff]   ;;  %v550_v17 = vld [vmem:[%s732_s1 + $0xe0] sm:$0xff]   ;;  %v554_v21 = vld [vmem:[%s732_s1 + $0xe8] sm:$0xff]  }
   0x7   :  { %v547_v14 = vld [vmem:[%s732_s1 + $0x18] sm:$0xff]   ;;  %v551_v18 = vld [vmem:[%s732_s1 + $0x20] sm:$0xff]   ;;  %v555_v22 = vld [vmem:[%s732_s1 + $0x28] sm:$0xff]  }
   0x8   :  { %480 = vmatpush3.bf16.msra.mxu0 %v539_v6  ;;  %v548_v15 = vld [vmem:[%s732_s1 + $0x98] sm:$0xff]   ;;  %v552_v19 = vld [vmem:[%s732_s1 + $0xa0] sm:$0xff]   ;;  %v556_v23 = vld [vmem:[%s732_s1 + $0xa8] sm:$0xff]  }
   0x9   :  { %508 = vmatpush3.bf16.msra.mxu1 %v540_v7  ;;  %481 = vmatprep.subr.bf16.mxu0 %v541_v8  ;;  %v557_v24 = vld [vmem:[%s732_s1 + $0x70] sm:$0xff]   ;;  %v561_v28 = vld [vmem:[%s732_s1 + $0x78] sm:$0xff]   ;;  %v436_v42 = vld [vmem:[%s734_s2] ss:$0 sm:$0xff] }
   0xa   :  { %509 = vmatprep.subr.bf16.mxu1 %v542_v9  ;;  %v558_v25 = vld [vmem:[%s732_s1 + $0xf0] sm:$0xff]   ;;  %v562_v29 = vld [vmem:[%s732_s1 + $0xf8] sm:$0xff]  }
   0xb   :  { %v559_v26 = vld [vmem:[%s732_s1 + $0x30] sm:$0xff]   ;;  %v563_v30 = vld [vmem:[%s732_s1 + $0x38] sm:$0xff]  }
   0xc   :  { %482 = vmatpush3.bf16.msra.mxu0 %v543_v10  ;;  %v560_v27 = vld [vmem:[%s732_s1 + $0xb0] sm:$0xff]   ;;  %v564_v31 = vld [vmem:[%s732_s1 + $0xb8] sm:$0xff]  }
   0xd   :  { %510 = vmatpush3.bf16.msra.mxu1 %v544_v11  ;;  %483 = vmatprep.subr.bf16.mxu0 %v545_v12  ;;  %v565_v32 = vld [vmem:[%s733_s0] ss:$16 sps:$4 sm:$0xff]   ;;  %v567_v33 = vld [vmem:[%s733_s0 + $0x4] ss:$16 sps:$4 sm:$0xff]   ;;  %v568_v34 = vld [vmem:[%s733_s0 + $0x8] ss:$16 sps:$4 sm:$0xff]  }
   0xe   :  { %511 = vmatprep.subr.bf16.mxu1 %v546_v13  ;;  %v570_v35 = vld [vmem:[%s733_s0 + $0xc] ss:$16 sps:$4 sm:$0xff]   ;;  %358 = vmatprep.mubr.bf16.mxu0 %v567_v33  ;;  %v571_v36 = vld [vmem:[%s733_s0 + $0x24] ss:$16 sps:$4 sm:$0xff]   ;;  %v575_v38 = vld [vmem:[%s733_s0 + $0x20] ss:$16 sps:$4 sm:$0xff]  }
   0xf   :  { %407 = vmatprep.mubr.bf16.mxu1 %v570_v35  ;;  %v573_v37 = vld [vmem:[%s733_s0 + $0x2c] ss:$16 sps:$4 sm:$0xff]   ;;  %v576_v39 = vld [vmem:[%s733_s0 + $0x28] ss:$16 sps:$4 sm:$0xff]  }
  0x10   :  { %484 = vmatpush3.bf16.msra.mxu0 %v547_v14 }
  0x11   :  { %512 = vmatpush3.bf16.msra.mxu1 %v548_v15  ;;  %485 = vmatprep.subr.bf16.mxu0 %v549_v16 }
  0x12   :  { %513 = vmatprep.subr.bf16.mxu1 %v550_v17 }
  0x14   :  { %486 = vmatpush3.bf16.msra.mxu0 %v551_v18 }
  0x15   :  { %514 = vmatpush3.bf16.msra.mxu1 %v552_v19  ;;  %487 = vmatprep.subr.bf16.mxu0 %v553_v20 }
  0x16   :  { %515 = vmatprep.subr.bf16.mxu1 %v554_v21 }
  0x18   :  { %488 = vmatpush3.bf16.msra.mxu0 %v555_v22 }
  0x19   :  { %516 = vmatpush3.bf16.msra.mxu1 %v556_v23  ;;  %489 = vmatprep.subr.bf16.mxu0 %v557_v24 }
  0x1a   :  { %517 = vmatprep.subr.bf16.mxu1 %v558_v25 }
  0x1c   :  { %490 = vmatpush3.bf16.msra.mxu0 %v559_v26 }
  0x1d   :  { %518 = vmatpush3.bf16.msra.mxu1 %v560_v27  ;;  %491 = vmatprep.subr.bf16.mxu0 %v561_v28 }
  0x1e   :  { %519 = vmatprep.subr.bf16.mxu1 %v562_v29 }
  0x20   :  { %492 = vmatpush3.bf16.msra.mxu0 %v563_v30 }
  0x21   :  { %520 = vmatpush3.bf16.msra.mxu1 %v564_v31 }
  0x23   :  { %359 = vmatmul.mubr.bf16.vlgmr.msra.gmra.mrb[0].mxu0 %v565_v32 }
  0x24   :  { %408 = vmatmul.mubr.bf16.vlgmr.msra.gmra.mrb[0].mxu1 %v568_v34  ;;  %366 = vmatprep.mubr.bf16.mxu0 %v571_v36 }
  0x25   :  { %415 = vmatprep.mubr.bf16.mxu1 %v573_v37 }
  0x2b   :  { %367 = vmatmul.mubr.bf16.gmra.mrb[4].mxu0 %v575_v38 }
  0x2c   :  { %416 = vmatmul.mubr.bf16.gmra.mrb[4].mxu1 %v576_v39 }
  0xf6   :  { %v493_v40 = vpop.f32.mrb[0].mxu0 }
  0xf7   :  { %v521_v41 = vpop.f32.mrb[0].mxu1  ;;  %v494_v43 = vpop.f32.mrb[1].mxu0 }
  0xf8   :  { %v495_v44 = vadd.f32 %v494_v43, %v493_v40  ;;  %v522_v45 = vpop.f32.mrb[1].mxu1  ;;  %v496_v46 = vpop.f32.mrb[2].mxu0 }
  0xf9   :  { %v523_v47 = vadd.f32 %v522_v45, %v521_v41  ;;  %v524_v48 = vpop.f32.mrb[2].mxu1  ;;  %v497_v49 = vpop.f32.mrb[3].mxu0 }
  0xfa   :  { %v361_v50 = vadd.f32 %v495_v44, %v436_v42  ;;  %v498_v51 = vadd.f32 %v497_v49, %v496_v46  ;;  %v525_v52 = vpop.f32.mrb[3].mxu1 }
  0xfb   :  { %v526_v53 = vadd.f32 %v525_v52, %v524_v48 }
  0xfc   :  { %v410_v54 = vadd.f32 %v523_v47, %v361_v50  ;;  %v364_v55 = vadd.f32 %v498_v51, %v436_v42 }
  0xfe   :  { %v424_v56 = vmax.f32 %v410_v54, 0.0  ;;  %v413_v57 = vadd.f32 %v526_v53, %v364_v55  ;;  %v499_v58 = vpop.f32.mrb[4].mxu0 }
  0xff   :  { %v527_v59 = vpop.f32.mrb[4].mxu1  ;;  %v500_v60 = vpop.f32.mrb[5].mxu0 }
 0x100   :  { %428 = vst [vmem:[%s735_s3] sm:$0xff] %v424_v56  ;;  %v425_v61 = vmax.f32 %v413_v57, 0.0  ;;  %v501_v62 = vadd.f32 %v500_v60, %v499_v58  ;;  %v528_v63 = vpop.f32.mrb[5].mxu1  ;;  %v502_v0 = vpop.f32.mrb[6].mxu0 }
 0x101   :  { %v529_v1 = vadd.f32 %v528_v63, %v527_v59  ;;  %v530_v2 = vpop.f32.mrb[6].mxu1  ;;  %v503_v3 = vpop.f32.mrb[7].mxu0 }
 0x102   :  { %429 = vst [vmem:[%s735_s3 + $0x8] sm:$0xff] %v425_v61  ;;  %v369_v4 = vadd.f32 %v501_v62, %v436_v42  ;;  %v504_v5 = vadd.f32 %v503_v3, %v502_v0  ;;  %v531_v6 = vpop.f32.mrb[7].mxu1 }
 0x103   :  { %v532_v7 = vadd.f32 %v531_v6, %v530_v2 }
 0x104   :  { %v418_v8 = vadd.f32 %v529_v1, %v369_v4  ;;  %v372_v9 = vadd.f32 %v504_v5, %v436_v42 }
 0x106   :  { %v426_v10 = vmax.f32 %v418_v8, 0.0  ;;  %v421_v11 = vadd.f32 %v532_v7, %v372_v9 }
 0x108   :  { %430 = vst [vmem:[%s735_s3 + $0x10] sm:$0xff] %v426_v10  ;;  %v427_v12 = vmax.f32 %v421_v11, 0.0 }
 0x10a   :  { %431 = vst [vmem:[%s735_s3 + $0x18] sm:$0xff] %v427_v12 }

// kernel: autoencoder_forward.13
= control target key start
LH: loop header
LB: loop body
LE: loop exit
PB: predicated region body
PF: predicated region fallthrough
CT: control target
= control target key end

     0   :  { %s1770_s1 = inlined_call_operand.vmem [shape: bf16[128,128], index: 1, kind: input, shape index: {}]   ;;  %s1771_s0 = inlined_call_operand.vmem [shape: bf16[512,128], index: 0, kind: input, shape index: {}]   ;;  %s1772_s2 = inlined_call_operand.vmem [shape: f32[1,128], index: 2, kind: input, shape index: {}]   ;;  %s1773_s3 = inlined_call_operand.vmem [shape: f32[512,128], index: 3, kind: output, shape index: {}]  }
   0x1   :  { %v1132_v0 = vld [vmem:[%s1770_s1] sm:$0xff]   ;;  %v1133_v1 = vld [vmem:[%s1770_s1 + $0x8] sm:$0xff]   ;;  %v1134_v2 = vld [vmem:[%s1770_s1 + $0x10] sm:$0xff]  }
   0x2   :  { %1036 = vmatprep.subr.bf16.mxu0 %v1132_v0  ;;  %1116 = vmatprep.subr.bf16.mxu1 %v1132_v0  ;;  %v1135_v3 = vld [vmem:[%s1770_s1 + $0x18] sm:$0xff]   ;;  %v1140_v4 = vld [vmem:[%s1771_s0] sm:$0xff]   ;;  %v1137_v7 = vld [vmem:[%s1770_s1 + $0x28] sm:$0xff]  }
   0x3   :  { %1037 = vmatpush3.bf16.msra.mxu0 %v1132_v0  ;;  %1124 = vmatpush3.bf16.msra.mxu1 %v1132_v0  ;;  %v1141_v5 = vld [vmem:[%s1771_s0 + $0x80] sm:$0xff]   ;;  %v1138_v8 = vld [vmem:[%s1770_s1 + $0x30] sm:$0xff]   ;;  %v1139_v9 = vld [vmem:[%s1770_s1 + $0x38] sm:$0xff]  }
   0x4   :  { %1038 = vmatprep.subr.bf16.mxu0 %v1133_v1  ;;  %1117 = vmatprep.subr.bf16.mxu1 %v1133_v1  ;;  %v1136_v6 = vld [vmem:[%s1770_s1 + $0x20] sm:$0xff]   ;;  %v1142_v10 = vld [vmem:[%s1771_s0 + $0x8] sm:$0xff]   ;;  %v1144_v12 = vld [vmem:[%s1771_s0 + $0x10] sm:$0xff]  }
   0x5   :  { %1052 = vmatprep.mubr.bf16.mxu0 %v1140_v4  ;;  %1084 = vmatprep.mubr.bf16.mxu1 %v1141_v5  ;;  %v1143_v11 = vld [vmem:[%s1771_s0 + $0x88] sm:$0xff]   ;;  %v1145_v13 = vld [vmem:[%s1771_s0 + $0x90] sm:$0xff]   ;;  %v1146_v14 = vld [vmem:[%s1771_s0 + $0x18] sm:$0xff]  }
   0x6   :  { %v1147_v15 = vld [vmem:[%s1771_s0 + $0x98] sm:$0xff]   ;;  %v1148_v16 = vld [vmem:[%s1771_s0 + $0x20] sm:$0xff]   ;;  %v1150_v18 = vld [vmem:[%s1771_s0 + $0x28] sm:$0xff]  }
   0x7   :  { %1039 = vmatpush3.bf16.msra.mxu0 %v1133_v1  ;;  %1125 = vmatpush3.bf16.msra.mxu1 %v1133_v1  ;;  %v1149_v17 = vld [vmem:[%s1771_s0 + $0xa0] sm:$0xff]   ;;  %v1151_v19 = vld [vmem:[%s1771_s0 + $0xa8] sm:$0xff]   ;;  %v1152_v20 = vld [vmem:[%s1771_s0 + $0x30] sm:$0xff]  }
   0x8   :  { %1040 = vmatprep.subr.bf16.mxu0 %v1134_v2  ;;  %1118 = vmatprep.subr.bf16.mxu1 %v1134_v2  ;;  %v1153_v21 = vld [vmem:[%s1771_s0 + $0xb0] sm:$0xff]   ;;  %v1154_v22 = vld [vmem:[%s1771_s0 + $0x38] sm:$0xff]   ;;  %v1156_v24 = vld [vmem:[%s1771_s0 + $0x40] sm:$0xff]  }
   0x9   :  { %v1155_v23 = vld [vmem:[%s1771_s0 + $0xb8] sm:$0xff]   ;;  %v1157_v25 = vld [vmem:[%s1771_s0 + $0xc0] sm:$0xff]   ;;  %v1158_v26 = vld [vmem:[%s1771_s0 + $0x48] sm:$0xff]  }
   0xa   :  { %v1159_v27 = vld [vmem:[%s1771_s0 + $0xc8] sm:$0xff]   ;;  %v1160_v28 = vld [vmem:[%s1771_s0 + $0x50] sm:$0xff]   ;;  %v1162_v30 = vld [vmem:[%s1771_s0 + $0x58] sm:$0xff]  }
   0xb   :  { %1041 = vmatpush3.bf16.msra.mxu0 %v1134_v2  ;;  %1126 = vmatpush3.bf16.msra.mxu1 %v1134_v2  ;;  %v1161_v29 = vld [vmem:[%s1771_s0 + $0xd0] sm:$0xff]   ;;  %v1163_v31 = vld [vmem:[%s1771_s0 + $0xd8] sm:$0xff]   ;;  %v1164_v32 = vld [vmem:[%s1771_s0 + $0x60] sm:$0xff]  }
   0xc   :  { %1042 = vmatprep.subr.bf16.mxu0 %v1135_v3  ;;  %1119 = vmatprep.subr.bf16.mxu1 %v1135_v3  ;;  %v1165_v33 = vld [vmem:[%s1771_s0 + $0xe0] sm:$0xff]   ;;  %v1166_v34 = vld [vmem:[%s1771_s0 + $0x68] sm:$0xff]   ;;  %v1168_v36 = vld [vmem:[%s1771_s0 + $0x70] sm:$0xff]  }
   0xd   :  { %v1167_v35 = vld [vmem:[%s1771_s0 + $0xe8] sm:$0xff]   ;;  %v1169_v37 = vld [vmem:[%s1771_s0 + $0xf0] sm:$0xff]   ;;  %v1170_v38 = vld [vmem:[%s1771_s0 + $0x78] sm:$0xff]  }
   0xe   :  { %v1171_v39 = vld [vmem:[%s1771_s0 + $0xf8] sm:$0xff]   ;;  %v1443_v40 = vld [vmem:[%s1772_s2] ss:$0 sm:$0xff] }
   0xf   :  { %1043 = vmatpush3.bf16.msra.mxu0 %v1135_v3  ;;  %1127 = vmatpush3.bf16.msra.mxu1 %v1135_v3 }
  0x10   :  { %1044 = vmatprep.subr.bf16.mxu0 %v1136_v6  ;;  %1120 = vmatprep.subr.bf16.mxu1 %v1136_v6 }
  0x13   :  { %1045 = vmatpush3.bf16.msra.mxu0 %v1136_v6  ;;  %1128 = vmatpush3.bf16.msra.mxu1 %v1136_v6 }
  0x14   :  { %1046 = vmatprep.subr.bf16.mxu0 %v1137_v7  ;;  %1121 = vmatprep.subr.bf16.mxu1 %v1137_v7 }
  0x17   :  { %1047 = vmatpush3.bf16.msra.mxu0 %v1137_v7  ;;  %1129 = vmatpush3.bf16.msra.mxu1 %v1137_v7 }
  0x18   :  { %1048 = vmatprep.subr.bf16.mxu0 %v1138_v8  ;;  %1122 = vmatprep.subr.bf16.mxu1 %v1138_v8 }
  0x1b   :  { %1049 = vmatpush3.bf16.msra.mxu0 %v1138_v8  ;;  %1130 = vmatpush3.bf16.msra.mxu1 %v1138_v8 }
  0x1c   :  { %1050 = vmatprep.subr.bf16.mxu0 %v1139_v9  ;;  %1123 = vmatprep.subr.bf16.mxu1 %v1139_v9 }
  0x1f   :  { %1051 = vmatpush3.bf16.msra.mxu0 %v1139_v9  ;;  %1131 = vmatpush3.bf16.msra.mxu1 %v1139_v9 }
  0x22   :  { %1053 = vmatmul.mubr.bf16.vlgmr.msra.gmra.mrb[0].mxu0 %v1142_v10  ;;  %1085 = vmatmul.mubr.bf16.vlgmr.msra.gmra.mrb[0].mxu1 %v1143_v11 }
  0x23   :  { %1056 = vmatprep.mubr.bf16.mxu0 %v1144_v12  ;;  %1088 = vmatprep.mubr.bf16.mxu1 %v1145_v13 }
  0x2a   :  { %1057 = vmatmul.mubr.bf16.gmra.mrb[4].mxu0 %v1146_v14  ;;  %1089 = vmatmul.mubr.bf16.gmra.mrb[4].mxu1 %v1147_v15 }
  0x2b   :  { %1060 = vmatprep.mubr.bf16.mxu0 %v1148_v16  ;;  %1092 = vmatprep.mubr.bf16.mxu1 %v1149_v17 }
  0x32   :  { %1061 = vmatmul.mubr.bf16.gmra.mrb[8].mxu0 %v1150_v18  ;;  %1093 = vmatmul.mubr.bf16.gmra.mrb[8].mxu1 %v1151_v19 }
  0x33   :  { %1064 = vmatprep.mubr.bf16.mxu0 %v1152_v20  ;;  %1096 = vmatprep.mubr.bf16.mxu1 %v1153_v21 }
  0x3a   :  { %1065 = vmatmul.mubr.bf16.gmra.mrb[12].mxu0 %v1154_v22  ;;  %1097 = vmatmul.mubr.bf16.gmra.mrb[12].mxu1 %v1155_v23 }
  0x3b   :  { %1068 = vmatprep.mubr.bf16.mxu0 %v1156_v24  ;;  %1100 = vmatprep.mubr.bf16.mxu1 %v1157_v25 }
  0x42   :  { %1069 = vmatmul.mubr.bf16.gmra.mrb[16].mxu0 %v1158_v26  ;;  %1101 = vmatmul.mubr.bf16.gmra.mrb[16].mxu1 %v1159_v27 }
  0x43   :  { %1072 = vmatprep.mubr.bf16.mxu0 %v1160_v28  ;;  %1104 = vmatprep.mubr.bf16.mxu1 %v1161_v29 }
  0x4a   :  { %1073 = vmatmul.mubr.bf16.gmra.mrb[20].mxu0 %v1162_v30  ;;  %1105 = vmatmul.mubr.bf16.gmra.mrb[20].mxu1 %v1163_v31 }
  0x4b   :  { %1076 = vmatprep.mubr.bf16.mxu0 %v1164_v32  ;;  %1108 = vmatprep.mubr.bf16.mxu1 %v1165_v33 }
  0x52   :  { %1077 = vmatmul.mubr.bf16.gmra.mrb[24].mxu0 %v1166_v34  ;;  %1109 = vmatmul.mubr.bf16.gmra.mrb[24].mxu1 %v1167_v35 }
  0x53   :  { %1080 = vmatprep.mubr.bf16.mxu0 %v1168_v36  ;;  %1112 = vmatprep.mubr.bf16.mxu1 %v1169_v37 }
  0x5a   :  { %1081 = vmatmul.mubr.bf16.gmra.mrb[28].mxu0 %v1170_v38  ;;  %1113 = vmatmul.mubr.bf16.gmra.mrb[28].mxu1 %v1171_v39 }
  0xf5   :  { %v1054_v41 = vpop.f32.mrb[0].mxu0  ;;  %v1086_v42 = vpop.f32.mrb[0].mxu1 }
  0xf6   :  { %v385_v43 = vadd.f32 %v1054_v41, %v1443_v40  ;;  %v513_v44 = vadd.f32 %v1086_v42, %v1443_v40  ;;  %v376_v45 = vpop.f32.mrb[1].mxu0  ;;  %v504_v46 = vpop.f32.mrb[1].mxu1 }
  0xf7   :  { %v377_v47 = vadd.f32 %v1443_v40, %v376_v45  ;;  %v505_v48 = vadd.f32 %v1443_v40, %v504_v46  ;;  %v1055_v49 = vpop.f32.mrb[2].mxu0  ;;  %v1087_v50 = vpop.f32.mrb[2].mxu1 }
  0xf8   :  { %v633_v51 = vmul.f32 0.5, %v385_v43  ;;  %v665_v52 = vmul.f32 0.5, %v513_v44  ;;  %v388_v53 = vadd.f32 %v1055_v49, %v1443_v40  ;;  %v516_v54 = vadd.f32 %v1087_v50, %v1443_v40  ;;  %v379_v55 = vpop.f32.mrb[3].mxu0  ;;  %v507_v56 = vpop.f32.mrb[3].mxu1 }
  0xf9   :  { %v631_v57 = vmul.f32 0.5, %v377_v47  ;;  %v663_v58 = vmul.f32 0.5, %v505_v48  ;;  %v380_v59 = vadd.f32 %v1443_v40, %v379_v55  ;;  %v508_v60 = vadd.f32 %v1443_v40, %v507_v56 }
  0xfa   :  { %1172 = vtanh.f32 %v633_v51  ;;  %v634_v61 = vmul.f32 0.5, %v388_v53  ;;  %v666_v62 = vmul.f32 0.5, %v516_v54 }
  0xfb   :  { %1174 = vtanh.f32 %v665_v52  ;;  %v632_v63 = vmul.f32 0.5, %v380_v59  ;;  %v664_v0 = vmul.f32 0.5, %v508_v60 }
  0xfc   :  { %1176 = vtanh.f32 %v631_v57 }
  0xfd   :  { %1178 = vtanh.f32 %v663_v58  ;;  %v1058_v1 = vpop.f32.mrb[4].mxu0  ;;  %v1090_v2 = vpop.f32.mrb[4].mxu1 }
  0xfe   :  { %1180 = vtanh.f32 %v634_v61  ;;  %v401_v3 = vadd.f32 %v1058_v1, %v1443_v40  ;;  %v529_v4 = vadd.f32 %v1090_v2, %v1443_v40  ;;  %v392_v5 = vpop.f32.mrb[5].mxu0  ;;  %v520_v6 = vpop.f32.mrb[5].mxu1 }
  0xff   :  { %1182 = vtanh.f32 %v666_v62  ;;  %v393_v7 = vadd.f32 %v1443_v40, %v392_v5  ;;  %v521_v8 = vadd.f32 %v1443_v40, %v520_v6  ;;  %v1059_v9 = vpop.f32.mrb[6].mxu0  ;;  %v1091_v10 = vpop.f32.mrb[6].mxu1 }
 0x100   :  { %1184 = vtanh.f32 %v632_v63  ;;  %v637_v11 = vmul.f32 0.5, %v401_v3  ;;  %v669_v12 = vmul.f32 0.5, %v529_v4  ;;  %v404_v13 = vadd.f32 %v1059_v9, %v1443_v40  ;;  %v395_v14 = vpop.f32.mrb[7].mxu0  ;;  %v523_v15 = vpop.f32.mrb[7].mxu1 }
 0x101   :  { %1186 = vtanh.f32 %v664_v0  ;;  %v635_v16 = vmul.f32 0.5, %v393_v7  ;;  %v667_v17 = vmul.f32 0.5, %v521_v8  ;;  %v532_v18 = vadd.f32 %v1091_v10, %v1443_v40 }
 0x102   :  { %1188 = vtanh.f32 %v637_v11  ;;  %v638_v19 = vmul.f32 0.5, %v404_v13  ;;  %v396_v20 = vadd.f32 %v1443_v40, %v395_v14  ;;  %v524_v21 = vadd.f32 %v1443_v40, %v523_v15 }
 0x103   :  { %1190 = vtanh.f32 %v669_v12  ;;  %v670_v22 = vmul.f32 0.5, %v532_v18 }
 0x104   :  { %v1173_v23 = vpop.eup %1172  ;;  %1192 = vtanh.f32 %v635_v16  ;;  %v636_v24 = vmul.f32 0.5, %v396_v20  ;;  %v668_v27 = vmul.f32 0.5, %v524_v21 }
 0x105   :  { %v1175_v25 = vpop.eup %1174  ;;  %v761_v26 = vmul.f32 0.5, %v1173_v23  ;;  %1194 = vtanh.f32 %v667_v17  ;;  %v1062_v28 = vpop.f32.mrb[8].mxu0 }
 0x106   :  { %v1094_v29 = vpop.f32.mrb[8].mxu1  ;;  %v1177_v30 = vpop.eup %1176  ;;  %v793_v31 = vmul.f32 0.5, %v1175_v25  ;;  %1196 = vtanh.f32 %v638_v19  ;;  %v417_v32 = vadd.f32 %v1062_v28, %v1443_v40 }
 0x107   :  { %v545_v33 = vadd.f32 %v1094_v29, %v1443_v40  ;;  %v408_v34 = vpop.f32.mrb[9].mxu0  ;;  %v536_v35 = vpop.f32.mrb[9].mxu1  ;;  %v825_v37 = vadd.f32 0.5, %v761_v26  ;;  %v759_v38 = vmul.f32 0.5, %v1177_v30  ;;  %1198 = vtanh.f32 %v670_v22 }
 0x108   :  { %v1179_v36 = vpop.eup %1178  ;;  %v409_v39 = vadd.f32 %v1443_v40, %v408_v34  ;;  %v1063_v41 = vpop.f32.mrb[10].mxu0  ;;  %v857_v44 = vadd.f32 0.5, %v793_v31  ;;  %1200 = vtanh.f32 %v636_v24  ;;  %v641_v46 = vmul.f32 0.5, %v417_v32 }
 0x109   :  { %v1095_v42 = vpop.f32.mrb[10].mxu1  ;;  %v1181_v43 = vpop.eup %1180  ;;  %v791_v45 = vmul.f32 0.5, %v1179_v36  ;;  %889 = vst [vmem:[%s1773_s3 + $0x10] sm:$0xff] %v825_v37  ;;  %v823_v50 = vadd.f32 0.5, %v759_v38  ;;  %1202 = vtanh.f32 %v668_v27  ;;  %v673_v52 = vmul.f32 0.5, %v545_v33 }
 0x10a   :  { %v411_v47 = vpop.f32.mrb[11].mxu0  ;;  %v539_v48 = vpop.f32.mrb[11].mxu1  ;;  %v762_v51 = vmul.f32 0.5, %v1181_v43  ;;  %921 = vst [vmem:[%s1773_s3 + $0x110] sm:$0xff] %v857_v44  ;;  %1204 = vtanh.f32 %v641_v46  ;;  %v639_v56 = vmul.f32 0.5, %v409_v39  ;;  %v537_v60 = vadd.f32 %v1443_v40, %v536_v35 }
 0x10b   :  { %v1183_v49 = vpop.eup %1182  ;;  %v855_v54 = vadd.f32 0.5, %v791_v45  ;;  %887 = vst [vmem:[%s1773_s3] sm:$0xff] %v823_v50  ;;  %1206 = vtanh.f32 %v673_v52  ;;  %v420_v0 = vadd.f32 %v1063_v41, %v1443_v40  ;;  %v548_v5 = vadd.f32 %v1095_v42, %v1443_v40 }
 0x10c   :  { %v1185_v53 = vpop.eup %1184  ;;  %v794_v55 = vmul.f32 0.5, %v1183_v49  ;;  %v826_v58 = vadd.f32 0.5, %v762_v51  ;;  %1208 = vtanh.f32 %v639_v56  ;;  %v671_v4 = vmul.f32 0.5, %v537_v60 }
 0x10d   :  { %v1187_v57 = vpop.eup %1186  ;;  %v760_v59 = vmul.f32 0.5, %v1185_v53  ;;  %919 = vst [vmem:[%s1773_s3 + $0x100] sm:$0xff] %v855_v54  ;;  %v1066_v6 = vpop.f32.mrb[12].mxu0  ;;  %v642_v11 = vmul.f32 0.5, %v420_v0  ;;  %v412_v12 = vadd.f32 %v1443_v40, %v411_v47  ;;  %v674_v18 = vmul.f32 0.5, %v548_v5 }
 0x10e   :  { %v1189_v61 = vpop.eup %1188  ;;  %v858_v62 = vadd.f32 0.5, %v794_v55  ;;  %v792_v63 = vmul.f32 0.5, %v1187_v57  ;;  %890 = vst [vmem:[%s1773_s3 + $0x18] sm:$0xff] %v826_v58  ;;  %v1098_v7 = vpop.f32.mrb[12].mxu1  ;;  %1210 = vtanh.f32 %v671_v4  ;;  %v540_v30 = vadd.f32 %v1443_v40, %v539_v48 }
 0x10f   :  { %v1191_v1 = vpop.eup %1190  ;;  %v824_v2 = vadd.f32 0.5, %v760_v59  ;;  %v765_v3 = vmul.f32 0.5, %v1189_v61  ;;  %v424_v13 = vpop.f32.mrb[13].mxu0  ;;  %1212 = vtanh.f32 %v642_v11  ;;  %v640_v24 = vmul.f32 0.5, %v412_v12 }
 0x110   :  { %v1193_v8 = vpop.eup %1192  ;;  %922 = vst [vmem:[%s1773_s3 + $0x118] sm:$0xff] %v858_v62  ;;  %v856_v9 = vadd.f32 0.5, %v792_v63  ;;  %v797_v10 = vmul.f32 0.5, %v1191_v1  ;;  %v552_v14 = vpop.f32.mrb[13].mxu1  ;;  %1214 = vtanh.f32 %v674_v18  ;;  %v433_v34 = vadd.f32 %v1066_v6, %v1443_v40 }
 0x111   :  { %v1195_v15 = vpop.eup %1194  ;;  %888 = vst [vmem:[%s1773_s3 + $0x8] sm:$0xff] %v824_v2  ;;  %v829_v16 = vadd.f32 0.5, %v765_v3  ;;  %v763_v17 = vmul.f32 0.5, %v1193_v8  ;;  %v1067_v19 = vpop.f32.mrb[14].mxu0  ;;  %1216 = vtanh.f32 %v640_v24  ;;  %v672_v38 = vmul.f32 0.5, %v540_v30 }
 0x112   :  { %v1099_v20 = vpop.f32.mrb[14].mxu1  ;;  %v1197_v21 = vpop.eup %1196  ;;  %920 = vst [vmem:[%s1773_s3 + $0x108] sm:$0xff] %v856_v9  ;;  %v861_v22 = vadd.f32 0.5, %v797_v10  ;;  %v795_v23 = vmul.f32 0.5, %v1195_v15  ;;  %v561_v39 = vadd.f32 %v1098_v7, %v1443_v40  ;;  %v645_v44 = vmul.f32 0.5, %v433_v34 }
 0x113   :  { %v427_v25 = vpop.f32.mrb[15].mxu0  ;;  %v555_v26 = vpop.f32.mrb[15].mxu1  ;;  %893 = vst [vmem:[%s1773_s3 + $0x30] sm:$0xff] %v829_v16  ;;  %v827_v28 = vadd.f32 0.5, %v763_v17  ;;  %v766_v29 = vmul.f32 0.5, %v1197_v21  ;;  %v425_v45 = vadd.f32 %v1443_v40, %v424_v13  ;;  %1218 = vtanh.f32 %v672_v38 }
 0x114   :  { %v1199_v27 = vpop.eup %1198  ;;  %925 = vst [vmem:[%s1773_s3 + $0x130] sm:$0xff] %v861_v22  ;;  %v859_v32 = vadd.f32 0.5, %v795_v23  ;;  %v677_v49 = vmul.f32 0.5, %v561_v39  ;;  %1220 = vtanh.f32 %v645_v44  ;;  %v553_v60 = vadd.f32 %v1443_v40, %v552_v14 }
 0x115   :  { %v1201_v31 = vpop.eup %1200  ;;  %v798_v33 = vmul.f32 0.5, %v1199_v27  ;;  %891 = vst [vmem:[%s1773_s3 + $0x20] sm:$0xff] %v827_v28  ;;  %v830_v36 = vadd.f32 0.5, %v766_v29  ;;  %v1070_v50 = vpop.f32.mrb[16].mxu0  ;;  %v643_v55 = vmul.f32 0.5, %v425_v45  ;;  %v436_v0 = vadd.f32 %v1067_v19, %v1443_v40 }
 0x116   :  { %v1203_v35 = vpop.eup %1202  ;;  %v764_v37 = vmul.f32 0.5, %v1201_v31  ;;  %923 = vst [vmem:[%s1773_s3 + $0x120] sm:$0xff] %v859_v32  ;;  %v1102_v51 = vpop.f32.mrb[16].mxu1  ;;  %1222 = vtanh.f32 %v677_v49  ;;  %v564_v1 = vadd.f32 %v1099_v20, %v1443_v40  ;;  %v675_v6 = vmul.f32 0.5, %v553_v60 }
 0x117   :  { %v1205_v41 = vpop.eup %1204  ;;  %v862_v42 = vadd.f32 0.5, %v798_v33  ;;  %v796_v43 = vmul.f32 0.5, %v1203_v35  ;;  %894 = vst [vmem:[%s1773_s3 + $0x38] sm:$0xff] %v830_v36  ;;  %v440_v56 = vpop.f32.mrb[17].mxu0  ;;  %1224 = vtanh.f32 %v643_v55  ;;  %v428_v7 = vadd.f32 %v1443_v40, %v427_v25 }
 0x118   :  { %v1207_v46 = vpop.eup %1206  ;;  %v828_v47 = vadd.f32 0.5, %v764_v37  ;;  %v769_v48 = vmul.f32 0.5, %v1205_v41  ;;  %v568_v57 = vpop.f32.mrb[17].mxu1  ;;  %v556_v8 = vadd.f32 %v1443_v40, %v555_v26  ;;  %v646_v11 = vmul.f32 0.5, %v436_v0 }
 0x119   :  { %v1209_v52 = vpop.eup %1208  ;;  %926 = vst [vmem:[%s1773_s3 + $0x138] sm:$0xff] %v862_v42  ;;  %v860_v53 = vadd.f32 0.5, %v796_v43  ;;  %v801_v54 = vmul.f32 0.5, %v1207_v46  ;;  %v1071_v61 = vpop.f32.mrb[18].mxu0  ;;  %v678_v12 = vmul.f32 0.5, %v564_v1  ;;  %v449_v13 = vadd.f32 %v1070_v50, %v1443_v40 }
 0x11a   :  { %892 = vst [vmem:[%s1773_s3 + $0x28] sm:$0xff] %v828_v47  ;;  %v833_v58 = vadd.f32 0.5, %v769_v48  ;;  %v767_v59 = vmul.f32 0.5, %v1209_v52  ;;  %v1518_v62 = vpop.f32.mrb[18].mxu1  ;;  %v1525_v2 = vpop.f32.mrb[19].mxu0  ;;  %1226 = vtanh.f32 %v675_v6  ;;  %v644_v16 = vmul.f32 0.5, %v428_v7 }
 0x11b   :  { %924 = vst [vmem:[%s1773_s3 + $0x128] sm:$0xff] %v860_v53  ;;  %v865_v63 = vadd.f32 0.5, %v801_v54  ;;  %v1527_v3 = vpop.f32.mrb[19].mxu1  ;;  %v1211_v4 = vpop.eup %1210  ;;  %v676_v17 = vmul.f32 0.5, %v556_v8  ;;  %1228 = vtanh.f32 %v646_v11  ;;  %v649_v21 = vmul.f32 0.5, %v449_v13 }
 0x11c   :  { %897 = vst [vmem:[%s1773_s3 + $0x50] sm:$0xff] %v833_v58  ;;  %v831_v5 = vadd.f32 0.5, %v767_v59  ;;  %v1213_v9 = vpop.eup %1212  ;;  %v799_v10 = vmul.f32 0.5, %v1211_v4  ;;  %1230 = vtanh.f32 %v678_v12  ;;  %v577_v24 = vadd.f32 %v1102_v51, %v1443_v40 }
 0x11d   :  { %929 = vst [vmem:[%s1773_s3 + $0x150] sm:$0xff] %v865_v63  ;;  %v1215_v14 = vpop.eup %1214  ;;  %v770_v15 = vmul.f32 0.5, %v1213_v9  ;;  %v1074_v25 = vpop.f32.mrb[20].mxu0  ;;  %1232 = vtanh.f32 %v644_v16  ;;  %v441_v28 = vadd.f32 %v1443_v40, %v440_v56  ;;  %v569_v29 = vadd.f32 %v1443_v40, %v568_v57 }
 0x11e   :  { %895 = vst [vmem:[%s1773_s3 + $0x40] sm:$0xff] %v831_v5  ;;  %v1217_v18 = vpop.eup %1216  ;;  %v863_v19 = vadd.f32 0.5, %v799_v10  ;;  %v802_v20 = vmul.f32 0.5, %v1215_v14  ;;  %v1106_v26 = vpop.f32.mrb[20].mxu1  ;;  %1234 = vtanh.f32 %v676_v17  ;;  %v681_v34 = vmul.f32 0.5, %v577_v24 }
 0x11f   :  { %v834_v22 = vadd.f32 0.5, %v770_v15  ;;  %v768_v23 = vmul.f32 0.5, %v1217_v18  ;;  %v456_v30 = vpop.f32.mrb[21].mxu0  ;;  %v584_v31 = vpop.f32.mrb[21].mxu1  ;;  %v452_v35 = vadd.f32 %v1071_v61, %v1443_v40  ;;  %1236 = vtanh.f32 %v649_v21 }
 0x120   :  { %927 = vst [vmem:[%s1773_s3 + $0x140] sm:$0xff] %v863_v19  ;;  %v866_v27 = vadd.f32 0.5, %v802_v20  ;;  %v1219_v32 = vpop.eup %1218  ;;  %v1551_v36 = vpop.f32.mrb[22].mxu0  ;;  %v647_v41 = vmul.f32 0.5, %v441_v28  ;;  %v679_v42 = vmul.f32 0.5, %v569_v29  ;;  %1238 = vtanh.f32 %v681_v34 }
 0x121   :  { %898 = vst [vmem:[%s1773_s3 + $0x58] sm:$0xff] %v834_v22  ;;  %v832_v33 = vadd.f32 0.5, %v768_v23  ;;  %v1553_v37 = vpop.f32.mrb[22].mxu1  ;;  %v1221_v38 = vpop.eup %1220  ;;  %v800_v39 = vmul.f32 0.5, %v1219_v32  ;;  %v650_v47 = vmul.f32 0.5, %v452_v35  ;;  %v580_v48 = vadd.f32 %v1518_v62, %v1443_v40 }
 0x122   :  { %930 = vst [vmem:[%s1773_s3 + $0x158] sm:$0xff] %v866_v27  ;;  %v1558_v43 = vpop.f32.mrb[23].mxu0  ;;  %v1560_v44 = vpop.f32.mrb[23].mxu1  ;;  %v773_v46 = vmul.f32 0.5, %v1221_v38  ;;  %1240 = vtanh.f32 %v647_v41  ;;  %v444_v52 = vadd.f32 %v1443_v40, %v1525_v2  ;;  %v572_v58 = vadd.f32 %v1443_v40, %v1527_v3 }
 0x123   :  { %v1223_v45 = vpop.eup %1222  ;;  %896 = vst [vmem:[%s1773_s3 + $0x48] sm:$0xff] %v832_v33  ;;  %v864_v50 = vadd.f32 0.5, %v800_v39  ;;  %1242 = vtanh.f32 %v679_v42  ;;  %v682_v55 = vmul.f32 0.5, %v580_v48  ;;  %v465_v61 = vadd.f32 %v1074_v25, %v1443_v40 }
 0x124   :  { %v1225_v49 = vpop.eup %1224  ;;  %v805_v51 = vmul.f32 0.5, %v1223_v45  ;;  %v837_v53 = vadd.f32 0.5, %v773_v46  ;;  %1244 = vtanh.f32 %v650_v47  ;;  %v648_v57 = vmul.f32 0.5, %v444_v52 }
 0x125   :  { %v771_v54 = vmul.f32 0.5, %v1225_v49  ;;  %928 = vst [vmem:[%s1773_s3 + $0x148] sm:$0xff] %v864_v50  ;;  %v1227_v59 = vpop.eup %1226  ;;  %1246 = vtanh.f32 %v682_v55  ;;  %v593_v62 = vadd.f32 %v1106_v26, %v1443_v40  ;;  %v1579_v63 = vpop.f32.mrb[24].mxu0  ;;  %v680_v3 = vmul.f32 0.5, %v572_v58 }
 0x126   :  { %v869_v56 = vadd.f32 0.5, %v805_v51  ;;  %901 = vst [vmem:[%s1773_s3 + $0x70] sm:$0xff] %v837_v53  ;;  %v1581_v0 = vpop.f32.mrb[24].mxu1  ;;  %v1229_v1 = vpop.eup %1228  ;;  %v803_v2 = vmul.f32 0.5, %v1227_v59  ;;  %1248 = vtanh.f32 %v648_v57  ;;  %v457_v4 = vadd.f32 %v1443_v40, %v456_v30 }
 0x127   :  { %v835_v60 = vadd.f32 0.5, %v771_v54  ;;  %v1587_v5 = vpop.f32.mrb[25].mxu0  ;;  %v1589_v6 = vpop.f32.mrb[25].mxu1  ;;  %v774_v8 = vmul.f32 0.5, %v1229_v1  ;;  %v653_v9 = vmul.f32 0.5, %v465_v61  ;;  %v685_v10 = vmul.f32 0.5, %v593_v62 }
 0x128   :  { %933 = vst [vmem:[%s1773_s3 + $0x170] sm:$0xff] %v869_v56  ;;  %v1231_v7 = vpop.eup %1230  ;;  %v585_v11 = vadd.f32 %v1443_v40, %v584_v31  ;;  %v1595_v12 = vpop.f32.mrb[26].mxu0  ;;  %v867_v15 = vadd.f32 0.5, %v803_v2  ;;  %1250 = vtanh.f32 %v680_v3  ;;  %v651_v17 = vmul.f32 0.5, %v457_v4 }
 0x129   :  { %899 = vst [vmem:[%s1773_s3 + $0x60] sm:$0xff] %v835_v60  ;;  %v1597_v13 = vpop.f32.mrb[26].mxu1  ;;  %v1233_v14 = vpop.eup %1232  ;;  %v806_v16 = vmul.f32 0.5, %v1231_v7  ;;  %v838_v21 = vadd.f32 0.5, %v774_v8  ;;  %1252 = vtanh.f32 %v653_v9  ;;  %v468_v27 = vadd.f32 %v1551_v36, %v1443_v40 }
 0x12a   :  { %v1599_v18 = vpop.f32.mrb[27].mxu0  ;;  %v1601_v19 = vpop.f32.mrb[27].mxu1  ;;  %v772_v22 = vmul.f32 0.5, %v1233_v14  ;;  %v683_v23 = vmul.f32 0.5, %v585_v11  ;;  %931 = vst [vmem:[%s1773_s3 + $0x160] sm:$0xff] %v867_v15  ;;  %1254 = vtanh.f32 %v685_v10  ;;  %v596_v31 = vadd.f32 %v1553_v37, %v1443_v40 }
 0x12b   :  { %v1235_v20 = vpop.eup %1234  ;;  %v870_v25 = vadd.f32 0.5, %v806_v16  ;;  %902 = vst [vmem:[%s1773_s3 + $0x78] sm:$0xff] %v838_v21  ;;  %1256 = vtanh.f32 %v651_v17  ;;  %v654_v35 = vmul.f32 0.5, %v468_v27  ;;  %v460_v37 = vadd.f32 %v1443_v40, %v1558_v43 }
 0x12c   :  { %v1237_v24 = vpop.eup %1236  ;;  %v804_v26 = vmul.f32 0.5, %v1235_v20  ;;  %v836_v29 = vadd.f32 0.5, %v772_v22  ;;  %1258 = vtanh.f32 %v683_v23  ;;  %v686_v41 = vmul.f32 0.5, %v596_v31 }
 0x12d   :  { %v1239_v28 = vpop.eup %1238  ;;  %v777_v30 = vmul.f32 0.5, %v1237_v24  ;;  %934 = vst [vmem:[%s1773_s3 + $0x178] sm:$0xff] %v870_v25  ;;  %v1621_v42 = vpop.f32.mrb[28].mxu0  ;;  %1260 = vtanh.f32 %v654_v35  ;;  %v588_v49 = vadd.f32 %v1443_v40, %v1560_v44  ;;  %v652_v54 = vmul.f32 0.5, %v460_v37 }
 0x12e   :  { %v1241_v32 = vpop.eup %1240  ;;  %v868_v33 = vadd.f32 0.5, %v804_v26  ;;  %v809_v34 = vmul.f32 0.5, %v1239_v28  ;;  %900 = vst [vmem:[%s1773_s3 + $0x68] sm:$0xff] %v836_v29  ;;  %v1623_v45 = vpop.f32.mrb[28].mxu1  ;;  %1262 = vtanh.f32 %v686_v41  ;;  %v481_v60 = vadd.f32 %v1579_v63, %v1443_v40 }
 0x12f   :  { %v1243_v36 = vpop.eup %1242  ;;  %v841_v38 = vadd.f32 0.5, %v777_v30  ;;  %v775_v39 = vmul.f32 0.5, %v1241_v32  ;;  %v1630_v50 = vpop.f32.mrb[29].mxu0  ;;  %v684_v59 = vmul.f32 0.5, %v588_v49  ;;  %1264 = vtanh.f32 %v652_v54 }
 0x130   :  { %v1245_v46 = vpop.eup %1244  ;;  %932 = vst [vmem:[%s1773_s3 + $0x168] sm:$0xff] %v868_v33  ;;  %v873_v47 = vadd.f32 0.5, %v809_v34  ;;  %v807_v48 = vmul.f32 0.5, %v1243_v36  ;;  %v1632_v51 = vpop.f32.mrb[29].mxu1  ;;  %v609_v3 = vadd.f32 %v1581_v0, %v1443_v40  ;;  %v657_v7 = vmul.f32 0.5, %v481_v60 }
 0x131   :  { %v1247_v43 = vpop.eup %1246  ;;  %905 = vst [vmem:[%s1773_s3 + $0x90] sm:$0xff] %v841_v38  ;;  %v839_v52 = vadd.f32 0.5, %v775_v39  ;;  %v778_v53 = vmul.f32 0.5, %v1245_v46  ;;  %v1637_v55 = vpop.f32.mrb[30].mxu0  ;;  %1266 = vtanh.f32 %v684_v59  ;;  %v473_v8 = vadd.f32 %v1443_v40, %v1587_v5 }
 0x132   :  { %v1639_v56 = vpop.f32.mrb[30].mxu1  ;;  %v1249_v57 = vpop.eup %1248  ;;  %937 = vst [vmem:[%s1773_s3 + $0x190] sm:$0xff] %v873_v47  ;;  %v871_v44 = vadd.f32 0.5, %v807_v48  ;;  %v810_v58 = vmul.f32 0.5, %v1247_v43  ;;  %v689_v14 = vmul.f32 0.5, %v609_v3  ;;  %v601_v0 = vadd.f32 %v1443_v40, %v1589_v6 }
 0x133   :  { %v1646_v61 = vpop.f32.mrb[31].mxu0  ;;  %v1648_v62 = vpop.f32.mrb[31].mxu1  ;;  %903 = vst [vmem:[%s1773_s3 + $0x80] sm:$0xff] %v839_v52  ;;  %v842_v1 = vadd.f32 0.5, %v778_v53  ;;  %v776_v2 = vmul.f32 0.5, %v1249_v57  ;;  %1268 = vtanh.f32 %v657_v7  ;;  %v655_v17 = vmul.f32 0.5, %v473_v8 }
 0x134   :  { %v1251_v4 = vpop.eup %1250  ;;  %935 = vst [vmem:[%s1773_s3 + $0x180] sm:$0xff] %v871_v44  ;;  %v874_v63 = vadd.f32 0.5, %v810_v58  ;;  %v484_v5 = vadd.f32 %v1595_v12, %v1443_v40  ;;  %1270 = vtanh.f32 %v689_v14  ;;  %v687_v6 = vmul.f32 0.5, %v601_v0 }
 0x135   :  { %v1253_v9 = vpop.eup %1252  ;;  %906 = vst [vmem:[%s1773_s3 + $0x98] sm:$0xff] %v842_v1  ;;  %v840_v10 = vadd.f32 0.5, %v776_v2  ;;  %v808_v11 = vmul.f32 0.5, %v1251_v4  ;;  %1272 = vtanh.f32 %v655_v17  ;;  %v612_v28 = vadd.f32 %v1597_v13, %v1443_v40 }
 0x136   :  { %v1255_v15 = vpop.eup %1254  ;;  %938 = vst [vmem:[%s1773_s3 + $0x198] sm:$0xff] %v874_v63  ;;  %v781_v16 = vmul.f32 0.5, %v1253_v9  ;;  %v658_v26 = vmul.f32 0.5, %v484_v5  ;;  %1274 = vtanh.f32 %v687_v6  ;;  %v476_v31 = vadd.f32 %v1443_v40, %v1599_v18 }
 0x137   :  { %v1257_v20 = vpop.eup %1256  ;;  %904 = vst [vmem:[%s1773_s3 + $0x88] sm:$0xff] %v840_v10  ;;  %v872_v21 = vadd.f32 0.5, %v808_v11  ;;  %v813_v22 = vmul.f32 0.5, %v1255_v15  ;;  %v604_v32 = vadd.f32 %v1443_v40, %v1601_v19  ;;  %v690_v35 = vmul.f32 0.5, %v612_v28 }
 0x138   :  { %v1259_v23 = vpop.eup %1258  ;;  %v845_v24 = vadd.f32 0.5, %v781_v16  ;;  %v779_v25 = vmul.f32 0.5, %v1257_v20  ;;  %1276 = vtanh.f32 %v658_v26  ;;  %v497_v36 = vadd.f32 %v1621_v42, %v1443_v40 }
 0x139   :  { %936 = vst [vmem:[%s1773_s3 + $0x188] sm:$0xff] %v872_v21  ;;  %v877_v27 = vadd.f32 0.5, %v813_v22  ;;  %v811_v12 = vmul.f32 0.5, %v1259_v23  ;;  %v1261_v29 = vpop.eup %1260  ;;  %v656_v18 = vmul.f32 0.5, %v476_v31  ;;  %v688_v39 = vmul.f32 0.5, %v604_v32 }
 0x13a   :  { %909 = vst [vmem:[%s1773_s3 + $0xb0] sm:$0xff] %v845_v24  ;;  %v843_v30 = vadd.f32 0.5, %v779_v25  ;;  %v1263_v33 = vpop.eup %1262  ;;  %v782_v13 = vmul.f32 0.5, %v1261_v29  ;;  %v625_v19 = vadd.f32 %v1623_v45, %v1443_v40  ;;  %1278 = vtanh.f32 %v690_v35 }
 0x13b   :  { %941 = vst [vmem:[%s1773_s3 + $0x1b0] sm:$0xff] %v877_v27  ;;  %v875_v34 = vadd.f32 0.5, %v811_v12  ;;  %v814_v38 = vmul.f32 0.5, %v1263_v33  ;;  %v1265_v41 = vpop.eup %1264  ;;  %v661_v46 = vmul.f32 0.5, %v497_v36  ;;  %v489_v42 = vadd.f32 %v1443_v40, %v1630_v50 }
 0x13c   :  { %907 = vst [vmem:[%s1773_s3 + $0xa0] sm:$0xff] %v843_v30  ;;  %v846_v37 = vadd.f32 0.5, %v782_v13  ;;  %v1267_v47 = vpop.eup %1266  ;;  %v780_v49 = vmul.f32 0.5, %v1265_v41  ;;  %1280 = vtanh.f32 %v656_v18  ;;  %v693_v43 = vmul.f32 0.5, %v625_v19 }
 0x13d   :  { %939 = vst [vmem:[%s1773_s3 + $0x1a0] sm:$0xff] %v875_v34  ;;  %v878_v48 = vadd.f32 0.5, %v814_v38  ;;  %v812_v45 = vmul.f32 0.5, %v1267_v47  ;;  %1282 = vtanh.f32 %v688_v39  ;;  %v659_v52 = vmul.f32 0.5, %v489_v42  ;;  %v1269_v54 = vpop.eup %1268 }
 0x13e   :  { %910 = vst [vmem:[%s1773_s3 + $0xb8] sm:$0xff] %v846_v37  ;;  %v617_v53 = vadd.f32 %v1443_v40, %v1632_v51  ;;  %v844_v50 = vadd.f32 0.5, %v780_v49  ;;  %1284 = vtanh.f32 %v661_v46  ;;  %v500_v57 = vadd.f32 %v1637_v55, %v1443_v40  ;;  %v1271_v58 = vpop.eup %1270 }
 0x13f   :  { %942 = vst [vmem:[%s1773_s3 + $0x1b8] sm:$0xff] %v878_v48  ;;  %v628_v44 = vadd.f32 %v1639_v56, %v1443_v40  ;;  %v876_v59 = vadd.f32 0.5, %v812_v45  ;;  %v785_v60 = vmul.f32 0.5, %v1269_v54  ;;  %1286 = vtanh.f32 %v693_v43  ;;  %v1273_v2 = vpop.eup %1272 }
 0x140   :  { %v691_v1 = vmul.f32 0.5, %v617_v53  ;;  %908 = vst [vmem:[%s1773_s3 + $0xa8] sm:$0xff] %v844_v50  ;;  %v817_v51 = vmul.f32 0.5, %v1271_v58  ;;  %1288 = vtanh.f32 %v659_v52  ;;  %v662_v3 = vmul.f32 0.5, %v500_v57  ;;  %v1275_v63 = vpop.eup %1274 }
 0x141   :  { %v694_v4 = vmul.f32 0.5, %v628_v44  ;;  %940 = vst [vmem:[%s1773_s3 + $0x1a8] sm:$0xff] %v876_v59  ;;  %v849_v55 = vadd.f32 0.5, %v785_v60  ;;  %v783_v56 = vmul.f32 0.5, %v1273_v2  ;;  %v492_v7 = vadd.f32 %v1443_v40, %v1646_v61 }
 0x142   :  { %1290 = vtanh.f32 %v691_v1  ;;  %v1277_v8 = vpop.eup %1276  ;;  %v881_v9 = vadd.f32 0.5, %v817_v51  ;;  %v815_v10 = vmul.f32 0.5, %v1275_v63  ;;  %v620_v11 = vadd.f32 %v1443_v40, %v1648_v62 }
 0x143   :  { %1292 = vtanh.f32 %v662_v3  ;;  %913 = vst [vmem:[%s1773_s3 + $0xd0] sm:$0xff] %v849_v55  ;;  %v847_v14 = vadd.f32 0.5, %v783_v56  ;;  %v786_v0 = vmul.f32 0.5, %v1277_v8  ;;  %v660_v15 = vmul.f32 0.5, %v492_v7 }
 0x144   :  { %1294 = vtanh.f32 %v694_v4  ;;  %945 = vst [vmem:[%s1773_s3 + $0x1d0] sm:$0xff] %v881_v9  ;;  %v879_v61 = vadd.f32 0.5, %v815_v10  ;;  %v692_v16 = vmul.f32 0.5, %v620_v11  ;;  %v1279_v17 = vpop.eup %1278 }
 0x145   :  { %911 = vst [vmem:[%s1773_s3 + $0xc0] sm:$0xff] %v847_v14  ;;  %v850_v40 = vadd.f32 0.5, %v786_v0  ;;  %1296 = vtanh.f32 %v660_v15  ;;  %v818_v5 = vmul.f32 0.5, %v1279_v17 }
 0x146   :  { %v1281_v62 = vpop.eup %1280  ;;  %943 = vst [vmem:[%s1773_s3 + $0x1c0] sm:$0xff] %v879_v61  ;;  %1298 = vtanh.f32 %v692_v16 }
 0x147   :  { %v1283_v20 = vpop.eup %1282  ;;  %914 = vst [vmem:[%s1773_s3 + $0xd8] sm:$0xff] %v850_v40  ;;  %v784_v21 = vmul.f32 0.5, %v1281_v62  ;;  %v882_v6 = vadd.f32 0.5, %v818_v5 }
 0x148   :  { %v1285_v22 = vpop.eup %1284  ;;  %v816_v23 = vmul.f32 0.5, %v1283_v20 }
 0x149   :  { %v1287_v24 = vpop.eup %1286  ;;  %v848_v25 = vadd.f32 0.5, %v784_v21  ;;  %v789_v26 = vmul.f32 0.5, %v1285_v22  ;;  %946 = vst [vmem:[%s1773_s3 + $0x1d8] sm:$0xff] %v882_v6 }
 0x14a   :  { %v1289_v27 = vpop.eup %1288  ;;  %v880_v12 = vadd.f32 0.5, %v816_v23  ;;  %v821_v28 = vmul.f32 0.5, %v1287_v24 }
 0x14b   :  { %912 = vst [vmem:[%s1773_s3 + $0xc8] sm:$0xff] %v848_v25  ;;  %v853_v30 = vadd.f32 0.5, %v789_v26  ;;  %v787_v31 = vmul.f32 0.5, %v1289_v27 }
 0x14c   :  { %v1291_v29 = vpop.eup %1290  ;;  %944 = vst [vmem:[%s1773_s3 + $0x1c8] sm:$0xff] %v880_v12  ;;  %v885_v33 = vadd.f32 0.5, %v821_v28 }
 0x14d   :  { %v1293_v32 = vpop.eup %1292  ;;  %v819_v34 = vmul.f32 0.5, %v1291_v29  ;;  %917 = vst [vmem:[%s1773_s3 + $0xf0] sm:$0xff] %v853_v30  ;;  %v851_v35 = vadd.f32 0.5, %v787_v31 }
 0x14e   :  { %v1295_v13 = vpop.eup %1294  ;;  %v790_v36 = vmul.f32 0.5, %v1293_v32  ;;  %949 = vst [vmem:[%s1773_s3 + $0x1f0] sm:$0xff] %v885_v33 }
 0x14f   :  { %v883_v38 = vadd.f32 0.5, %v819_v34  ;;  %v822_v18 = vmul.f32 0.5, %v1295_v13  ;;  %v1297_v39 = vpop.eup %1296  ;;  %915 = vst [vmem:[%s1773_s3 + $0xe0] sm:$0xff] %v851_v35 }
 0x150   :  { %v854_v19 = vadd.f32 0.5, %v790_v36  ;;  %v1299_v41 = vpop.eup %1298  ;;  %v788_v46 = vmul.f32 0.5, %v1297_v39 }
 0x151   :  { %947 = vst [vmem:[%s1773_s3 + $0x1e0] sm:$0xff] %v883_v38  ;;  %v886_v37 = vadd.f32 0.5, %v822_v18  ;;  %v820_v42 = vmul.f32 0.5, %v1299_v41 }
 0x152   :  { %918 = vst [vmem:[%s1773_s3 + $0xf8] sm:$0xff] %v854_v19  ;;  %v852_v47 = vadd.f32 0.5, %v788_v46 }
 0x153   :  { %950 = vst [vmem:[%s1773_s3 + $0x1f8] sm:$0xff] %v886_v37  ;;  %v884_v48 = vadd.f32 0.5, %v820_v42 }
 0x154   :  { %916 = vst [vmem:[%s1773_s3 + $0xe8] sm:$0xff] %v852_v47 }
 0x155   :  { %948 = vst [vmem:[%s1773_s3 + $0x1e8] sm:$0xff] %v884_v48 }

</bundles_post_ra>
